<compile_context>
chip_gen: v5e
topology: v5e:2x2
jax: 0.10.0
libtpu: 0.0.40
codegen_flags: <defaults>
</compile_context>

<pallas_src>
import functools
import math

import jax
import jax.numpy as jnp
from jax import lax
from jax.experimental import pallas as pl
from jax.experimental.pallas import tpu as pltpu

HIDDEN_DIM = 32          # hidden_dim == context_dim
PREVIEW = 4              # must be even, T % PREVIEW == 0
N_LAYER = 2              # number of conditional (coupling) layers
DATA_SCALE = 1.0
DATA_SHIFT = 0.0

_VMEM_LIMIT = 32 * 1024 * 1024   # safe on v5e/v6e/v7x for the tile sizes below


# --------------------------------------------------------------------------
# tiling helpers
# --------------------------------------------------------------------------
def _num_tensorcores():
    try:
        kind = jax.devices()[0].device_kind.lower()
        if "v7" in kind or "tpu7" in kind:
            return 2
    except Exception:
        pass
    return 1


def _pick_batch_tile(n):
    # Only split the batch for megacore (2 TCs) when each half still gives a
    # healthy matmul M; on single-TC chips splitting just serializes grid steps.
    if _num_tensorcores() >= 2 and n >= 256 and n % 16 == 0:
        return n // 2
    return n


def _pick_group_tile(g, bn):
    # groups per grid step, bounded so x + z blocks (double buffered) fit VMEM
    bn_rows = (bn + 7) // 8
    cap = max(1, min(g, 1024 // max(1, bn_rows), 256))
    for c in range(cap, 0, -1):
        if g % c == 0:
            return c
    return 1


def _full_block(arr):
    zeros = (0,) * arr.ndim
    return pl.BlockSpec(arr.shape, lambda *_: zeros)


# --------------------------------------------------------------------------
# Fused kernel: 3-layer LSTM + ContextNet head + coupling flow + N(0,1) logp
# --------------------------------------------------------------------------
def cflow_kernel(x_ref,
                 wih0_ref, whh0_ref, wih1_ref, whh1_ref, wih2_ref, whh2_ref,
                 b_ref, w1_ref, b1_ref, wo_ref, bo_ref,
                 wcond_ref, bcond_ref, why_ref, wst_ref, bst_ref,
                 wm2_ref, bm2_ref, scm_ref, ws2_ref, bs2_ref, scs_ref,
                 z_ref, stats_ref,
                 h_scr, c_scr,
                 *, preview, n_layer, flips, data_scale, data_shift):
    P = preview
    half = P // 2
    GB, BN, _ = x_ref.shape
    H = whh0_ref.shape[0]
    Hmu = wm2_ref.shape[0]

    # reset carried LSTM state / stats accumulator at sequence start
    @pl.when(pl.program_id(1) == 0)
    def _():
        h_scr[...] = jnp.zeros_like(h_scr)
        c_scr[...] = jnp.zeros_like(c_scr)
        stats_ref[...] = jnp.zeros_like(stats_ref)

    # ---- hoist loop-invariant loads / broadcasts out of the group loop ----
    wih0_b = jnp.broadcast_to(wih0_ref[...], (BN, 4 * H))
    whh0 = whh0_ref[...]
    wih1 = wih1_ref[...]
    whh1 = whh1_ref[...]
    wih2 = wih2_ref[...]
    whh2 = whh2_ref[...]
    b0_b = jnp.broadcast_to(b_ref[0], (BN, 4 * H))
    b1_b = jnp.broadcast_to(b_ref[1], (BN, 4 * H))
    b2_b = jnp.broadcast_to(b_ref[2], (BN, 4 * H))
    w1 = w1_ref[...]
    bl1 = b1_ref[...]
    wo = wo_ref[...]
    bo = bo_ref[...]
    wcond = wcond_ref[...]
    bcond = bcond_ref[...]
    why = why_ref[...]                      # (L, half, H)
    wst = wst_ref[...]                      # (L, H, 2*half) = [Ws | Wt]
    bst = bst_ref[...]                      # (L, 1, 2*half)
    wm2 = wm2_ref[...]
    bm2 = bm2_ref[...]
    scm = scm_ref[...]
    ws2 = ws2_ref[...]
    bs2 = bs2_ref[...]
    scs = scs_ref[...]

    use_vpu_y1 = half <= 4
    if use_vpu_y1:
        # (1, H) rows of the y1 projection, hoisted; K=half MXU push avoided
        why_rows = [[why[l, kk:kk + 1, :] for kk in range(half)]
                    for l in range(n_layer)]
    wst_l = [wst[l] for l in range(n_layer)]
    bst_l = [bst[l] for l in range(n_layer)]

    inv_scale = 1.0 / data_scale
    off_sg = n_layer * H
    off_mu = off_sg + H
    logp_const = -0.5 * P * math.log(2.0 * math.pi)

    def cell(gates, c):
        # gate columns pre-permuted to [i, f, o, g]:
        # one sigmoid over 3H lanes + one tanh over H lanes (2 EUP pushes)
        ifo = jax.nn.sigmoid(gates[:, :3 * H])
        i = ifo[:, 0 * H:1 * H]
        f = ifo[:, 1 * H:2 * H]
        o = ifo[:, 2 * H:3 * H]
        g = jnp.tanh(gates[:, 3 * H:])
        c_new = f * c + i * g
        return o * jnp.tanh(c_new), c_new

    def group_step(gi, carry):
        h1, c1, h2, c2, h3, c3, ljd_acc, lp_acc = carry
        xg = x_ref[gi]                                       # (BN, P)

        cond = None
        for j in range(P):                                   # static unroll
            x_t = xg[:, j:j + 1]                             # (BN, 1)
            # layer 0: K=1 input term on the VPU, recurrent term on the MXU
            g1 = x_t * wih0_b + jnp.dot(
                h1, whh0, preferred_element_type=jnp.float32) + b0_b
            h1n, c1 = cell(g1, c1)
            # layers 1/2: the Whh matmul only needs the PREVIOUS h, so it can
            # issue while the previous layer's cell math is still in flight.
            g2 = (jnp.dot(h2, whh1, preferred_element_type=jnp.float32)
                  + jnp.dot(h1n, wih1, preferred_element_type=jnp.float32)
                  + b1_b)
            h2n, c2 = cell(g2, c2)
            g3 = (jnp.dot(h3, whh2, preferred_element_type=jnp.float32)
                  + jnp.dot(h2n, wih2, preferred_element_type=jnp.float32)
                  + b2_b)
            h3n, c3 = cell(g3, c3)
            h1, h2, h3 = h1n, h2n, h3n
            if j == P - 2:
                # the only timestep whose ContextNet output survives the
                # right-shift + [P-1::P] selection done by forward()/f_()
                hid = jnp.tanh(jnp.dot(h3, w1,
                                       preferred_element_type=jnp.float32)
                               + bl1)
                cond = jnp.dot(hid, wo,
                               preferred_element_type=jnp.float32) + bo

        # ------------- flow for this preview group (cond in VMEM) -----------
        # one fused matmul for every cond consumer:
        #   [whc_0 | ... | whc_{L-1} | sigma_w1 | mu_w1 | zero-pad to 128]
        cf = jnp.dot(cond, wcond, preferred_element_type=jnp.float32) + bcond

        y = (xg - data_shift) * inv_scale
        a = y[:, :half]
        bh = y[:, half:]
        ljd = jnp.zeros((BN, 1), jnp.float32)

        for l in range(n_layer):                             # static unroll
            hc_l = cf[:, l * H:(l + 1) * H]
            y1, y2 = (bh, a) if flips[l] else (a, bh)
            if use_vpu_y1:
                h_pre = hc_l
                for kk in range(half):
                    h_pre = h_pre + y1[:, kk:kk + 1] * why_rows[l][kk]
            else:
                h_pre = jnp.dot(y1, why[l],
                                preferred_element_type=jnp.float32) + hc_l
            hid_l = jnp.tanh(h_pre)
            st = jnp.dot(hid_l, wst_l[l],
                         preferred_element_type=jnp.float32) + bst_l[l]
            s = jnp.tanh(st[:, :half])
            t = st[:, half:]
            y2n = y2 * jnp.exp(s) + t
            ljd = ljd + jnp.sum(s, axis=-1, keepdims=True)
            if flips[l]:
                a = y2n
            else:
                bh = y2n

        sg_h = jnp.tanh(cf[:, off_sg:off_sg + H])
        mu_h = jnp.tanh(cf[:, off_mu:off_mu + Hmu])
        mu = jnp.tanh(jnp.dot(mu_h, wm2,
                              preferred_element_type=jnp.float32) + bm2) * scm
        sg = jnp.abs(jnp.tanh(jnp.dot(sg_h, ws2,
                                      preferred_element_type=jnp.float32)
                              + bs2) * scs)

        z = (jnp.concatenate([a, bh], axis=-1) - mu) / sg
        z_ref[gi] = z
        lp = -0.5 * jnp.sum(z * z, axis=-1, keepdims=True) + logp_const
        return (h1, c1, h2, c2, h3, c3, ljd_acc + ljd, lp_acc + lp)

    zero_col = jnp.zeros((BN, 1), jnp.float32)
    carry0 = (h_scr[0], c_scr[0], h_scr[1], c_scr[1], h_scr[2], c_scr[2],
              zero_col, zero_col)
    unroll = 2 if (GB >= 2 and GB % 2 == 0) else 1
    h1, c1, h2, c2, h3, c3, ljd_acc, lp_acc = lax.fori_loop(
        0, GB, group_step, carry0, unroll=unroll)

    h_scr[0] = h1
    c_scr[0] = c1
    h_scr[1] = h2
    c_scr[1] = c2
    h_scr[2] = h3
    c_scr[2] = c3
    stats_ref[...] += jnp.concatenate([ljd_acc, lp_acc], axis=-1)


# --------------------------------------------------------------------------
# Weight preparation: gate re-order, fusion, lane padding
# --------------------------------------------------------------------------
def _prepare_weights(params):
    H = params["ctx_w1"].shape[0]
    n_layer = params["cpl_why"].shape[0]

    def reorder(w):  # (..., 4H): PyTorch (i,f,g,o) columns -> kernel (i,f,o,g)
        return jnp.concatenate(
            [w[..., :2 * H], w[..., 3 * H:4 * H], w[..., 2 * H:3 * H]], axis=-1)

    wih0 = reorder(params["lstm_wih0"])
    whh0 = reorder(params["lstm_whh"][0])
    wih1 = reorder(params["lstm_wih1"])
    whh1 = reorder(params["lstm_whh"][1])
    wih2 = reorder(params["lstm_wih2"])
    whh2 = reorder(params["lstm_whh"][2])
    b = reorder(params["lstm_b"])

    # fuse all cond consumers: [whc_0 | ... | whc_{L-1} | sg_w1 | mu_w1], pad to 128
    wcond = jnp.concatenate(
        [params["cpl_whc"][l] for l in range(n_layer)]
        + [params["sg_w1"], params["mu_w1"]], axis=1)
    bcond = jnp.concatenate(
        [params["cpl_bh"][l] for l in range(n_layer)]
        + [params["sg_b1"], params["mu_b1"]], axis=1)
    pad = (-wcond.shape[1]) % 128
    if pad:
        wcond = jnp.pad(wcond, ((0, 0), (0, pad)))
        bcond = jnp.pad(bcond, ((0, 0), (0, pad)))

    # fuse the s/t heads of every coupling layer
    wst = jnp.concatenate([params["cpl_ws"], params["cpl_wt"]], axis=2)
    bst = jnp.concatenate([params["cpl_bs"], params["cpl_bt"]], axis=2)

    return (wih0, whh0, wih1, whh1, wih2, whh2, b,
            params["ctx_w1"], params["ctx_b1"],
            params["ctx_wo"], params["ctx_bo"],
            wcond, bcond, params["cpl_why"], wst, bst,
            params["mu_w2"], params["mu_b2"], params["mu_scale"],
            params["sg_w2"], params["sg_b2"], params["sg_scale"])


# --------------------------------------------------------------------------
# Wrapper
# --------------------------------------------------------------------------
@jax.jit
def cflow_forward(params, x):
    """CFlow.forward: x (N, T) -> (z, log_prob_z, log_det_jac)."""
    if x.ndim == 1:
        x = x.reshape(1, -1)
    N, T = x.shape
    P = PREVIEW
    assert T % P == 0
    G = T // P
    H = params["ctx_w1"].shape[0]
    n_layer = int(params["cpl_why"].shape[0])

    weights = _prepare_weights(params)

    BN = _pick_batch_tile(N)
    GB = _pick_group_tile(G, BN)

    # group-major (G, N, P): lane dim = P, leading-dim indexing in the kernel
    x_gm = jnp.transpose(x.reshape(N, G, P), (1, 0, 2))

    kern = functools.partial(
        cflow_kernel,
        preview=P,
        n_layer=n_layer,
        flips=tuple(bool(i % 2) for i in range(n_layer)),
        data_scale=DATA_SCALE,
        data_shift=DATA_SHIFT)

    z_gm, stats = pl.pallas_call(
        kern,
        out_shape=(jax.ShapeDtypeStruct((G, N, P), jnp.float32),
                   jax.ShapeDtypeStruct((N, 2), jnp.float32)),
        grid=(N // BN, G // GB),
        in_specs=[pl.BlockSpec((GB, BN, P), lambda b, t: (t, b, 0))]
                 + [_full_block(w) for w in weights],
        out_specs=(pl.BlockSpec((GB, BN, P), lambda b, t: (t, b, 0)),
                   pl.BlockSpec((BN, 2), lambda b, t: (b, 0))),
        scratch_shapes=[pltpu.VMEM((3, BN, H), jnp.float32),   # h state
                        pltpu.VMEM((3, BN, H), jnp.float32)],  # c state
        compiler_params=pltpu.CompilerParams(
            dimension_semantics=("parallel", "arbitrary"),
            vmem_limit_bytes=_VMEM_LIMIT),
    )(x_gm, *weights)

    z = jnp.transpose(z_gm, (1, 0, 2)).reshape(N, T)
    log_det_jac = stats[:, 0] / G          # mean over preview groups
    log_prob_z = stats[:, 1] / T           # mean over all T latent elements
    return z, log_prob_z, log_det_jac


# --------------------------------------------------------------------------
# Deterministic parameter construction (mirrors CFlow.__init__ shapes)
# --------------------------------------------------------------------------
def init_params(key, hidden_dim=HIDDEN_DIM, preview=PREVIEW, n_layer=N_LAYER):
    H = hidden_dim
    Hc = hidden_dim            # context_dim == hidden_dim
    P = preview
    half = P // 2
    keys = iter(jax.random.split(key, 64))

    def nrm(shape):            # _init_weights: Linear weights ~ N(0, 0.06), bias = 0
        return 0.06 * jax.random.normal(next(keys), shape, dtype=jnp.float32)

    k = 1.0 / math.sqrt(H)     # PyTorch LSTM default init: U(-1/sqrt(H), 1/sqrt(H))

    def uni(shape):
        return jax.random.uniform(next(keys), shape, jnp.float32, -k, k)

    params = {
        # ContextNet: nn.LSTM(1, H, 3) — weights stored transposed (in, 4H),
        # gate columns in PyTorch (i, f, g, o) order (re-packed by wrapper)
        "lstm_wih0": uni((1, 4 * H)),
        "lstm_wih1": uni((H, 4 * H)),
        "lstm_wih2": uni((H, 4 * H)),
        "lstm_whh": uni((3, H, 4 * H)),
        "lstm_b": uni((3, 1, 4 * H)) + uni((3, 1, 4 * H)),      # b_ih + b_hh
        # ContextNet linear_one / out_layer
        "ctx_w1": nrm((H, H)), "ctx_b1": jnp.zeros((1, H), jnp.float32),
        "ctx_wo": nrm((H, Hc)), "ctx_bo": jnp.zeros((1, Hc), jnp.float32),
        # MomentNet mu: Linear(Hc, H//2) -> Linear(H//2, P), scale = ones
        "mu_w1": nrm((Hc, H // 2)), "mu_b1": jnp.zeros((1, H // 2), jnp.float32),
        "mu_w2": nrm((H // 2, P)), "mu_b2": jnp.zeros((1, P), jnp.float32),
        "mu_scale": jnp.ones((1, P), jnp.float32),
        # MomentNet sigma: Linear(Hc, H) -> Linear(H, P), scale = ones
        "sg_w1": nrm((Hc, H)), "sg_b1": jnp.zeros((1, H), jnp.float32),
        "sg_w2": nrm((H, P)), "sg_b2": jnp.zeros((1, P), jnp.float32),
        "sg_scale": jnp.ones((1, P), jnp.float32),
        # ConditionalLayer stack (affine coupling), stacked over n_layer
        "cpl_why": nrm((n_layer, half, H)),
        "cpl_whc": nrm((n_layer, Hc, H)),
        "cpl_bh": jnp.zeros((n_layer, 1, H), jnp.float32),
        "cpl_ws": nrm((n_layer, H, half)),
        "cpl_bs": jnp.zeros((n_layer, 1, half), jnp.float32),
        "cpl_wt": nrm((n_layer, H, half)),
        "cpl_bt": jnp.zeros((n_layer, 1, half), jnp.float32),
    }
    return params


if __name__ == "__main__":
    key = jax.random.PRNGKey(0)
    pkey, xkey = jax.random.split(key)
    params = init_params(pkey)

    N, T = 2, 8                                  # T % PREVIEW == 0
    x = jax.random.normal(xkey, (N, T), dtype=jnp.float32)

    z, log_prob_z, log_det_jac = cflow_forward(params, x)
    jax.block_until_ready((z, log_prob_z, log_det_jac))

    assert z.shape == (N, T)
    assert log_prob_z.shape == (N,)
    assert log_det_jac.shape == (N,)
    assert bool(jnp.all(jnp.isfinite(z)))
    assert bool(jnp.all(jnp.isfinite(log_prob_z)))
    assert bool(jnp.all(jnp.isfinite(log_det_jac)))
    print("KERNEL_OK")
</pallas_src>

<mosaic_0001>
module attributes {stable_mosaic.version = 11 : i64} {
  func.func @cflow_kernel(%arg0: i32, %arg1: i32, %arg2: memref<2x2x4xf32, #tpu.memory_space<vmem>>, %arg3: memref<1x128xf32, #tpu.memory_space<vmem>>, %arg4: memref<32x128xf32, #tpu.memory_space<vmem>>, %arg5: memref<32x128xf32, #tpu.memory_space<vmem>>, %arg6: memref<32x128xf32, #tpu.memory_space<vmem>>, %arg7: memref<32x128xf32, #tpu.memory_space<vmem>>, %arg8: memref<32x128xf32, #tpu.memory_space<vmem>>, %arg9: memref<3x1x128xf32, #tpu.memory_space<vmem>>, %arg10: memref<32x32xf32, #tpu.memory_space<vmem>>, %arg11: memref<1x32xf32, #tpu.memory_space<vmem>>, %arg12: memref<32x32xf32, #tpu.memory_space<vmem>>, %arg13: memref<1x32xf32, #tpu.memory_space<vmem>>, %arg14: memref<32x128xf32, #tpu.memory_space<vmem>>, %arg15: memref<1x128xf32, #tpu.memory_space<vmem>>, %arg16: memref<2x2x32xf32, #tpu.memory_space<vmem>>, %arg17: memref<2x32x4xf32, #tpu.memory_space<vmem>>, %arg18: memref<2x1x4xf32, #tpu.memory_space<vmem>>, %arg19: memref<16x4xf32, #tpu.memory_space<vmem>>, %arg20: memref<1x4xf32, #tpu.memory_space<vmem>>, %arg21: memref<1x4xf32, #tpu.memory_space<vmem>>, %arg22: memref<32x4xf32, #tpu.memory_space<vmem>>, %arg23: memref<1x4xf32, #tpu.memory_space<vmem>>, %arg24: memref<1x4xf32, #tpu.memory_space<vmem>>, %arg25: memref<2x2x4xf32, #tpu.memory_space<vmem>>, %arg26: memref<2x2xf32, #tpu.memory_space<vmem>>, %arg27: memref<3x2x32xf32, #tpu.memory_space<vmem>>, %arg28: memref<3x2x32xf32, #tpu.memory_space<vmem>>) attributes {dimension_semantics = [#tpu.dimension_semantics<parallel>, #tpu.dimension_semantics<arbitrary>], iteration_bounds = array<i64: 1, 1>, scalar_prefetch = 0 : i64, scratch_operands = 2 : i64, tpu.core_type = #tpu.core_type<tc>, window_params = [{transform_indices = @transform_0, window_bounds = array<i64: 2, 2, 4>}, {pipeline_mode = #tpu.pipeline_mode<synchronous>, transform_indices = @transform_1, window_bounds = array<i64: 1, 128>}, {pipeline_mode = #tpu.pipeline_mode<synchronous>, transform_indices = @transform_2, window_bounds = array<i64: 32, 128>}, {pipeline_mode = #tpu.pipeline_mode<synchronous>, transform_indices = @transform_3, window_bounds = array<i64: 32, 128>}, {pipeline_mode = #tpu.pipeline_mode<synchronous>, transform_indices = @transform_4, window_bounds = array<i64: 32, 128>}, {pipeline_mode = #tpu.pipeline_mode<synchronous>, transform_indices = @transform_5, window_bounds = array<i64: 32, 128>}, {pipeline_mode = #tpu.pipeline_mode<synchronous>, transform_indices = @transform_6, window_bounds = array<i64: 32, 128>}, {pipeline_mode = #tpu.pipeline_mode<synchronous>, transform_indices = @transform_7, window_bounds = array<i64: 3, 1, 128>}, {pipeline_mode = #tpu.pipeline_mode<synchronous>, transform_indices = @transform_8, window_bounds = array<i64: 32, 32>}, {pipeline_mode = #tpu.pipeline_mode<synchronous>, transform_indices = @transform_9, window_bounds = array<i64: 1, 32>}, {pipeline_mode = #tpu.pipeline_mode<synchronous>, transform_indices = @transform_10, window_bounds = array<i64: 32, 32>}, {pipeline_mode = #tpu.pipeline_mode<synchronous>, transform_indices = @transform_11, window_bounds = array<i64: 1, 32>}, {pipeline_mode = #tpu.pipeline_mode<synchronous>, transform_indices = @transform_12, window_bounds = array<i64: 32, 128>}, {pipeline_mode = #tpu.pipeline_mode<synchronous>, transform_indices = @transform_13, window_bounds = array<i64: 1, 128>}, {pipeline_mode = #tpu.pipeline_mode<synchronous>, transform_indices = @transform_14, window_bounds = array<i64: 2, 2, 32>}, {pipeline_mode = #tpu.pipeline_mode<synchronous>, transform_indices = @transform_15, window_bounds = array<i64: 2, 32, 4>}, {pipeline_mode = #tpu.pipeline_mode<synchronous>, transform_indices = @transform_16, window_bounds = array<i64: 2, 1, 4>}, {pipeline_mode = #tpu.pipeline_mode<synchronous>, transform_indices = @transform_17, window_bounds = array<i64: 16, 4>}, {pipeline_mode = #tpu.pipeline_mode<synchronous>, transform_indices = @transform_18, window_bounds = array<i64: 1, 4>}, {pipeline_mode = #tpu.pipeline_mode<synchronous>, transform_indices = @transform_19, window_bounds = array<i64: 1, 4>}, {pipeline_mode = #tpu.pipeline_mode<synchronous>, transform_indices = @transform_20, window_bounds = array<i64: 32, 4>}, {pipeline_mode = #tpu.pipeline_mode<synchronous>, transform_indices = @transform_21, window_bounds = array<i64: 1, 4>}, {pipeline_mode = #tpu.pipeline_mode<synchronous>, transform_indices = @transform_22, window_bounds = array<i64: 1, 4>}, {transform_indices = @transform_23, window_bounds = array<i64: 2, 2, 4>}, {transform_indices = @transform_24, window_bounds = array<i64: 2, 2>}]} {
    %c0_i32 = arith.constant 0 : i32
    %0 = arith.cmpi eq, %arg1, %c0_i32 : i32
    %1 = arith.extui %0 : i1 to i32
    %c0_i32_0 = arith.constant 0 : i32
    %2 = arith.cmpi ne, %1, %c0_i32_0 : i32
    scf.if %2 {
      %cst_195 = arith.constant 0.000000e+00 : f32
      %787 = vector.broadcast %cst_195 : f32 to vector<3x2x32xf32>
      %c0_196 = arith.constant 0 : index
      %c0_197 = arith.constant 0 : index
      %c0_198 = arith.constant 0 : index
      %788 = vector.load %arg27[%c0_196, %c0_197, %c0_198] : memref<3x2x32xf32, #tpu.memory_space<vmem>>, vector<3x2x32xf32>
      tpu.vector_store %arg27[%c0_196, %c0_197, %c0_198], %787 {strides = array<i32>} : memref<3x2x32xf32, #tpu.memory_space<vmem>>, vector<3x2x32xf32>,
      %cst_199 = arith.constant 0.000000e+00 : f32
      %789 = vector.broadcast %cst_199 : f32 to vector<3x2x32xf32>
      %c0_200 = arith.constant 0 : index
      %c0_201 = arith.constant 0 : index
      %c0_202 = arith.constant 0 : index
      %790 = vector.load %arg28[%c0_200, %c0_201, %c0_202] : memref<3x2x32xf32, #tpu.memory_space<vmem>>, vector<3x2x32xf32>
      tpu.vector_store %arg28[%c0_200, %c0_201, %c0_202], %789 {strides = array<i32>} : memref<3x2x32xf32, #tpu.memory_space<vmem>>, vector<3x2x32xf32>,
      %cst_203 = arith.constant 0.000000e+00 : f32
      %791 = vector.broadcast %cst_203 : f32 to vector<2x2xf32>
      %c0_204 = arith.constant 0 : index
      %c0_205 = arith.constant 0 : index
      %792 = vector.load %arg26[%c0_204, %c0_205] : memref<2x2xf32, #tpu.memory_space<vmem>>, vector<2x2xf32>
      tpu.vector_store %arg26[%c0_204, %c0_205], %791 {strides = array<i32>} : memref<2x2xf32, #tpu.memory_space<vmem>>, vector<2x2xf32>,
    } else {
    }
    %c0 = arith.constant 0 : index
    %c0_1 = arith.constant 0 : index
    %3 = vector.load %arg3[%c0, %c0_1] : memref<1x128xf32, #tpu.memory_space<vmem>>, vector<1x128xf32>
    %4 = vector.shape_cast %3 : vector<1x128xf32> to vector<1x128xf32>
    %5 = vector.broadcast %4 : vector<1x128xf32> to vector<2x128xf32>
    %c0_2 = arith.constant 0 : index
    %c0_3 = arith.constant 0 : index
    %6 = vector.load %arg4[%c0_2, %c0_3] : memref<32x128xf32, #tpu.memory_space<vmem>>, vector<32x128xf32>
    %c0_4 = arith.constant 0 : index
    %c0_5 = arith.constant 0 : index
    %7 = vector.load %arg5[%c0_4, %c0_5] : memref<32x128xf32, #tpu.memory_space<vmem>>, vector<32x128xf32>
    %c0_6 = arith.constant 0 : index
    %c0_7 = arith.constant 0 : index
    %8 = vector.load %arg6[%c0_6, %c0_7] : memref<32x128xf32, #tpu.memory_space<vmem>>, vector<32x128xf32>
    %c0_8 = arith.constant 0 : index
    %c0_9 = arith.constant 0 : index
    %9 = vector.load %arg7[%c0_8, %c0_9] : memref<32x128xf32, #tpu.memory_space<vmem>>, vector<32x128xf32>
    %c0_10 = arith.constant 0 : index
    %c0_11 = arith.constant 0 : index
    %10 = vector.load %arg8[%c0_10, %c0_11] : memref<32x128xf32, #tpu.memory_space<vmem>>, vector<32x128xf32>
    %c0_12 = arith.constant 0 : index
    %c0_13 = arith.constant 0 : index
    %c0_14 = arith.constant 0 : index
    %11 = vector.load %arg9[%c0_12, %c0_13, %c0_14] : memref<3x1x128xf32, #tpu.memory_space<vmem>>, vector<1x1x128xf32>
    %12 = vector.shape_cast %11 : vector<1x1x128xf32> to vector<1x128xf32>
    %13 = vector.shape_cast %12 : vector<1x128xf32> to vector<1x128xf32>
    %14 = vector.broadcast %13 : vector<1x128xf32> to vector<2x128xf32>
    %c1 = arith.constant 1 : index
    %c0_15 = arith.constant 0 : index
    %c0_16 = arith.constant 0 : index
    %15 = vector.load %arg9[%c1, %c0_15, %c0_16] : memref<3x1x128xf32, #tpu.memory_space<vmem>>, vector<1x1x128xf32>
    %16 = vector.shape_cast %15 : vector<1x1x128xf32> to vector<1x128xf32>
    %17 = vector.shape_cast %16 : vector<1x128xf32> to vector<1x128xf32>
    %18 = vector.broadcast %17 : vector<1x128xf32> to vector<2x128xf32>
    %c2 = arith.constant 2 : index
    %c0_17 = arith.constant 0 : index
    %c0_18 = arith.constant 0 : index
    %19 = vector.load %arg9[%c2, %c0_17, %c0_18] : memref<3x1x128xf32, #tpu.memory_space<vmem>>, vector<1x1x128xf32>
    %20 = vector.shape_cast %19 : vector<1x1x128xf32> to vector<1x128xf32>
    %21 = vector.shape_cast %20 : vector<1x128xf32> to vector<1x128xf32>
    %22 = vector.broadcast %21 : vector<1x128xf32> to vector<2x128xf32>
    %c0_19 = arith.constant 0 : index
    %c0_20 = arith.constant 0 : index
    %23 = vector.load %arg10[%c0_19, %c0_20] : memref<32x32xf32, #tpu.memory_space<vmem>>, vector<32x32xf32>
    %c0_21 = arith.constant 0 : index
    %c0_22 = arith.constant 0 : index
    %24 = vector.load %arg11[%c0_21, %c0_22] : memref<1x32xf32, #tpu.memory_space<vmem>>, vector<1x32xf32>
    %c0_23 = arith.constant 0 : index
    %c0_24 = arith.constant 0 : index
    %25 = vector.load %arg12[%c0_23, %c0_24] : memref<32x32xf32, #tpu.memory_space<vmem>>, vector<32x32xf32>
    %c0_25 = arith.constant 0 : index
    %c0_26 = arith.constant 0 : index
    %26 = vector.load %arg13[%c0_25, %c0_26] : memref<1x32xf32, #tpu.memory_space<vmem>>, vector<1x32xf32>
    %c0_27 = arith.constant 0 : index
    %c0_28 = arith.constant 0 : index
    %27 = vector.load %arg14[%c0_27, %c0_28] : memref<32x128xf32, #tpu.memory_space<vmem>>, vector<32x128xf32>
    %c0_29 = arith.constant 0 : index
    %c0_30 = arith.constant 0 : index
    %28 = vector.load %arg15[%c0_29, %c0_30] : memref<1x128xf32, #tpu.memory_space<vmem>>, vector<1x128xf32>
    %c0_31 = arith.constant 0 : index
    %c0_32 = arith.constant 0 : index
    %c0_33 = arith.constant 0 : index
    %29 = vector.load %arg16[%c0_31, %c0_32, %c0_33] : memref<2x2x32xf32, #tpu.memory_space<vmem>>, vector<2x2x32xf32>
    %c0_34 = arith.constant 0 : index
    %c0_35 = arith.constant 0 : index
    %c0_36 = arith.constant 0 : index
    %30 = vector.load %arg17[%c0_34, %c0_35, %c0_36] : memref<2x32x4xf32, #tpu.memory_space<vmem>>, vector<2x32x4xf32>
    %c0_37 = arith.constant 0 : index
    %c0_38 = arith.constant 0 : index
    %c0_39 = arith.constant 0 : index
    %31 = vector.load %arg18[%c0_37, %c0_38, %c0_39] : memref<2x1x4xf32, #tpu.memory_space<vmem>>, vector<2x1x4xf32>
    %c0_40 = arith.constant 0 : index
    %c0_41 = arith.constant 0 : index
    %32 = vector.load %arg19[%c0_40, %c0_41] : memref<16x4xf32, #tpu.memory_space<vmem>>, vector<16x4xf32>
    %c0_42 = arith.constant 0 : index
    %c0_43 = arith.constant 0 : index
    %33 = vector.load %arg20[%c0_42, %c0_43] : memref<1x4xf32, #tpu.memory_space<vmem>>, vector<1x4xf32>
    %c0_44 = arith.constant 0 : index
    %c0_45 = arith.constant 0 : index
    %34 = vector.load %arg21[%c0_44, %c0_45] : memref<1x4xf32, #tpu.memory_space<vmem>>, vector<1x4xf32>
    %c0_46 = arith.constant 0 : index
    %c0_47 = arith.constant 0 : index
    %35 = vector.load %arg22[%c0_46, %c0_47] : memref<32x4xf32, #tpu.memory_space<vmem>>, vector<32x4xf32>
    %c0_48 = arith.constant 0 : index
    %c0_49 = arith.constant 0 : index
    %36 = vector.load %arg23[%c0_48, %c0_49] : memref<1x4xf32, #tpu.memory_space<vmem>>, vector<1x4xf32>
    %c0_50 = arith.constant 0 : index
    %c0_51 = arith.constant 0 : index
    %37 = vector.load %arg24[%c0_50, %c0_51] : memref<1x4xf32, #tpu.memory_space<vmem>>, vector<1x4xf32>
    %38 = vector.extract_strided_slice %29 {offsets = [0, 0, 0], sizes = [1, 1, 32], strides = [1, 1, 1]} : vector<2x2x32xf32> to vector<1x1x32xf32>
    %39 = vector.shape_cast %38 : vector<1x1x32xf32> to vector<1x32xf32>
    %40 = vector.extract_strided_slice %29 {offsets = [0, 1, 0], sizes = [1, 1, 32], strides = [1, 1, 1]} : vector<2x2x32xf32> to vector<1x1x32xf32>
    %41 = vector.shape_cast %40 : vector<1x1x32xf32> to vector<1x32xf32>
    %42 = vector.extract_strided_slice %29 {offsets = [1, 0, 0], sizes = [1, 1, 32], strides = [1, 1, 1]} : vector<2x2x32xf32> to vector<1x1x32xf32>
    %43 = vector.shape_cast %42 : vector<1x1x32xf32> to vector<1x32xf32>
    %44 = vector.extract_strided_slice %29 {offsets = [1, 1, 0], sizes = [1, 1, 32], strides = [1, 1, 1]} : vector<2x2x32xf32> to vector<1x1x32xf32>
    %45 = vector.shape_cast %44 : vector<1x1x32xf32> to vector<1x32xf32>
    %46 = vector.extract_strided_slice %30 {offsets = [0, 0, 0], sizes = [1, 32, 4], strides = [1, 1, 1]} : vector<2x32x4xf32> to vector<1x32x4xf32>
    %47 = vector.shape_cast %46 : vector<1x32x4xf32> to vector<32x4xf32>
    %48 = vector.extract_strided_slice %30 {offsets = [1, 0, 0], sizes = [1, 32, 4], strides = [1, 1, 1]} : vector<2x32x4xf32> to vector<1x32x4xf32>
    %49 = vector.shape_cast %48 : vector<1x32x4xf32> to vector<32x4xf32>
    %50 = vector.extract_strided_slice %31 {offsets = [0, 0, 0], sizes = [1, 1, 4], strides = [1, 1, 1]} : vector<2x1x4xf32> to vector<1x1x4xf32>
    %51 = vector.shape_cast %50 : vector<1x1x4xf32> to vector<1x4xf32>
    %52 = vector.extract_strided_slice %31 {offsets = [1, 0, 0], sizes = [1, 1, 4], strides = [1, 1, 1]} : vector<2x1x4xf32> to vector<1x1x4xf32>
    %53 = vector.shape_cast %52 : vector<1x1x4xf32> to vector<1x4xf32>
    %cst = arith.constant 0.000000e+00 : f32
    %54 = vector.broadcast %cst : f32 to vector<2x1xf32>
    %c0_52 = arith.constant 0 : index
    %c0_53 = arith.constant 0 : index
    %c0_54 = arith.constant 0 : index
    %55 = vector.load %arg27[%c0_52, %c0_53, %c0_54] : memref<3x2x32xf32, #tpu.memory_space<vmem>>, vector<1x2x32xf32>
    %56 = vector.shape_cast %55 : vector<1x2x32xf32> to vector<2x32xf32>
    %c0_55 = arith.constant 0 : index
    %c0_56 = arith.constant 0 : index
    %c0_57 = arith.constant 0 : index
    %57 = vector.load %arg28[%c0_55, %c0_56, %c0_57] : memref<3x2x32xf32, #tpu.memory_space<vmem>>, vector<1x2x32xf32>
    %58 = vector.shape_cast %57 : vector<1x2x32xf32> to vector<2x32xf32>
    %c1_58 = arith.constant 1 : index
    %c0_59 = arith.constant 0 : index
    %c0_60 = arith.constant 0 : index
    %59 = vector.load %arg27[%c1_58, %c0_59, %c0_60] : memref<3x2x32xf32, #tpu.memory_space<vmem>>, vector<1x2x32xf32>
    %60 = vector.shape_cast %59 : vector<1x2x32xf32> to vector<2x32xf32>
    %c1_61 = arith.constant 1 : index
    %c0_62 = arith.constant 0 : index
    %c0_63 = arith.constant 0 : index
    %61 = vector.load %arg28[%c1_61, %c0_62, %c0_63] : memref<3x2x32xf32, #tpu.memory_space<vmem>>, vector<1x2x32xf32>
    %62 = vector.shape_cast %61 : vector<1x2x32xf32> to vector<2x32xf32>
    %c2_64 = arith.constant 2 : index
    %c0_65 = arith.constant 0 : index
    %c0_66 = arith.constant 0 : index
    %63 = vector.load %arg27[%c2_64, %c0_65, %c0_66] : memref<3x2x32xf32, #tpu.memory_space<vmem>>, vector<1x2x32xf32>
    %64 = vector.shape_cast %63 : vector<1x2x32xf32> to vector<2x32xf32>
    %c2_67 = arith.constant 2 : index
    %c0_68 = arith.constant 0 : index
    %c0_69 = arith.constant 0 : index
    %65 = vector.load %arg28[%c2_67, %c0_68, %c0_69] : memref<3x2x32xf32, #tpu.memory_space<vmem>>, vector<1x2x32xf32>
    %66 = vector.shape_cast %65 : vector<1x2x32xf32> to vector<2x32xf32>
    %c0_i32_70 = arith.constant 0 : i32
    %67 = arith.index_cast %c0_i32_70 : i32 to index
    %c0_71 = arith.constant 0 : index
    %c0_72 = arith.constant 0 : index
    %68 = vector.load %arg2[%67, %c0_71, %c0_72] : memref<2x2x4xf32, #tpu.memory_space<vmem>>, vector<1x2x4xf32>
    %69 = vector.shape_cast %68 : vector<1x2x4xf32> to vector<2x4xf32>
    %70 = vector.extract_strided_slice %69 {offsets = [0, 0], sizes = [2, 1], strides = [1, 1]} : vector<2x4xf32> to vector<2x1xf32>
    %71 = vector.broadcast %70 : vector<2x1xf32> to vector<2x128xf32>
    %72 = arith.mulf %71, %5 : vector<2x128xf32>
    %cst_73 = arith.constant dense<0.000000e+00> : vector<2x128xf32>
    %73 = tpu.matmul %56, %6, %cst_73 {dimension_numbers = #tpu.dot_dimension_numbers<[1], [0], [0], [1], [0, 0, 1, 1], [], []>} : vector<2x32xf32>, vector<32x128xf32>, vector<2x128xf32> -> vector<2x128xf32>
    %74 = arith.addf %72, %73 : vector<2x128xf32>
    %75 = arith.addf %74, %14 : vector<2x128xf32>
    %76 = vector.extract_strided_slice %75 {offsets = [0, 0], sizes = [2, 96], strides = [1, 1]} : vector<2x128xf32> to vector<2x96xf32>
    %77 = arith.negf %76 : vector<2x96xf32>
    %78 = math.exp %77 : vector<2x96xf32>
    %cst_74 = arith.constant 1.000000e+00 : f32
    %79 = vector.broadcast %cst_74 : f32 to vector<2x96xf32>
    %80 = arith.addf %79, %78 : vector<2x96xf32>
    %81 = arith.divf %79, %80 : vector<2x96xf32>
    %82 = vector.extract_strided_slice %81 {offsets = [0, 0], sizes = [2, 32], strides = [1, 1]} : vector<2x96xf32> to vector<2x32xf32>
    %83 = vector.extract_strided_slice %81 {offsets = [0, 32], sizes = [2, 32], strides = [1, 1]} : vector<2x96xf32> to vector<2x32xf32>
    %84 = vector.extract_strided_slice %81 {offsets = [0, 64], sizes = [2, 32], strides = [1, 1]} : vector<2x96xf32> to vector<2x32xf32>
    %85 = vector.extract_strided_slice %75 {offsets = [0, 96], sizes = [2, 32], strides = [1, 1]} : vector<2x128xf32> to vector<2x32xf32>
    %86 = math.tanh %85 : vector<2x32xf32>
    %87 = arith.mulf %83, %58 : vector<2x32xf32>
    %88 = arith.mulf %82, %86 : vector<2x32xf32>
    %89 = arith.addf %87, %88 : vector<2x32xf32>
    %90 = math.tanh %89 : vector<2x32xf32>
    %91 = arith.mulf %84, %90 : vector<2x32xf32>
    %cst_75 = arith.constant dense<0.000000e+00> : vector<2x128xf32>
    %92 = tpu.matmul %60, %8, %cst_75 {dimension_numbers = #tpu.dot_dimension_numbers<[1], [0], [0], [1], [0, 0, 1, 1], [], []>} : vector<2x32xf32>, vector<32x128xf32>, vector<2x128xf32> -> vector<2x128xf32>
    %cst_76 = arith.constant dense<0.000000e+00> : vector<2x128xf32>
    %93 = tpu.matmul %91, %7, %cst_76 {dimension_numbers = #tpu.dot_dimension_numbers<[1], [0], [0], [1], [0, 0, 1, 1], [], []>} : vector<2x32xf32>, vector<32x128xf32>, vector<2x128xf32> -> vector<2x128xf32>
    %94 = arith.addf %92, %93 : vector<2x128xf32>
    %95 = arith.addf %94, %18 : vector<2x128xf32>
    %96 = vector.extract_strided_slice %95 {offsets = [0, 0], sizes = [2, 96], strides = [1, 1]} : vector<2x128xf32> to vector<2x96xf32>
    %97 = arith.negf %96 : vector<2x96xf32>
    %98 = math.exp %97 : vector<2x96xf32>
    %cst_77 = arith.constant 1.000000e+00 : f32
    %99 = vector.broadcast %cst_77 : f32 to vector<2x96xf32>
    %100 = arith.addf %99, %98 : vector<2x96xf32>
    %101 = arith.divf %99, %100 : vector<2x96xf32>
    %102 = vector.extract_strided_slice %101 {offsets = [0, 0], sizes = [2, 32], strides = [1, 1]} : vector<2x96xf32> to vector<2x32xf32>
    %103 = vector.extract_strided_slice %101 {offsets = [0, 32], sizes = [2, 32], strides = [1, 1]} : vector<2x96xf32> to vector<2x32xf32>
    %104 = vector.extract_strided_slice %101 {offsets = [0, 64], sizes = [2, 32], strides = [1, 1]} : vector<2x96xf32> to vector<2x32xf32>
    %105 = vector.extract_strided_slice %95 {offsets = [0, 96], sizes = [2, 32], strides = [1, 1]} : vector<2x128xf32> to vector<2x32xf32>
    %106 = math.tanh %105 : vector<2x32xf32>
    %107 = arith.mulf %103, %62 : vector<2x32xf32>
    %108 = arith.mulf %102, %106 : vector<2x32xf32>
    %109 = arith.addf %107, %108 : vector<2x32xf32>
    %110 = math.tanh %109 : vector<2x32xf32>
    %111 = arith.mulf %104, %110 : vector<2x32xf32>
    %cst_78 = arith.constant dense<0.000000e+00> : vector<2x128xf32>
    %112 = tpu.matmul %64, %10, %cst_78 {dimension_numbers = #tpu.dot_dimension_numbers<[1], [0], [0], [1], [0, 0, 1, 1], [], []>} : vector<2x32xf32>, vector<32x128xf32>, vector<2x128xf32> -> vector<2x128xf32>
    %cst_79 = arith.constant dense<0.000000e+00> : vector<2x128xf32>
    %113 = tpu.matmul %111, %9, %cst_79 {dimension_numbers = #tpu.dot_dimension_numbers<[1], [0], [0], [1], [0, 0, 1, 1], [], []>} : vector<2x32xf32>, vector<32x128xf32>, vector<2x128xf32> -> vector<2x128xf32>
    %114 = arith.addf %112, %113 : vector<2x128xf32>
    %115 = arith.addf %114, %22 : vector<2x128xf32>
    %116 = vector.extract_strided_slice %115 {offsets = [0, 0], sizes = [2, 96], strides = [1, 1]} : vector<2x128xf32> to vector<2x96xf32>
    %117 = arith.negf %116 : vector<2x96xf32>
    %118 = math.exp %117 : vector<2x96xf32>
    %cst_80 = arith.constant 1.000000e+00 : f32
    %119 = vector.broadcast %cst_80 : f32 to vector<2x96xf32>
    %120 = arith.addf %119, %118 : vector<2x96xf32>
    %121 = arith.divf %119, %120 : vector<2x96xf32>
    %122 = vector.extract_strided_slice %121 {offsets = [0, 0], sizes = [2, 32], strides = [1, 1]} : vector<2x96xf32> to vector<2x32xf32>
    %123 = vector.extract_strided_slice %121 {offsets = [0, 32], sizes = [2, 32], strides = [1, 1]} : vector<2x96xf32> to vector<2x32xf32>
    %124 = vector.extract_strided_slice %121 {offsets = [0, 64], sizes = [2, 32], strides = [1, 1]} : vector<2x96xf32> to vector<2x32xf32>
    %125 = vector.extract_strided_slice %115 {offsets = [0, 96], sizes = [2, 32], strides = [1, 1]} : vector<2x128xf32> to vector<2x32xf32>
    %126 = math.tanh %125 : vector<2x32xf32>
    %127 = arith.mulf %123, %66 : vector<2x32xf32>
    %128 = arith.mulf %122, %126 : vector<2x32xf32>
    %129 = arith.addf %127, %128 : vector<2x32xf32>
    %130 = math.tanh %129 : vector<2x32xf32>
    %131 = arith.mulf %124, %130 : vector<2x32xf32>
    %132 = vector.extract_strided_slice %69 {offsets = [0, 1], sizes = [2, 1], strides = [1, 1]} : vector<2x4xf32> to vector<2x1xf32>
    %133 = vector.broadcast %132 : vector<2x1xf32> to vector<2x128xf32>
    %134 = arith.mulf %133, %5 : vector<2x128xf32>
    %cst_81 = arith.constant dense<0.000000e+00> : vector<2x128xf32>
    %135 = tpu.matmul %91, %6, %cst_81 {dimension_numbers = #tpu.dot_dimension_numbers<[1], [0], [0], [1], [0, 0, 1, 1], [], []>} : vector<2x32xf32>, vector<32x128xf32>, vector<2x128xf32> -> vector<2x128xf32>
    %136 = arith.addf %134, %135 : vector<2x128xf32>
    %137 = arith.addf %136, %14 : vector<2x128xf32>
    %138 = vector.extract_strided_slice %137 {offsets = [0, 0], sizes = [2, 96], strides = [1, 1]} : vector<2x128xf32> to vector<2x96xf32>
    %139 = arith.negf %138 : vector<2x96xf32>
    %140 = math.exp %139 : vector<2x96xf32>
    %cst_82 = arith.constant 1.000000e+00 : f32
    %141 = vector.broadcast %cst_82 : f32 to vector<2x96xf32>
    %142 = arith.addf %141, %140 : vector<2x96xf32>
    %143 = arith.divf %141, %142 : vector<2x96xf32>
    %144 = vector.extract_strided_slice %143 {offsets = [0, 0], sizes = [2, 32], strides = [1, 1]} : vector<2x96xf32> to vector<2x32xf32>
    %145 = vector.extract_strided_slice %143 {offsets = [0, 32], sizes = [2, 32], strides = [1, 1]} : vector<2x96xf32> to vector<2x32xf32>
    %146 = vector.extract_strided_slice %143 {offsets = [0, 64], sizes = [2, 32], strides = [1, 1]} : vector<2x96xf32> to vector<2x32xf32>
    %147 = vector.extract_strided_slice %137 {offsets = [0, 96], sizes = [2, 32], strides = [1, 1]} : vector<2x128xf32> to vector<2x32xf32>
    %148 = math.tanh %147 : vector<2x32xf32>
    %149 = arith.mulf %145, %89 : vector<2x32xf32>
    %150 = arith.mulf %144, %148 : vector<2x32xf32>
    %151 = arith.addf %149, %150 : vector<2x32xf32>
    %152 = math.tanh %151 : vector<2x32xf32>
    %153 = arith.mulf %146, %152 : vector<2x32xf32>
    %cst_83 = arith.constant dense<0.000000e+00> : vector<2x128xf32>
    %154 = tpu.matmul %111, %8, %cst_83 {dimension_numbers = #tpu.dot_dimension_numbers<[1], [0], [0], [1], [0, 0, 1, 1], [], []>} : vector<2x32xf32>, vector<32x128xf32>, vector<2x128xf32> -> vector<2x128xf32>
    %cst_84 = arith.constant dense<0.000000e+00> : vector<2x128xf32>
    %155 = tpu.matmul %153, %7, %cst_84 {dimension_numbers = #tpu.dot_dimension_numbers<[1], [0], [0], [1], [0, 0, 1, 1], [], []>} : vector<2x32xf32>, vector<32x128xf32>, vector<2x128xf32> -> vector<2x128xf32>
    %156 = arith.addf %154, %155 : vector<2x128xf32>
    %157 = arith.addf %156, %18 : vector<2x128xf32>
    %158 = vector.extract_strided_slice %157 {offsets = [0, 0], sizes = [2, 96], strides = [1, 1]} : vector<2x128xf32> to vector<2x96xf32>
    %159 = arith.negf %158 : vector<2x96xf32>
    %160 = math.exp %159 : vector<2x96xf32>
    %cst_85 = arith.constant 1.000000e+00 : f32
    %161 = vector.broadcast %cst_85 : f32 to vector<2x96xf32>
    %162 = arith.addf %161, %160 : vector<2x96xf32>
    %163 = arith.divf %161, %162 : vector<2x96xf32>
    %164 = vector.extract_strided_slice %163 {offsets = [0, 0], sizes = [2, 32], strides = [1, 1]} : vector<2x96xf32> to vector<2x32xf32>
    %165 = vector.extract_strided_slice %163 {offsets = [0, 32], sizes = [2, 32], strides = [1, 1]} : vector<2x96xf32> to vector<2x32xf32>
    %166 = vector.extract_strided_slice %163 {offsets = [0, 64], sizes = [2, 32], strides = [1, 1]} : vector<2x96xf32> to vector<2x32xf32>
    %167 = vector.extract_strided_slice %157 {offsets = [0, 96], sizes = [2, 32], strides = [1, 1]} : vector<2x128xf32> to vector<2x32xf32>
    %168 = math.tanh %167 : vector<2x32xf32>
    %169 = arith.mulf %165, %109 : vector<2x32xf32>
    %170 = arith.mulf %164, %168 : vector<2x32xf32>
    %171 = arith.addf %169, %170 : vector<2x32xf32>
    %172 = math.tanh %171 : vector<2x32xf32>
    %173 = arith.mulf %166, %172 : vector<2x32xf32>
    %cst_86 = arith.constant dense<0.000000e+00> : vector<2x128xf32>
    %174 = tpu.matmul %131, %10, %cst_86 {dimension_numbers = #tpu.dot_dimension_numbers<[1], [0], [0], [1], [0, 0, 1, 1], [], []>} : vector<2x32xf32>, vector<32x128xf32>, vector<2x128xf32> -> vector<2x128xf32>
    %cst_87 = arith.constant dense<0.000000e+00> : vector<2x128xf32>
    %175 = tpu.matmul %173, %9, %cst_87 {dimension_numbers = #tpu.dot_dimension_numbers<[1], [0], [0], [1], [0, 0, 1, 1], [], []>} : vector<2x32xf32>, vector<32x128xf32>, vector<2x128xf32> -> vector<2x128xf32>
    %176 = arith.addf %174, %175 : vector<2x128xf32>
    %177 = arith.addf %176, %22 : vector<2x128xf32>
    %178 = vector.extract_strided_slice %177 {offsets = [0, 0], sizes = [2, 96], strides = [1, 1]} : vector<2x128xf32> to vector<2x96xf32>
    %179 = arith.negf %178 : vector<2x96xf32>
    %180 = math.exp %179 : vector<2x96xf32>
    %cst_88 = arith.constant 1.000000e+00 : f32
    %181 = vector.broadcast %cst_88 : f32 to vector<2x96xf32>
    %182 = arith.addf %181, %180 : vector<2x96xf32>
    %183 = arith.divf %181, %182 : vector<2x96xf32>
    %184 = vector.extract_strided_slice %183 {offsets = [0, 0], sizes = [2, 32], strides = [1, 1]} : vector<2x96xf32> to vector<2x32xf32>
    %185 = vector.extract_strided_slice %183 {offsets = [0, 32], sizes = [2, 32], strides = [1, 1]} : vector<2x96xf32> to vector<2x32xf32>
    %186 = vector.extract_strided_slice %183 {offsets = [0, 64], sizes = [2, 32], strides = [1, 1]} : vector<2x96xf32> to vector<2x32xf32>
    %187 = vector.extract_strided_slice %177 {offsets = [0, 96], sizes = [2, 32], strides = [1, 1]} : vector<2x128xf32> to vector<2x32xf32>
    %188 = math.tanh %187 : vector<2x32xf32>
    %189 = arith.mulf %185, %129 : vector<2x32xf32>
    %190 = arith.mulf %184, %188 : vector<2x32xf32>
    %191 = arith.addf %189, %190 : vector<2x32xf32>
    %192 = math.tanh %191 : vector<2x32xf32>
    %193 = arith.mulf %186, %192 : vector<2x32xf32>
    %194 = vector.extract_strided_slice %69 {offsets = [0, 2], sizes = [2, 1], strides = [1, 1]} : vector<2x4xf32> to vector<2x1xf32>
    %195 = vector.broadcast %194 : vector<2x1xf32> to vector<2x128xf32>
    %196 = arith.mulf %195, %5 : vector<2x128xf32>
    %cst_89 = arith.constant dense<0.000000e+00> : vector<2x128xf32>
    %197 = tpu.matmul %153, %6, %cst_89 {dimension_numbers = #tpu.dot_dimension_numbers<[1], [0], [0], [1], [0, 0, 1, 1], [], []>} : vector<2x32xf32>, vector<32x128xf32>, vector<2x128xf32> -> vector<2x128xf32>
    %198 = arith.addf %196, %197 : vector<2x128xf32>
    %199 = arith.addf %198, %14 : vector<2x128xf32>
    %200 = vector.extract_strided_slice %199 {offsets = [0, 0], sizes = [2, 96], strides = [1, 1]} : vector<2x128xf32> to vector<2x96xf32>
    %201 = arith.negf %200 : vector<2x96xf32>
    %202 = math.exp %201 : vector<2x96xf32>
    %cst_90 = arith.constant 1.000000e+00 : f32
    %203 = vector.broadcast %cst_90 : f32 to vector<2x96xf32>
    %204 = arith.addf %203, %202 : vector<2x96xf32>
    %205 = arith.divf %203, %204 : vector<2x96xf32>
    %206 = vector.extract_strided_slice %205 {offsets = [0, 0], sizes = [2, 32], strides = [1, 1]} : vector<2x96xf32> to vector<2x32xf32>
    %207 = vector.extract_strided_slice %205 {offsets = [0, 32], sizes = [2, 32], strides = [1, 1]} : vector<2x96xf32> to vector<2x32xf32>
    %208 = vector.extract_strided_slice %205 {offsets = [0, 64], sizes = [2, 32], strides = [1, 1]} : vector<2x96xf32> to vector<2x32xf32>
    %209 = vector.extract_strided_slice %199 {offsets = [0, 96], sizes = [2, 32], strides = [1, 1]} : vector<2x128xf32> to vector<2x32xf32>
    %210 = math.tanh %209 : vector<2x32xf32>
    %211 = arith.mulf %207, %151 : vector<2x32xf32>
    %212 = arith.mulf %206, %210 : vector<2x32xf32>
    %213 = arith.addf %211, %212 : vector<2x32xf32>
    %214 = math.tanh %213 : vector<2x32xf32>
    %215 = arith.mulf %208, %214 : vector<2x32xf32>
    %cst_91 = arith.constant dense<0.000000e+00> : vector<2x128xf32>
    %216 = tpu.matmul %173, %8, %cst_91 {dimension_numbers = #tpu.dot_dimension_numbers<[1], [0], [0], [1], [0, 0, 1, 1], [], []>} : vector<2x32xf32>, vector<32x128xf32>, vector<2x128xf32> -> vector<2x128xf32>
    %cst_92 = arith.constant dense<0.000000e+00> : vector<2x128xf32>
    %217 = tpu.matmul %215, %7, %cst_92 {dimension_numbers = #tpu.dot_dimension_numbers<[1], [0], [0], [1], [0, 0, 1, 1], [], []>} : vector<2x32xf32>, vector<32x128xf32>, vector<2x128xf32> -> vector<2x128xf32>
    %218 = arith.addf %216, %217 : vector<2x128xf32>
    %219 = arith.addf %218, %18 : vector<2x128xf32>
    %220 = vector.extract_strided_slice %219 {offsets = [0, 0], sizes = [2, 96], strides = [1, 1]} : vector<2x128xf32> to vector<2x96xf32>
    %221 = arith.negf %220 : vector<2x96xf32>
    %222 = math.exp %221 : vector<2x96xf32>
    %cst_93 = arith.constant 1.000000e+00 : f32
    %223 = vector.broadcast %cst_93 : f32 to vector<2x96xf32>
    %224 = arith.addf %223, %222 : vector<2x96xf32>
    %225 = arith.divf %223, %224 : vector<2x96xf32>
    %226 = vector.extract_strided_slice %225 {offsets = [0, 0], sizes = [2, 32], strides = [1, 1]} : vector<2x96xf32> to vector<2x32xf32>
    %227 = vector.extract_strided_slice %225 {offsets = [0, 32], sizes = [2, 32], strides = [1, 1]} : vector<2x96xf32> to vector<2x32xf32>
    %228 = vector.extract_strided_slice %225 {offsets = [0, 64], sizes = [2, 32], strides = [1, 1]} : vector<2x96xf32> to vector<2x32xf32>
    %229 = vector.extract_strided_slice %219 {offsets = [0, 96], sizes = [2, 32], strides = [1, 1]} : vector<2x128xf32> to vector<2x32xf32>
    %230 = math.tanh %229 : vector<2x32xf32>
    %231 = arith.mulf %227, %171 : vector<2x32xf32>
    %232 = arith.mulf %226, %230 : vector<2x32xf32>
    %233 = arith.addf %231, %232 : vector<2x32xf32>
    %234 = math.tanh %233 : vector<2x32xf32>
    %235 = arith.mulf %228, %234 : vector<2x32xf32>
    %cst_94 = arith.constant dense<0.000000e+00> : vector<2x128xf32>
    %236 = tpu.matmul %193, %10, %cst_94 {dimension_numbers = #tpu.dot_dimension_numbers<[1], [0], [0], [1], [0, 0, 1, 1], [], []>} : vector<2x32xf32>, vector<32x128xf32>, vector<2x128xf32> -> vector<2x128xf32>
    %cst_95 = arith.constant dense<0.000000e+00> : vector<2x128xf32>
    %237 = tpu.matmul %235, %9, %cst_95 {dimension_numbers = #tpu.dot_dimension_numbers<[1], [0], [0], [1], [0, 0, 1, 1], [], []>} : vector<2x32xf32>, vector<32x128xf32>, vector<2x128xf32> -> vector<2x128xf32>
    %238 = arith.addf %236, %237 : vector<2x128xf32>
    %239 = arith.addf %238, %22 : vector<2x128xf32>
    %240 = vector.extract_strided_slice %239 {offsets = [0, 0], sizes = [2, 96], strides = [1, 1]} : vector<2x128xf32> to vector<2x96xf32>
    %241 = arith.negf %240 : vector<2x96xf32>
    %242 = math.exp %241 : vector<2x96xf32>
    %cst_96 = arith.constant 1.000000e+00 : f32
    %243 = vector.broadcast %cst_96 : f32 to vector<2x96xf32>
    %244 = arith.addf %243, %242 : vector<2x96xf32>
    %245 = arith.divf %243, %244 : vector<2x96xf32>
    %246 = vector.extract_strided_slice %245 {offsets = [0, 0], sizes = [2, 32], strides = [1, 1]} : vector<2x96xf32> to vector<2x32xf32>
    %247 = vector.extract_strided_slice %245 {offsets = [0, 32], sizes = [2, 32], strides = [1, 1]} : vector<2x96xf32> to vector<2x32xf32>
    %248 = vector.extract_strided_slice %245 {offsets = [0, 64], sizes = [2, 32], strides = [1, 1]} : vector<2x96xf32> to vector<2x32xf32>
    %249 = vector.extract_strided_slice %239 {offsets = [0, 96], sizes = [2, 32], strides = [1, 1]} : vector<2x128xf32> to vector<2x32xf32>
    %250 = math.tanh %249 : vector<2x32xf32>
    %251 = arith.mulf %247, %191 : vector<2x32xf32>
    %252 = arith.mulf %246, %250 : vector<2x32xf32>
    %253 = arith.addf %251, %252 : vector<2x32xf32>
    %254 = math.tanh %253 : vector<2x32xf32>
    %255 = arith.mulf %248, %254 : vector<2x32xf32>
    %cst_97 = arith.constant dense<0.000000e+00> : vector<2x32xf32>
    %256 = tpu.matmul %255, %23, %cst_97 {dimension_numbers = #tpu.dot_dimension_numbers<[1], [0], [0], [1], [0, 0, 1, 1], [], []>} : vector<2x32xf32>, vector<32x32xf32>, vector<2x32xf32> -> vector<2x32xf32>
    %257 = vector.broadcast %24 : vector<1x32xf32> to vector<2x32xf32>
    %258 = arith.addf %256, %257 : vector<2x32xf32>
    %259 = math.tanh %258 : vector<2x32xf32>
    %cst_98 = arith.constant dense<0.000000e+00> : vector<2x32xf32>
    %260 = tpu.matmul %259, %25, %cst_98 {dimension_numbers = #tpu.dot_dimension_numbers<[1], [0], [0], [1], [0, 0, 1, 1], [], []>} : vector<2x32xf32>, vector<32x32xf32>, vector<2x32xf32> -> vector<2x32xf32>
    %261 = vector.broadcast %26 : vector<1x32xf32> to vector<2x32xf32>
    %262 = arith.addf %260, %261 : vector<2x32xf32>
    %263 = vector.extract_strided_slice %69 {offsets = [0, 3], sizes = [2, 1], strides = [1, 1]} : vector<2x4xf32> to vector<2x1xf32>
    %264 = vector.broadcast %263 : vector<2x1xf32> to vector<2x128xf32>
    %265 = arith.mulf %264, %5 : vector<2x128xf32>
    %cst_99 = arith.constant dense<0.000000e+00> : vector<2x128xf32>
    %266 = tpu.matmul %215, %6, %cst_99 {dimension_numbers = #tpu.dot_dimension_numbers<[1], [0], [0], [1], [0, 0, 1, 1], [], []>} : vector<2x32xf32>, vector<32x128xf32>, vector<2x128xf32> -> vector<2x128xf32>
    %267 = arith.addf %265, %266 : vector<2x128xf32>
    %268 = arith.addf %267, %14 : vector<2x128xf32>
    %269 = vector.extract_strided_slice %268 {offsets = [0, 0], sizes = [2, 96], strides = [1, 1]} : vector<2x128xf32> to vector<2x96xf32>
    %270 = arith.negf %269 : vector<2x96xf32>
    %271 = math.exp %270 : vector<2x96xf32>
    %cst_100 = arith.constant 1.000000e+00 : f32
    %272 = vector.broadcast %cst_100 : f32 to vector<2x96xf32>
    %273 = arith.addf %272, %271 : vector<2x96xf32>
    %274 = arith.divf %272, %273 : vector<2x96xf32>
    %275 = vector.extract_strided_slice %274 {offsets = [0, 0], sizes = [2, 32], strides = [1, 1]} : vector<2x96xf32> to vector<2x32xf32>
    %276 = vector.extract_strided_slice %274 {offsets = [0, 32], sizes = [2, 32], strides = [1, 1]} : vector<2x96xf32> to vector<2x32xf32>
    %277 = vector.extract_strided_slice %274 {offsets = [0, 64], sizes = [2, 32], strides = [1, 1]} : vector<2x96xf32> to vector<2x32xf32>
    %278 = vector.extract_strided_slice %268 {offsets = [0, 96], sizes = [2, 32], strides = [1, 1]} : vector<2x128xf32> to vector<2x32xf32>
    %279 = math.tanh %278 : vector<2x32xf32>
    %280 = arith.mulf %276, %213 : vector<2x32xf32>
    %281 = arith.mulf %275, %279 : vector<2x32xf32>
    %282 = arith.addf %280, %281 : vector<2x32xf32>
    %283 = math.tanh %282 : vector<2x32xf32>
    %284 = arith.mulf %277, %283 : vector<2x32xf32>
    %cst_101 = arith.constant dense<0.000000e+00> : vector<2x128xf32>
    %285 = tpu.matmul %235, %8, %cst_101 {dimension_numbers = #tpu.dot_dimension_numbers<[1], [0], [0], [1], [0, 0, 1, 1], [], []>} : vector<2x32xf32>, vector<32x128xf32>, vector<2x128xf32> -> vector<2x128xf32>
    %cst_102 = arith.constant dense<0.000000e+00> : vector<2x128xf32>
    %286 = tpu.matmul %284, %7, %cst_102 {dimension_numbers = #tpu.dot_dimension_numbers<[1], [0], [0], [1], [0, 0, 1, 1], [], []>} : vector<2x32xf32>, vector<32x128xf32>, vector<2x128xf32> -> vector<2x128xf32>
    %287 = arith.addf %285, %286 : vector<2x128xf32>
    %288 = arith.addf %287, %18 : vector<2x128xf32>
    %289 = vector.extract_strided_slice %288 {offsets = [0, 0], sizes = [2, 96], strides = [1, 1]} : vector<2x128xf32> to vector<2x96xf32>
    %290 = arith.negf %289 : vector<2x96xf32>
    %291 = math.exp %290 : vector<2x96xf32>
    %cst_103 = arith.constant 1.000000e+00 : f32
    %292 = vector.broadcast %cst_103 : f32 to vector<2x96xf32>
    %293 = arith.addf %292, %291 : vector<2x96xf32>
    %294 = arith.divf %292, %293 : vector<2x96xf32>
    %295 = vector.extract_strided_slice %294 {offsets = [0, 0], sizes = [2, 32], strides = [1, 1]} : vector<2x96xf32> to vector<2x32xf32>
    %296 = vector.extract_strided_slice %294 {offsets = [0, 32], sizes = [2, 32], strides = [1, 1]} : vector<2x96xf32> to vector<2x32xf32>
    %297 = vector.extract_strided_slice %294 {offsets = [0, 64], sizes = [2, 32], strides = [1, 1]} : vector<2x96xf32> to vector<2x32xf32>
    %298 = vector.extract_strided_slice %288 {offsets = [0, 96], sizes = [2, 32], strides = [1, 1]} : vector<2x128xf32> to vector<2x32xf32>
    %299 = math.tanh %298 : vector<2x32xf32>
    %300 = arith.mulf %296, %233 : vector<2x32xf32>
    %301 = arith.mulf %295, %299 : vector<2x32xf32>
    %302 = arith.addf %300, %301 : vector<2x32xf32>
    %303 = math.tanh %302 : vector<2x32xf32>
    %304 = arith.mulf %297, %303 : vector<2x32xf32>
    %cst_104 = arith.constant dense<0.000000e+00> : vector<2x128xf32>
    %305 = tpu.matmul %255, %10, %cst_104 {dimension_numbers = #tpu.dot_dimension_numbers<[1], [0], [0], [1], [0, 0, 1, 1], [], []>} : vector<2x32xf32>, vector<32x128xf32>, vector<2x128xf32> -> vector<2x128xf32>
    %cst_105 = arith.constant dense<0.000000e+00> : vector<2x128xf32>
    %306 = tpu.matmul %304, %9, %cst_105 {dimension_numbers = #tpu.dot_dimension_numbers<[1], [0], [0], [1], [0, 0, 1, 1], [], []>} : vector<2x32xf32>, vector<32x128xf32>, vector<2x128xf32> -> vector<2x128xf32>
    %307 = arith.addf %305, %306 : vector<2x128xf32>
    %308 = arith.addf %307, %22 : vector<2x128xf32>
    %309 = vector.extract_strided_slice %308 {offsets = [0, 0], sizes = [2, 96], strides = [1, 1]} : vector<2x128xf32> to vector<2x96xf32>
    %310 = arith.negf %309 : vector<2x96xf32>
    %311 = math.exp %310 : vector<2x96xf32>
    %cst_106 = arith.constant 1.000000e+00 : f32
    %312 = vector.broadcast %cst_106 : f32 to vector<2x96xf32>
    %313 = arith.addf %312, %311 : vector<2x96xf32>
    %314 = arith.divf %312, %313 : vector<2x96xf32>
    %315 = vector.extract_strided_slice %314 {offsets = [0, 0], sizes = [2, 32], strides = [1, 1]} : vector<2x96xf32> to vector<2x32xf32>
    %316 = vector.extract_strided_slice %314 {offsets = [0, 32], sizes = [2, 32], strides = [1, 1]} : vector<2x96xf32> to vector<2x32xf32>
    %317 = vector.extract_strided_slice %314 {offsets = [0, 64], sizes = [2, 32], strides = [1, 1]} : vector<2x96xf32> to vector<2x32xf32>
    %318 = vector.extract_strided_slice %308 {offsets = [0, 96], sizes = [2, 32], strides = [1, 1]} : vector<2x128xf32> to vector<2x32xf32>
    %319 = math.tanh %318 : vector<2x32xf32>
    %320 = arith.mulf %316, %253 : vector<2x32xf32>
    %321 = arith.mulf %315, %319 : vector<2x32xf32>
    %322 = arith.addf %320, %321 : vector<2x32xf32>
    %323 = math.tanh %322 : vector<2x32xf32>
    %324 = arith.mulf %317, %323 : vector<2x32xf32>
    %cst_107 = arith.constant dense<0.000000e+00> : vector<2x128xf32>
    %325 = tpu.matmul %262, %27, %cst_107 {dimension_numbers = #tpu.dot_dimension_numbers<[1], [0], [0], [1], [0, 0, 1, 1], [], []>} : vector<2x32xf32>, vector<32x128xf32>, vector<2x128xf32> -> vector<2x128xf32>
    %326 = vector.broadcast %28 : vector<1x128xf32> to vector<2x128xf32>
    %327 = arith.addf %325, %326 : vector<2x128xf32>
    %cst_108 = arith.constant 0.000000e+00 : f32
    %328 = vector.broadcast %cst_108 : f32 to vector<2x4xf32>
    %329 = arith.subf %69, %328 : vector<2x4xf32>
    %cst_109 = arith.constant 1.000000e+00 : f32
    %330 = vector.broadcast %cst_109 : f32 to vector<2x4xf32>
    %331 = arith.mulf %329, %330 : vector<2x4xf32>
    %332 = vector.extract_strided_slice %331 {offsets = [0, 0], sizes = [2, 2], strides = [1, 1]} : vector<2x4xf32> to vector<2x2xf32>
    %333 = vector.extract_strided_slice %331 {offsets = [0, 2], sizes = [2, 2], strides = [1, 1]} : vector<2x4xf32> to vector<2x2xf32>
    %cst_110 = arith.constant 0.000000e+00 : f32
    %334 = vector.broadcast %cst_110 : f32 to vector<2x1xf32>
    %335 = vector.extract_strided_slice %327 {offsets = [0, 0], sizes = [2, 32], strides = [1, 1]} : vector<2x128xf32> to vector<2x32xf32>
    %336 = vector.extract_strided_slice %332 {offsets = [0, 0], sizes = [2, 1], strides = [1, 1]} : vector<2x2xf32> to vector<2x1xf32>
    %337 = vector.broadcast %336 : vector<2x1xf32> to vector<2x32xf32>
    %338 = vector.broadcast %39 : vector<1x32xf32> to vector<2x32xf32>
    %339 = arith.mulf %337, %338 : vector<2x32xf32>
    %340 = arith.addf %335, %339 : vector<2x32xf32>
    %341 = vector.extract_strided_slice %332 {offsets = [0, 1], sizes = [2, 1], strides = [1, 1]} : vector<2x2xf32> to vector<2x1xf32>
    %342 = vector.broadcast %341 : vector<2x1xf32> to vector<2x32xf32>
    %343 = vector.broadcast %41 : vector<1x32xf32> to vector<2x32xf32>
    %344 = arith.mulf %342, %343 : vector<2x32xf32>
    %345 = arith.addf %340, %344 : vector<2x32xf32>
    %346 = math.tanh %345 : vector<2x32xf32>
    %cst_111 = arith.constant dense<0.000000e+00> : vector<2x4xf32>
    %347 = tpu.matmul %346, %47, %cst_111 {dimension_numbers = #tpu.dot_dimension_numbers<[1], [0], [0], [1], [0, 0, 1, 1], [], []>} : vector<2x32xf32>, vector<32x4xf32>, vector<2x4xf32> -> vector<2x4xf32>
    %348 = vector.broadcast %51 : vector<1x4xf32> to vector<2x4xf32>
    %349 = arith.addf %347, %348 : vector<2x4xf32>
    %350 = vector.extract_strided_slice %349 {offsets = [0, 0], sizes = [2, 2], strides = [1, 1]} : vector<2x4xf32> to vector<2x2xf32>
    %351 = math.tanh %350 : vector<2x2xf32>
    %352 = vector.extract_strided_slice %349 {offsets = [0, 2], sizes = [2, 2], strides = [1, 1]} : vector<2x4xf32> to vector<2x2xf32>
    %353 = math.exp %351 : vector<2x2xf32>
    %354 = arith.mulf %333, %353 : vector<2x2xf32>
    %355 = arith.addf %354, %352 : vector<2x2xf32>
    %cst_112 = arith.constant dense<0.000000e+00> : vector<2xf32>
    %356 = vector.multi_reduction <add>, %351, %cst_112 [1] : vector<2x2xf32> to vector<2xf32>
    %357 = vector.shape_cast %356 : vector<2xf32> to vector<2x1xf32>
    %358 = arith.addf %334, %357 : vector<2x1xf32>
    %359 = vector.extract_strided_slice %327 {offsets = [0, 32], sizes = [2, 32], strides = [1, 1]} : vector<2x128xf32> to vector<2x32xf32>
    %360 = vector.extract_strided_slice %355 {offsets = [0, 0], sizes = [2, 1], strides = [1, 1]} : vector<2x2xf32> to vector<2x1xf32>
    %361 = vector.broadcast %360 : vector<2x1xf32> to vector<2x32xf32>
    %362 = vector.broadcast %43 : vector<1x32xf32> to vector<2x32xf32>
    %363 = arith.mulf %361, %362 : vector<2x32xf32>
    %364 = arith.addf %359, %363 : vector<2x32xf32>
    %365 = vector.extract_strided_slice %355 {offsets = [0, 1], sizes = [2, 1], strides = [1, 1]} : vector<2x2xf32> to vector<2x1xf32>
    %366 = vector.broadcast %365 : vector<2x1xf32> to vector<2x32xf32>
    %367 = vector.broadcast %45 : vector<1x32xf32> to vector<2x32xf32>
    %368 = arith.mulf %366, %367 : vector<2x32xf32>
    %369 = arith.addf %364, %368 : vector<2x32xf32>
    %370 = math.tanh %369 : vector<2x32xf32>
    %cst_113 = arith.constant dense<0.000000e+00> : vector<2x4xf32>
    %371 = tpu.matmul %370, %49, %cst_113 {dimension_numbers = #tpu.dot_dimension_numbers<[1], [0], [0], [1], [0, 0, 1, 1], [], []>} : vector<2x32xf32>, vector<32x4xf32>, vector<2x4xf32> -> vector<2x4xf32>
    %372 = vector.broadcast %53 : vector<1x4xf32> to vector<2x4xf32>
    %373 = arith.addf %371, %372 : vector<2x4xf32>
    %374 = vector.extract_strided_slice %373 {offsets = [0, 0], sizes = [2, 2], strides = [1, 1]} : vector<2x4xf32> to vector<2x2xf32>
    %375 = math.tanh %374 : vector<2x2xf32>
    %376 = vector.extract_strided_slice %373 {offsets = [0, 2], sizes = [2, 2], strides = [1, 1]} : vector<2x4xf32> to vector<2x2xf32>
    %377 = math.exp %375 : vector<2x2xf32>
    %378 = arith.mulf %332, %377 : vector<2x2xf32>
    %379 = arith.addf %378, %376 : vector<2x2xf32>
    %cst_114 = arith.constant dense<0.000000e+00> : vector<2xf32>
    %380 = vector.multi_reduction <add>, %375, %cst_114 [1] : vector<2x2xf32> to vector<2xf32>
    %381 = vector.shape_cast %380 : vector<2xf32> to vector<2x1xf32>
    %382 = arith.addf %358, %381 : vector<2x1xf32>
    %383 = vector.extract_strided_slice %327 {offsets = [0, 64], sizes = [2, 32], strides = [1, 1]} : vector<2x128xf32> to vector<2x32xf32>
    %384 = math.tanh %383 : vector<2x32xf32>
    %385 = vector.extract_strided_slice %327 {offsets = [0, 96], sizes = [2, 16], strides = [1, 1]} : vector<2x128xf32> to vector<2x16xf32>
    %386 = math.tanh %385 : vector<2x16xf32>
    %cst_115 = arith.constant dense<0.000000e+00> : vector<2x4xf32>
    %387 = tpu.matmul %386, %32, %cst_115 {dimension_numbers = #tpu.dot_dimension_numbers<[1], [0], [0], [1], [0, 0, 1, 1], [], []>} : vector<2x16xf32>, vector<16x4xf32>, vector<2x4xf32> -> vector<2x4xf32>
    %388 = vector.broadcast %33 : vector<1x4xf32> to vector<2x4xf32>
    %389 = arith.addf %387, %388 : vector<2x4xf32>
    %390 = math.tanh %389 : vector<2x4xf32>
    %391 = vector.broadcast %34 : vector<1x4xf32> to vector<2x4xf32>
    %392 = arith.mulf %390, %391 : vector<2x4xf32>
    %cst_116 = arith.constant dense<0.000000e+00> : vector<2x4xf32>
    %393 = tpu.matmul %384, %35, %cst_116 {dimension_numbers = #tpu.dot_dimension_numbers<[1], [0], [0], [1], [0, 0, 1, 1], [], []>} : vector<2x32xf32>, vector<32x4xf32>, vector<2x4xf32> -> vector<2x4xf32>
    %394 = vector.broadcast %36 : vector<1x4xf32> to vector<2x4xf32>
    %395 = arith.addf %393, %394 : vector<2x4xf32>
    %396 = math.tanh %395 : vector<2x4xf32>
    %397 = vector.broadcast %37 : vector<1x4xf32> to vector<2x4xf32>
    %398 = arith.mulf %396, %397 : vector<2x4xf32>
    %399 = math.absf %398 : vector<2x4xf32>
    %400 = tpu.concatenate %379, %355 in 1 : vector<2x2xf32>, vector<2x2xf32> -> vector<2x4xf32>
    %401 = arith.subf %400, %392 : vector<2x4xf32>
    %402 = arith.divf %401, %399 : vector<2x4xf32>
    %403 = arith.index_cast %c0_i32_70 : i32 to index
    %c0_117 = arith.constant 0 : index
    %c0_118 = arith.constant 0 : index
    %404 = vector.load %arg25[%403, %c0_117, %c0_118] : memref<2x2x4xf32, #tpu.memory_space<vmem>>, vector<1x2x4xf32>
    %405 = vector.shape_cast %404 : vector<1x2x4xf32> to vector<2x4xf32>
    %406 = vector.shape_cast %402 : vector<2x4xf32> to vector<1x2x4xf32>
    tpu.vector_store %arg25[%403, %c0_117, %c0_118], %406 {strides = array<i32>} : memref<2x2x4xf32, #tpu.memory_space<vmem>>, vector<1x2x4xf32>,
    %407 = arith.mulf %402, %402 : vector<2x4xf32>
    %cst_119 = arith.constant dense<0.000000e+00> : vector<2xf32>
    %408 = vector.multi_reduction <add>, %407, %cst_119 [1] : vector<2x4xf32> to vector<2xf32>
    %409 = vector.shape_cast %408 : vector<2xf32> to vector<2x1xf32>
    %cst_120 = arith.constant -5.000000e-01 : f32
    %410 = vector.broadcast %cst_120 : f32 to vector<2x1xf32>
    %411 = arith.mulf %410, %409 : vector<2x1xf32>
    %cst_121 = arith.constant -3.67575407 : f32
    %412 = vector.broadcast %cst_121 : f32 to vector<2x1xf32>
    %413 = arith.addf %411, %412 : vector<2x1xf32>
    %414 = arith.addf %54, %382 : vector<2x1xf32>
    %415 = arith.addf %54, %413 : vector<2x1xf32>
    %c1_i32 = arith.constant 1 : i32
    %416 = arith.index_cast %c1_i32 : i32 to index
    %c0_122 = arith.constant 0 : index
    %c0_123 = arith.constant 0 : index
    %417 = vector.load %arg2[%416, %c0_122, %c0_123] : memref<2x2x4xf32, #tpu.memory_space<vmem>>, vector<1x2x4xf32>
    %418 = vector.shape_cast %417 : vector<1x2x4xf32> to vector<2x4xf32>
    %419 = vector.extract_strided_slice %418 {offsets = [0, 0], sizes = [2, 1], strides = [1, 1]} : vector<2x4xf32> to vector<2x1xf32>
    %420 = vector.broadcast %419 : vector<2x1xf32> to vector<2x128xf32>
    %421 = arith.mulf %420, %5 : vector<2x128xf32>
    %cst_124 = arith.constant dense<0.000000e+00> : vector<2x128xf32>
    %422 = tpu.matmul %284, %6, %cst_124 {dimension_numbers = #tpu.dot_dimension_numbers<[1], [0], [0], [1], [0, 0, 1, 1], [], []>} : vector<2x32xf32>, vector<32x128xf32>, vector<2x128xf32> -> vector<2x128xf32>
    %423 = arith.addf %421, %422 : vector<2x128xf32>
    %424 = arith.addf %423, %14 : vector<2x128xf32>
    %425 = vector.extract_strided_slice %424 {offsets = [0, 0], sizes = [2, 96], strides = [1, 1]} : vector<2x128xf32> to vector<2x96xf32>
    %426 = arith.negf %425 : vector<2x96xf32>
    %427 = math.exp %426 : vector<2x96xf32>
    %cst_125 = arith.constant 1.000000e+00 : f32
    %428 = vector.broadcast %cst_125 : f32 to vector<2x96xf32>
    %429 = arith.addf %428, %427 : vector<2x96xf32>
    %430 = arith.divf %428, %429 : vector<2x96xf32>
    %431 = vector.extract_strided_slice %430 {offsets = [0, 0], sizes = [2, 32], strides = [1, 1]} : vector<2x96xf32> to vector<2x32xf32>
    %432 = vector.extract_strided_slice %430 {offsets = [0, 32], sizes = [2, 32], strides = [1, 1]} : vector<2x96xf32> to vector<2x32xf32>
    %433 = vector.extract_strided_slice %430 {offsets = [0, 64], sizes = [2, 32], strides = [1, 1]} : vector<2x96xf32> to vector<2x32xf32>
    %434 = vector.extract_strided_slice %424 {offsets = [0, 96], sizes = [2, 32], strides = [1, 1]} : vector<2x128xf32> to vector<2x32xf32>
    %435 = math.tanh %434 : vector<2x32xf32>
    %436 = arith.mulf %432, %282 : vector<2x32xf32>
    %437 = arith.mulf %431, %435 : vector<2x32xf32>
    %438 = arith.addf %436, %437 : vector<2x32xf32>
    %439 = math.tanh %438 : vector<2x32xf32>
    %440 = arith.mulf %433, %439 : vector<2x32xf32>
    %cst_126 = arith.constant dense<0.000000e+00> : vector<2x128xf32>
    %441 = tpu.matmul %304, %8, %cst_126 {dimension_numbers = #tpu.dot_dimension_numbers<[1], [0], [0], [1], [0, 0, 1, 1], [], []>} : vector<2x32xf32>, vector<32x128xf32>, vector<2x128xf32> -> vector<2x128xf32>
    %cst_127 = arith.constant dense<0.000000e+00> : vector<2x128xf32>
    %442 = tpu.matmul %440, %7, %cst_127 {dimension_numbers = #tpu.dot_dimension_numbers<[1], [0], [0], [1], [0, 0, 1, 1], [], []>} : vector<2x32xf32>, vector<32x128xf32>, vector<2x128xf32> -> vector<2x128xf32>
    %443 = arith.addf %441, %442 : vector<2x128xf32>
    %444 = arith.addf %443, %18 : vector<2x128xf32>
    %445 = vector.extract_strided_slice %444 {offsets = [0, 0], sizes = [2, 96], strides = [1, 1]} : vector<2x128xf32> to vector<2x96xf32>
    %446 = arith.negf %445 : vector<2x96xf32>
    %447 = math.exp %446 : vector<2x96xf32>
    %cst_128 = arith.constant 1.000000e+00 : f32
    %448 = vector.broadcast %cst_128 : f32 to vector<2x96xf32>
    %449 = arith.addf %448, %447 : vector<2x96xf32>
    %450 = arith.divf %448, %449 : vector<2x96xf32>
    %451 = vector.extract_strided_slice %450 {offsets = [0, 0], sizes = [2, 32], strides = [1, 1]} : vector<2x96xf32> to vector<2x32xf32>
    %452 = vector.extract_strided_slice %450 {offsets = [0, 32], sizes = [2, 32], strides = [1, 1]} : vector<2x96xf32> to vector<2x32xf32>
    %453 = vector.extract_strided_slice %450 {offsets = [0, 64], sizes = [2, 32], strides = [1, 1]} : vector<2x96xf32> to vector<2x32xf32>
    %454 = vector.extract_strided_slice %444 {offsets = [0, 96], sizes = [2, 32], strides = [1, 1]} : vector<2x128xf32> to vector<2x32xf32>
    %455 = math.tanh %454 : vector<2x32xf32>
    %456 = arith.mulf %452, %302 : vector<2x32xf32>
    %457 = arith.mulf %451, %455 : vector<2x32xf32>
    %458 = arith.addf %456, %457 : vector<2x32xf32>
    %459 = math.tanh %458 : vector<2x32xf32>
    %460 = arith.mulf %453, %459 : vector<2x32xf32>
    %cst_129 = arith.constant dense<0.000000e+00> : vector<2x128xf32>
    %461 = tpu.matmul %324, %10, %cst_129 {dimension_numbers = #tpu.dot_dimension_numbers<[1], [0], [0], [1], [0, 0, 1, 1], [], []>} : vector<2x32xf32>, vector<32x128xf32>, vector<2x128xf32> -> vector<2x128xf32>
    %cst_130 = arith.constant dense<0.000000e+00> : vector<2x128xf32>
    %462 = tpu.matmul %460, %9, %cst_130 {dimension_numbers = #tpu.dot_dimension_numbers<[1], [0], [0], [1], [0, 0, 1, 1], [], []>} : vector<2x32xf32>, vector<32x128xf32>, vector<2x128xf32> -> vector<2x128xf32>
    %463 = arith.addf %461, %462 : vector<2x128xf32>
    %464 = arith.addf %463, %22 : vector<2x128xf32>
    %465 = vector.extract_strided_slice %464 {offsets = [0, 0], sizes = [2, 96], strides = [1, 1]} : vector<2x128xf32> to vector<2x96xf32>
    %466 = arith.negf %465 : vector<2x96xf32>
    %467 = math.exp %466 : vector<2x96xf32>
    %cst_131 = arith.constant 1.000000e+00 : f32
    %468 = vector.broadcast %cst_131 : f32 to vector<2x96xf32>
    %469 = arith.addf %468, %467 : vector<2x96xf32>
    %470 = arith.divf %468, %469 : vector<2x96xf32>
    %471 = vector.extract_strided_slice %470 {offsets = [0, 0], sizes = [2, 32], strides = [1, 1]} : vector<2x96xf32> to vector<2x32xf32>
    %472 = vector.extract_strided_slice %470 {offsets = [0, 32], sizes = [2, 32], strides = [1, 1]} : vector<2x96xf32> to vector<2x32xf32>
    %473 = vector.extract_strided_slice %470 {offsets = [0, 64], sizes = [2, 32], strides = [1, 1]} : vector<2x96xf32> to vector<2x32xf32>
    %474 = vector.extract_strided_slice %464 {offsets = [0, 96], sizes = [2, 32], strides = [1, 1]} : vector<2x128xf32> to vector<2x32xf32>
    %475 = math.tanh %474 : vector<2x32xf32>
    %476 = arith.mulf %472, %322 : vector<2x32xf32>
    %477 = arith.mulf %471, %475 : vector<2x32xf32>
    %478 = arith.addf %476, %477 : vector<2x32xf32>
    %479 = math.tanh %478 : vector<2x32xf32>
    %480 = arith.mulf %473, %479 : vector<2x32xf32>
    %481 = vector.extract_strided_slice %418 {offsets = [0, 1], sizes = [2, 1], strides = [1, 1]} : vector<2x4xf32> to vector<2x1xf32>
    %482 = vector.broadcast %481 : vector<2x1xf32> to vector<2x128xf32>
    %483 = arith.mulf %482, %5 : vector<2x128xf32>
    %cst_132 = arith.constant dense<0.000000e+00> : vector<2x128xf32>
    %484 = tpu.matmul %440, %6, %cst_132 {dimension_numbers = #tpu.dot_dimension_numbers<[1], [0], [0], [1], [0, 0, 1, 1], [], []>} : vector<2x32xf32>, vector<32x128xf32>, vector<2x128xf32> -> vector<2x128xf32>
    %485 = arith.addf %483, %484 : vector<2x128xf32>
    %486 = arith.addf %485, %14 : vector<2x128xf32>
    %487 = vector.extract_strided_slice %486 {offsets = [0, 0], sizes = [2, 96], strides = [1, 1]} : vector<2x128xf32> to vector<2x96xf32>
    %488 = arith.negf %487 : vector<2x96xf32>
    %489 = math.exp %488 : vector<2x96xf32>
    %cst_133 = arith.constant 1.000000e+00 : f32
    %490 = vector.broadcast %cst_133 : f32 to vector<2x96xf32>
    %491 = arith.addf %490, %489 : vector<2x96xf32>
    %492 = arith.divf %490, %491 : vector<2x96xf32>
    %493 = vector.extract_strided_slice %492 {offsets = [0, 0], sizes = [2, 32], strides = [1, 1]} : vector<2x96xf32> to vector<2x32xf32>
    %494 = vector.extract_strided_slice %492 {offsets = [0, 32], sizes = [2, 32], strides = [1, 1]} : vector<2x96xf32> to vector<2x32xf32>
    %495 = vector.extract_strided_slice %492 {offsets = [0, 64], sizes = [2, 32], strides = [1, 1]} : vector<2x96xf32> to vector<2x32xf32>
    %496 = vector.extract_strided_slice %486 {offsets = [0, 96], sizes = [2, 32], strides = [1, 1]} : vector<2x128xf32> to vector<2x32xf32>
    %497 = math.tanh %496 : vector<2x32xf32>
    %498 = arith.mulf %494, %438 : vector<2x32xf32>
    %499 = arith.mulf %493, %497 : vector<2x32xf32>
    %500 = arith.addf %498, %499 : vector<2x32xf32>
    %501 = math.tanh %500 : vector<2x32xf32>
    %502 = arith.mulf %495, %501 : vector<2x32xf32>
    %cst_134 = arith.constant dense<0.000000e+00> : vector<2x128xf32>
    %503 = tpu.matmul %460, %8, %cst_134 {dimension_numbers = #tpu.dot_dimension_numbers<[1], [0], [0], [1], [0, 0, 1, 1], [], []>} : vector<2x32xf32>, vector<32x128xf32>, vector<2x128xf32> -> vector<2x128xf32>
    %cst_135 = arith.constant dense<0.000000e+00> : vector<2x128xf32>
    %504 = tpu.matmul %502, %7, %cst_135 {dimension_numbers = #tpu.dot_dimension_numbers<[1], [0], [0], [1], [0, 0, 1, 1], [], []>} : vector<2x32xf32>, vector<32x128xf32>, vector<2x128xf32> -> vector<2x128xf32>
    %505 = arith.addf %503, %504 : vector<2x128xf32>
    %506 = arith.addf %505, %18 : vector<2x128xf32>
    %507 = vector.extract_strided_slice %506 {offsets = [0, 0], sizes = [2, 96], strides = [1, 1]} : vector<2x128xf32> to vector<2x96xf32>
    %508 = arith.negf %507 : vector<2x96xf32>
    %509 = math.exp %508 : vector<2x96xf32>
    %cst_136 = arith.constant 1.000000e+00 : f32
    %510 = vector.broadcast %cst_136 : f32 to vector<2x96xf32>
    %511 = arith.addf %510, %509 : vector<2x96xf32>
    %512 = arith.divf %510, %511 : vector<2x96xf32>
    %513 = vector.extract_strided_slice %512 {offsets = [0, 0], sizes = [2, 32], strides = [1, 1]} : vector<2x96xf32> to vector<2x32xf32>
    %514 = vector.extract_strided_slice %512 {offsets = [0, 32], sizes = [2, 32], strides = [1, 1]} : vector<2x96xf32> to vector<2x32xf32>
    %515 = vector.extract_strided_slice %512 {offsets = [0, 64], sizes = [2, 32], strides = [1, 1]} : vector<2x96xf32> to vector<2x32xf32>
    %516 = vector.extract_strided_slice %506 {offsets = [0, 96], sizes = [2, 32], strides = [1, 1]} : vector<2x128xf32> to vector<2x32xf32>
    %517 = math.tanh %516 : vector<2x32xf32>
    %518 = arith.mulf %514, %458 : vector<2x32xf32>
    %519 = arith.mulf %513, %517 : vector<2x32xf32>
    %520 = arith.addf %518, %519 : vector<2x32xf32>
    %521 = math.tanh %520 : vector<2x32xf32>
    %522 = arith.mulf %515, %521 : vector<2x32xf32>
    %cst_137 = arith.constant dense<0.000000e+00> : vector<2x128xf32>
    %523 = tpu.matmul %480, %10, %cst_137 {dimension_numbers = #tpu.dot_dimension_numbers<[1], [0], [0], [1], [0, 0, 1, 1], [], []>} : vector<2x32xf32>, vector<32x128xf32>, vector<2x128xf32> -> vector<2x128xf32>
    %cst_138 = arith.constant dense<0.000000e+00> : vector<2x128xf32>
    %524 = tpu.matmul %522, %9, %cst_138 {dimension_numbers = #tpu.dot_dimension_numbers<[1], [0], [0], [1], [0, 0, 1, 1], [], []>} : vector<2x32xf32>, vector<32x128xf32>, vector<2x128xf32> -> vector<2x128xf32>
    %525 = arith.addf %523, %524 : vector<2x128xf32>
    %526 = arith.addf %525, %22 : vector<2x128xf32>
    %527 = vector.extract_strided_slice %526 {offsets = [0, 0], sizes = [2, 96], strides = [1, 1]} : vector<2x128xf32> to vector<2x96xf32>
    %528 = arith.negf %527 : vector<2x96xf32>
    %529 = math.exp %528 : vector<2x96xf32>
    %cst_139 = arith.constant 1.000000e+00 : f32
    %530 = vector.broadcast %cst_139 : f32 to vector<2x96xf32>
    %531 = arith.addf %530, %529 : vector<2x96xf32>
    %532 = arith.divf %530, %531 : vector<2x96xf32>
    %533 = vector.extract_strided_slice %532 {offsets = [0, 0], sizes = [2, 32], strides = [1, 1]} : vector<2x96xf32> to vector<2x32xf32>
    %534 = vector.extract_strided_slice %532 {offsets = [0, 32], sizes = [2, 32], strides = [1, 1]} : vector<2x96xf32> to vector<2x32xf32>
    %535 = vector.extract_strided_slice %532 {offsets = [0, 64], sizes = [2, 32], strides = [1, 1]} : vector<2x96xf32> to vector<2x32xf32>
    %536 = vector.extract_strided_slice %526 {offsets = [0, 96], sizes = [2, 32], strides = [1, 1]} : vector<2x128xf32> to vector<2x32xf32>
    %537 = math.tanh %536 : vector<2x32xf32>
    %538 = arith.mulf %534, %478 : vector<2x32xf32>
    %539 = arith.mulf %533, %537 : vector<2x32xf32>
    %540 = arith.addf %538, %539 : vector<2x32xf32>
    %541 = math.tanh %540 : vector<2x32xf32>
    %542 = arith.mulf %535, %541 : vector<2x32xf32>
    %543 = vector.extract_strided_slice %418 {offsets = [0, 2], sizes = [2, 1], strides = [1, 1]} : vector<2x4xf32> to vector<2x1xf32>
    %544 = vector.broadcast %543 : vector<2x1xf32> to vector<2x128xf32>
    %545 = arith.mulf %544, %5 : vector<2x128xf32>
    %cst_140 = arith.constant dense<0.000000e+00> : vector<2x128xf32>
    %546 = tpu.matmul %502, %6, %cst_140 {dimension_numbers = #tpu.dot_dimension_numbers<[1], [0], [0], [1], [0, 0, 1, 1], [], []>} : vector<2x32xf32>, vector<32x128xf32>, vector<2x128xf32> -> vector<2x128xf32>
    %547 = arith.addf %545, %546 : vector<2x128xf32>
    %548 = arith.addf %547, %14 : vector<2x128xf32>
    %549 = vector.extract_strided_slice %548 {offsets = [0, 0], sizes = [2, 96], strides = [1, 1]} : vector<2x128xf32> to vector<2x96xf32>
    %550 = arith.negf %549 : vector<2x96xf32>
    %551 = math.exp %550 : vector<2x96xf32>
    %cst_141 = arith.constant 1.000000e+00 : f32
    %552 = vector.broadcast %cst_141 : f32 to vector<2x96xf32>
    %553 = arith.addf %552, %551 : vector<2x96xf32>
    %554 = arith.divf %552, %553 : vector<2x96xf32>
    %555 = vector.extract_strided_slice %554 {offsets = [0, 0], sizes = [2, 32], strides = [1, 1]} : vector<2x96xf32> to vector<2x32xf32>
    %556 = vector.extract_strided_slice %554 {offsets = [0, 32], sizes = [2, 32], strides = [1, 1]} : vector<2x96xf32> to vector<2x32xf32>
    %557 = vector.extract_strided_slice %554 {offsets = [0, 64], sizes = [2, 32], strides = [1, 1]} : vector<2x96xf32> to vector<2x32xf32>
    %558 = vector.extract_strided_slice %548 {offsets = [0, 96], sizes = [2, 32], strides = [1, 1]} : vector<2x128xf32> to vector<2x32xf32>
    %559 = math.tanh %558 : vector<2x32xf32>
    %560 = arith.mulf %556, %500 : vector<2x32xf32>
    %561 = arith.mulf %555, %559 : vector<2x32xf32>
    %562 = arith.addf %560, %561 : vector<2x32xf32>
    %563 = math.tanh %562 : vector<2x32xf32>
    %564 = arith.mulf %557, %563 : vector<2x32xf32>
    %cst_142 = arith.constant dense<0.000000e+00> : vector<2x128xf32>
    %565 = tpu.matmul %522, %8, %cst_142 {dimension_numbers = #tpu.dot_dimension_numbers<[1], [0], [0], [1], [0, 0, 1, 1], [], []>} : vector<2x32xf32>, vector<32x128xf32>, vector<2x128xf32> -> vector<2x128xf32>
    %cst_143 = arith.constant dense<0.000000e+00> : vector<2x128xf32>
    %566 = tpu.matmul %564, %7, %cst_143 {dimension_numbers = #tpu.dot_dimension_numbers<[1], [0], [0], [1], [0, 0, 1, 1], [], []>} : vector<2x32xf32>, vector<32x128xf32>, vector<2x128xf32> -> vector<2x128xf32>
    %567 = arith.addf %565, %566 : vector<2x128xf32>
    %568 = arith.addf %567, %18 : vector<2x128xf32>
    %569 = vector.extract_strided_slice %568 {offsets = [0, 0], sizes = [2, 96], strides = [1, 1]} : vector<2x128xf32> to vector<2x96xf32>
    %570 = arith.negf %569 : vector<2x96xf32>
    %571 = math.exp %570 : vector<2x96xf32>
    %cst_144 = arith.constant 1.000000e+00 : f32
    %572 = vector.broadcast %cst_144 : f32 to vector<2x96xf32>
    %573 = arith.addf %572, %571 : vector<2x96xf32>
    %574 = arith.divf %572, %573 : vector<2x96xf32>
    %575 = vector.extract_strided_slice %574 {offsets = [0, 0], sizes = [2, 32], strides = [1, 1]} : vector<2x96xf32> to vector<2x32xf32>
    %576 = vector.extract_strided_slice %574 {offsets = [0, 32], sizes = [2, 32], strides = [1, 1]} : vector<2x96xf32> to vector<2x32xf32>
    %577 = vector.extract_strided_slice %574 {offsets = [0, 64], sizes = [2, 32], strides = [1, 1]} : vector<2x96xf32> to vector<2x32xf32>
    %578 = vector.extract_strided_slice %568 {offsets = [0, 96], sizes = [2, 32], strides = [1, 1]} : vector<2x128xf32> to vector<2x32xf32>
    %579 = math.tanh %578 : vector<2x32xf32>
    %580 = arith.mulf %576, %520 : vector<2x32xf32>
    %581 = arith.mulf %575, %579 : vector<2x32xf32>
    %582 = arith.addf %580, %581 : vector<2x32xf32>
    %583 = math.tanh %582 : vector<2x32xf32>
    %584 = arith.mulf %577, %583 : vector<2x32xf32>
    %cst_145 = arith.constant dense<0.000000e+00> : vector<2x128xf32>
    %585 = tpu.matmul %542, %10, %cst_145 {dimension_numbers = #tpu.dot_dimension_numbers<[1], [0], [0], [1], [0, 0, 1, 1], [], []>} : vector<2x32xf32>, vector<32x128xf32>, vector<2x128xf32> -> vector<2x128xf32>
    %cst_146 = arith.constant dense<0.000000e+00> : vector<2x128xf32>
    %586 = tpu.matmul %584, %9, %cst_146 {dimension_numbers = #tpu.dot_dimension_numbers<[1], [0], [0], [1], [0, 0, 1, 1], [], []>} : vector<2x32xf32>, vector<32x128xf32>, vector<2x128xf32> -> vector<2x128xf32>
    %587 = arith.addf %585, %586 : vector<2x128xf32>
    %588 = arith.addf %587, %22 : vector<2x128xf32>
    %589 = vector.extract_strided_slice %588 {offsets = [0, 0], sizes = [2, 96], strides = [1, 1]} : vector<2x128xf32> to vector<2x96xf32>
    %590 = arith.negf %589 : vector<2x96xf32>
    %591 = math.exp %590 : vector<2x96xf32>
    %cst_147 = arith.constant 1.000000e+00 : f32
    %592 = vector.broadcast %cst_147 : f32 to vector<2x96xf32>
    %593 = arith.addf %592, %591 : vector<2x96xf32>
    %594 = arith.divf %592, %593 : vector<2x96xf32>
    %595 = vector.extract_strided_slice %594 {offsets = [0, 0], sizes = [2, 32], strides = [1, 1]} : vector<2x96xf32> to vector<2x32xf32>
    %596 = vector.extract_strided_slice %594 {offsets = [0, 32], sizes = [2, 32], strides = [1, 1]} : vector<2x96xf32> to vector<2x32xf32>
    %597 = vector.extract_strided_slice %594 {offsets = [0, 64], sizes = [2, 32], strides = [1, 1]} : vector<2x96xf32> to vector<2x32xf32>
    %598 = vector.extract_strided_slice %588 {offsets = [0, 96], sizes = [2, 32], strides = [1, 1]} : vector<2x128xf32> to vector<2x32xf32>
    %599 = math.tanh %598 : vector<2x32xf32>
    %600 = arith.mulf %596, %540 : vector<2x32xf32>
    %601 = arith.mulf %595, %599 : vector<2x32xf32>
    %602 = arith.addf %600, %601 : vector<2x32xf32>
    %603 = math.tanh %602 : vector<2x32xf32>
    %604 = arith.mulf %597, %603 : vector<2x32xf32>
    %cst_148 = arith.constant dense<0.000000e+00> : vector<2x32xf32>
    %605 = tpu.matmul %604, %23, %cst_148 {dimension_numbers = #tpu.dot_dimension_numbers<[1], [0], [0], [1], [0, 0, 1, 1], [], []>} : vector<2x32xf32>, vector<32x32xf32>, vector<2x32xf32> -> vector<2x32xf32>
    %606 = vector.broadcast %24 : vector<1x32xf32> to vector<2x32xf32>
    %607 = arith.addf %605, %606 : vector<2x32xf32>
    %608 = math.tanh %607 : vector<2x32xf32>
    %cst_149 = arith.constant dense<0.000000e+00> : vector<2x32xf32>
    %609 = tpu.matmul %608, %25, %cst_149 {dimension_numbers = #tpu.dot_dimension_numbers<[1], [0], [0], [1], [0, 0, 1, 1], [], []>} : vector<2x32xf32>, vector<32x32xf32>, vector<2x32xf32> -> vector<2x32xf32>
    %610 = vector.broadcast %26 : vector<1x32xf32> to vector<2x32xf32>
    %611 = arith.addf %609, %610 : vector<2x32xf32>
    %612 = vector.extract_strided_slice %418 {offsets = [0, 3], sizes = [2, 1], strides = [1, 1]} : vector<2x4xf32> to vector<2x1xf32>
    %613 = vector.broadcast %612 : vector<2x1xf32> to vector<2x128xf32>
    %614 = arith.mulf %613, %5 : vector<2x128xf32>
    %cst_150 = arith.constant dense<0.000000e+00> : vector<2x128xf32>
    %615 = tpu.matmul %564, %6, %cst_150 {dimension_numbers = #tpu.dot_dimension_numbers<[1], [0], [0], [1], [0, 0, 1, 1], [], []>} : vector<2x32xf32>, vector<32x128xf32>, vector<2x128xf32> -> vector<2x128xf32>
    %616 = arith.addf %614, %615 : vector<2x128xf32>
    %617 = arith.addf %616, %14 : vector<2x128xf32>
    %618 = vector.extract_strided_slice %617 {offsets = [0, 0], sizes = [2, 96], strides = [1, 1]} : vector<2x128xf32> to vector<2x96xf32>
    %619 = arith.negf %618 : vector<2x96xf32>
    %620 = math.exp %619 : vector<2x96xf32>
    %cst_151 = arith.constant 1.000000e+00 : f32
    %621 = vector.broadcast %cst_151 : f32 to vector<2x96xf32>
    %622 = arith.addf %621, %620 : vector<2x96xf32>
    %623 = arith.divf %621, %622 : vector<2x96xf32>
    %624 = vector.extract_strided_slice %623 {offsets = [0, 0], sizes = [2, 32], strides = [1, 1]} : vector<2x96xf32> to vector<2x32xf32>
    %625 = vector.extract_strided_slice %623 {offsets = [0, 32], sizes = [2, 32], strides = [1, 1]} : vector<2x96xf32> to vector<2x32xf32>
    %626 = vector.extract_strided_slice %623 {offsets = [0, 64], sizes = [2, 32], strides = [1, 1]} : vector<2x96xf32> to vector<2x32xf32>
    %627 = vector.extract_strided_slice %617 {offsets = [0, 96], sizes = [2, 32], strides = [1, 1]} : vector<2x128xf32> to vector<2x32xf32>
    %628 = math.tanh %627 : vector<2x32xf32>
    %629 = arith.mulf %625, %562 : vector<2x32xf32>
    %630 = arith.mulf %624, %628 : vector<2x32xf32>
    %631 = arith.addf %629, %630 : vector<2x32xf32>
    %632 = math.tanh %631 : vector<2x32xf32>
    %633 = arith.mulf %626, %632 : vector<2x32xf32>
    %cst_152 = arith.constant dense<0.000000e+00> : vector<2x128xf32>
    %634 = tpu.matmul %584, %8, %cst_152 {dimension_numbers = #tpu.dot_dimension_numbers<[1], [0], [0], [1], [0, 0, 1, 1], [], []>} : vector<2x32xf32>, vector<32x128xf32>, vector<2x128xf32> -> vector<2x128xf32>
    %cst_153 = arith.constant dense<0.000000e+00> : vector<2x128xf32>
    %635 = tpu.matmul %633, %7, %cst_153 {dimension_numbers = #tpu.dot_dimension_numbers<[1], [0], [0], [1], [0, 0, 1, 1], [], []>} : vector<2x32xf32>, vector<32x128xf32>, vector<2x128xf32> -> vector<2x128xf32>
    %636 = arith.addf %634, %635 : vector<2x128xf32>
    %637 = arith.addf %636, %18 : vector<2x128xf32>
    %638 = vector.extract_strided_slice %637 {offsets = [0, 0], sizes = [2, 96], strides = [1, 1]} : vector<2x128xf32> to vector<2x96xf32>
    %639 = arith.negf %638 : vector<2x96xf32>
    %640 = math.exp %639 : vector<2x96xf32>
    %cst_154 = arith.constant 1.000000e+00 : f32
    %641 = vector.broadcast %cst_154 : f32 to vector<2x96xf32>
    %642 = arith.addf %641, %640 : vector<2x96xf32>
    %643 = arith.divf %641, %642 : vector<2x96xf32>
    %644 = vector.extract_strided_slice %643 {offsets = [0, 0], sizes = [2, 32], strides = [1, 1]} : vector<2x96xf32> to vector<2x32xf32>
    %645 = vector.extract_strided_slice %643 {offsets = [0, 32], sizes = [2, 32], strides = [1, 1]} : vector<2x96xf32> to vector<2x32xf32>
    %646 = vector.extract_strided_slice %643 {offsets = [0, 64], sizes = [2, 32], strides = [1, 1]} : vector<2x96xf32> to vector<2x32xf32>
    %647 = vector.extract_strided_slice %637 {offsets = [0, 96], sizes = [2, 32], strides = [1, 1]} : vector<2x128xf32> to vector<2x32xf32>
    %648 = math.tanh %647 : vector<2x32xf32>
    %649 = arith.mulf %645, %582 : vector<2x32xf32>
    %650 = arith.mulf %644, %648 : vector<2x32xf32>
    %651 = arith.addf %649, %650 : vector<2x32xf32>
    %652 = math.tanh %651 : vector<2x32xf32>
    %653 = arith.mulf %646, %652 : vector<2x32xf32>
    %cst_155 = arith.constant dense<0.000000e+00> : vector<2x128xf32>
    %654 = tpu.matmul %604, %10, %cst_155 {dimension_numbers = #tpu.dot_dimension_numbers<[1], [0], [0], [1], [0, 0, 1, 1], [], []>} : vector<2x32xf32>, vector<32x128xf32>, vector<2x128xf32> -> vector<2x128xf32>
    %cst_156 = arith.constant dense<0.000000e+00> : vector<2x128xf32>
    %655 = tpu.matmul %653, %9, %cst_156 {dimension_numbers = #tpu.dot_dimension_numbers<[1], [0], [0], [1], [0, 0, 1, 1], [], []>} : vector<2x32xf32>, vector<32x128xf32>, vector<2x128xf32> -> vector<2x128xf32>
    %656 = arith.addf %654, %655 : vector<2x128xf32>
    %657 = arith.addf %656, %22 : vector<2x128xf32>
    %658 = vector.extract_strided_slice %657 {offsets = [0, 0], sizes = [2, 96], strides = [1, 1]} : vector<2x128xf32> to vector<2x96xf32>
    %659 = arith.negf %658 : vector<2x96xf32>
    %660 = math.exp %659 : vector<2x96xf32>
    %cst_157 = arith.constant 1.000000e+00 : f32
    %661 = vector.broadcast %cst_157 : f32 to vector<2x96xf32>
    %662 = arith.addf %661, %660 : vector<2x96xf32>
    %663 = arith.divf %661, %662 : vector<2x96xf32>
    %664 = vector.extract_strided_slice %663 {offsets = [0, 0], sizes = [2, 32], strides = [1, 1]} : vector<2x96xf32> to vector<2x32xf32>
    %665 = vector.extract_strided_slice %663 {offsets = [0, 32], sizes = [2, 32], strides = [1, 1]} : vector<2x96xf32> to vector<2x32xf32>
    %666 = vector.extract_strided_slice %663 {offsets = [0, 64], sizes = [2, 32], strides = [1, 1]} : vector<2x96xf32> to vector<2x32xf32>
    %667 = vector.extract_strided_slice %657 {offsets = [0, 96], sizes = [2, 32], strides = [1, 1]} : vector<2x128xf32> to vector<2x32xf32>
    %668 = math.tanh %667 : vector<2x32xf32>
    %669 = arith.mulf %665, %602 : vector<2x32xf32>
    %670 = arith.mulf %664, %668 : vector<2x32xf32>
    %671 = arith.addf %669, %670 : vector<2x32xf32>
    %672 = math.tanh %671 : vector<2x32xf32>
    %673 = arith.mulf %666, %672 : vector<2x32xf32>
    %cst_158 = arith.constant dense<0.000000e+00> : vector<2x128xf32>
    %674 = tpu.matmul %611, %27, %cst_158 {dimension_numbers = #tpu.dot_dimension_numbers<[1], [0], [0], [1], [0, 0, 1, 1], [], []>} : vector<2x32xf32>, vector<32x128xf32>, vector<2x128xf32> -> vector<2x128xf32>
    %675 = vector.broadcast %28 : vector<1x128xf32> to vector<2x128xf32>
    %676 = arith.addf %674, %675 : vector<2x128xf32>
    %cst_159 = arith.constant 0.000000e+00 : f32
    %677 = vector.broadcast %cst_159 : f32 to vector<2x4xf32>
    %678 = arith.subf %418, %677 : vector<2x4xf32>
    %cst_160 = arith.constant 1.000000e+00 : f32
    %679 = vector.broadcast %cst_160 : f32 to vector<2x4xf32>
    %680 = arith.mulf %678, %679 : vector<2x4xf32>
    %681 = vector.extract_strided_slice %680 {offsets = [0, 0], sizes = [2, 2], strides = [1, 1]} : vector<2x4xf32> to vector<2x2xf32>
    %682 = vector.extract_strided_slice %680 {offsets = [0, 2], sizes = [2, 2], strides = [1, 1]} : vector<2x4xf32> to vector<2x2xf32>
    %cst_161 = arith.constant 0.000000e+00 : f32
    %683 = vector.broadcast %cst_161 : f32 to vector<2x1xf32>
    %684 = vector.extract_strided_slice %676 {offsets = [0, 0], sizes = [2, 32], strides = [1, 1]} : vector<2x128xf32> to vector<2x32xf32>
    %685 = vector.extract_strided_slice %681 {offsets = [0, 0], sizes = [2, 1], strides = [1, 1]} : vector<2x2xf32> to vector<2x1xf32>
    %686 = vector.broadcast %685 : vector<2x1xf32> to vector<2x32xf32>
    %687 = vector.broadcast %39 : vector<1x32xf32> to vector<2x32xf32>
    %688 = arith.mulf %686, %687 : vector<2x32xf32>
    %689 = arith.addf %684, %688 : vector<2x32xf32>
    %690 = vector.extract_strided_slice %681 {offsets = [0, 1], sizes = [2, 1], strides = [1, 1]} : vector<2x2xf32> to vector<2x1xf32>
    %691 = vector.broadcast %690 : vector<2x1xf32> to vector<2x32xf32>
    %692 = vector.broadcast %41 : vector<1x32xf32> to vector<2x32xf32>
    %693 = arith.mulf %691, %692 : vector<2x32xf32>
    %694 = arith.addf %689, %693 : vector<2x32xf32>
    %695 = math.tanh %694 : vector<2x32xf32>
    %cst_162 = arith.constant dense<0.000000e+00> : vector<2x4xf32>
    %696 = tpu.matmul %695, %47, %cst_162 {dimension_numbers = #tpu.dot_dimension_numbers<[1], [0], [0], [1], [0, 0, 1, 1], [], []>} : vector<2x32xf32>, vector<32x4xf32>, vector<2x4xf32> -> vector<2x4xf32>
    %697 = vector.broadcast %51 : vector<1x4xf32> to vector<2x4xf32>
    %698 = arith.addf %696, %697 : vector<2x4xf32>
    %699 = vector.extract_strided_slice %698 {offsets = [0, 0], sizes = [2, 2], strides = [1, 1]} : vector<2x4xf32> to vector<2x2xf32>
    %700 = math.tanh %699 : vector<2x2xf32>
    %701 = vector.extract_strided_slice %698 {offsets = [0, 2], sizes = [2, 2], strides = [1, 1]} : vector<2x4xf32> to vector<2x2xf32>
    %702 = math.exp %700 : vector<2x2xf32>
    %703 = arith.mulf %682, %702 : vector<2x2xf32>
    %704 = arith.addf %703, %701 : vector<2x2xf32>
    %cst_163 = arith.constant dense<0.000000e+00> : vector<2xf32>
    %705 = vector.multi_reduction <add>, %700, %cst_163 [1] : vector<2x2xf32> to vector<2xf32>
    %706 = vector.shape_cast %705 : vector<2xf32> to vector<2x1xf32>
    %707 = arith.addf %683, %706 : vector<2x1xf32>
    %708 = vector.extract_strided_slice %676 {offsets = [0, 32], sizes = [2, 32], strides = [1, 1]} : vector<2x128xf32> to vector<2x32xf32>
    %709 = vector.extract_strided_slice %704 {offsets = [0, 0], sizes = [2, 1], strides = [1, 1]} : vector<2x2xf32> to vector<2x1xf32>
    %710 = vector.broadcast %709 : vector<2x1xf32> to vector<2x32xf32>
    %711 = vector.broadcast %43 : vector<1x32xf32> to vector<2x32xf32>
    %712 = arith.mulf %710, %711 : vector<2x32xf32>
    %713 = arith.addf %708, %712 : vector<2x32xf32>
    %714 = vector.extract_strided_slice %704 {offsets = [0, 1], sizes = [2, 1], strides = [1, 1]} : vector<2x2xf32> to vector<2x1xf32>
    %715 = vector.broadcast %714 : vector<2x1xf32> to vector<2x32xf32>
    %716 = vector.broadcast %45 : vector<1x32xf32> to vector<2x32xf32>
    %717 = arith.mulf %715, %716 : vector<2x32xf32>
    %718 = arith.addf %713, %717 : vector<2x32xf32>
    %719 = math.tanh %718 : vector<2x32xf32>
    %cst_164 = arith.constant dense<0.000000e+00> : vector<2x4xf32>
    %720 = tpu.matmul %719, %49, %cst_164 {dimension_numbers = #tpu.dot_dimension_numbers<[1], [0], [0], [1], [0, 0, 1, 1], [], []>} : vector<2x32xf32>, vector<32x4xf32>, vector<2x4xf32> -> vector<2x4xf32>
    %721 = vector.broadcast %53 : vector<1x4xf32> to vector<2x4xf32>
    %722 = arith.addf %720, %721 : vector<2x4xf32>
    %723 = vector.extract_strided_slice %722 {offsets = [0, 0], sizes = [2, 2], strides = [1, 1]} : vector<2x4xf32> to vector<2x2xf32>
    %724 = math.tanh %723 : vector<2x2xf32>
    %725 = vector.extract_strided_slice %722 {offsets = [0, 2], sizes = [2, 2], strides = [1, 1]} : vector<2x4xf32> to vector<2x2xf32>
    %726 = math.exp %724 : vector<2x2xf32>
    %727 = arith.mulf %681, %726 : vector<2x2xf32>
    %728 = arith.addf %727, %725 : vector<2x2xf32>
    %cst_165 = arith.constant dense<0.000000e+00> : vector<2xf32>
    %729 = vector.multi_reduction <add>, %724, %cst_165 [1] : vector<2x2xf32> to vector<2xf32>
    %730 = vector.shape_cast %729 : vector<2xf32> to vector<2x1xf32>
    %731 = arith.addf %707, %730 : vector<2x1xf32>
    %732 = vector.extract_strided_slice %676 {offsets = [0, 64], sizes = [2, 32], strides = [1, 1]} : vector<2x128xf32> to vector<2x32xf32>
    %733 = math.tanh %732 : vector<2x32xf32>
    %734 = vector.extract_strided_slice %676 {offsets = [0, 96], sizes = [2, 16], strides = [1, 1]} : vector<2x128xf32> to vector<2x16xf32>
    %735 = math.tanh %734 : vector<2x16xf32>
    %cst_166 = arith.constant dense<0.000000e+00> : vector<2x4xf32>
    %736 = tpu.matmul %735, %32, %cst_166 {dimension_numbers = #tpu.dot_dimension_numbers<[1], [0], [0], [1], [0, 0, 1, 1], [], []>} : vector<2x16xf32>, vector<16x4xf32>, vector<2x4xf32> -> vector<2x4xf32>
    %737 = vector.broadcast %33 : vector<1x4xf32> to vector<2x4xf32>
    %738 = arith.addf %736, %737 : vector<2x4xf32>
    %739 = math.tanh %738 : vector<2x4xf32>
    %740 = vector.broadcast %34 : vector<1x4xf32> to vector<2x4xf32>
    %741 = arith.mulf %739, %740 : vector<2x4xf32>
    %cst_167 = arith.constant dense<0.000000e+00> : vector<2x4xf32>
    %742 = tpu.matmul %733, %35, %cst_167 {dimension_numbers = #tpu.dot_dimension_numbers<[1], [0], [0], [1], [0, 0, 1, 1], [], []>} : vector<2x32xf32>, vector<32x4xf32>, vector<2x4xf32> -> vector<2x4xf32>
    %743 = vector.broadcast %36 : vector<1x4xf32> to vector<2x4xf32>
    %744 = arith.addf %742, %743 : vector<2x4xf32>
    %745 = math.tanh %744 : vector<2x4xf32>
    %746 = vector.broadcast %37 : vector<1x4xf32> to vector<2x4xf32>
    %747 = arith.mulf %745, %746 : vector<2x4xf32>
    %748 = math.absf %747 : vector<2x4xf32>
    %749 = tpu.concatenate %728, %704 in 1 : vector<2x2xf32>, vector<2x2xf32> -> vector<2x4xf32>
    %750 = arith.subf %749, %741 : vector<2x4xf32>
    %751 = arith.divf %750, %748 : vector<2x4xf32>
    %752 = arith.index_cast %c1_i32 : i32 to index
    %c0_168 = arith.constant 0 : index
    %c0_169 = arith.constant 0 : index
    %753 = vector.load %arg25[%752, %c0_168, %c0_169] : memref<2x2x4xf32, #tpu.memory_space<vmem>>, vector<1x2x4xf32>
    %754 = vector.shape_cast %753 : vector<1x2x4xf32> to vector<2x4xf32>
    %755 = vector.shape_cast %751 : vector<2x4xf32> to vector<1x2x4xf32>
    tpu.vector_store %arg25[%752, %c0_168, %c0_169], %755 {strides = array<i32>} : memref<2x2x4xf32, #tpu.memory_space<vmem>>, vector<1x2x4xf32>,
    %756 = arith.mulf %751, %751 : vector<2x4xf32>
    %cst_170 = arith.constant dense<0.000000e+00> : vector<2xf32>
    %757 = vector.multi_reduction <add>, %756, %cst_170 [1] : vector<2x4xf32> to vector<2xf32>
    %758 = vector.shape_cast %757 : vector<2xf32> to vector<2x1xf32>
    %cst_171 = arith.constant -5.000000e-01 : f32
    %759 = vector.broadcast %cst_171 : f32 to vector<2x1xf32>
    %760 = arith.mulf %759, %758 : vector<2x1xf32>
    %cst_172 = arith.constant -3.67575407 : f32
    %761 = vector.broadcast %cst_172 : f32 to vector<2x1xf32>
    %762 = arith.addf %760, %761 : vector<2x1xf32>
    %763 = arith.addf %414, %731 : vector<2x1xf32>
    %764 = arith.addf %415, %762 : vector<2x1xf32>
    %c2_i32 = arith.constant 2 : i32
    %c0_173 = arith.constant 0 : index
    %c0_174 = arith.constant 0 : index
    %c0_175 = arith.constant 0 : index
    %765 = vector.load %arg27[%c0_173, %c0_174, %c0_175] : memref<3x2x32xf32, #tpu.memory_space<vmem>>, vector<1x2x32xf32>
    %766 = vector.shape_cast %765 : vector<1x2x32xf32> to vector<2x32xf32>
    %767 = vector.shape_cast %633 : vector<2x32xf32> to vector<1x2x32xf32>
    tpu.vector_store %arg27[%c0_173, %c0_174, %c0_175], %767 {strides = array<i32>} : memref<3x2x32xf32, #tpu.memory_space<vmem>>, vector<1x2x32xf32>,
    %c0_176 = arith.constant 0 : index
    %c0_177 = arith.constant 0 : index
    %c0_178 = arith.constant 0 : index
    %768 = vector.load %arg28[%c0_176, %c0_177, %c0_178] : memref<3x2x32xf32, #tpu.memory_space<vmem>>, vector<1x2x32xf32>
    %769 = vector.shape_cast %768 : vector<1x2x32xf32> to vector<2x32xf32>
    %770 = vector.shape_cast %631 : vector<2x32xf32> to vector<1x2x32xf32>
    tpu.vector_store %arg28[%c0_176, %c0_177, %c0_178], %770 {strides = array<i32>} : memref<3x2x32xf32, #tpu.memory_space<vmem>>, vector<1x2x32xf32>,
    %c1_179 = arith.constant 1 : index
    %c0_180 = arith.constant 0 : index
    %c0_181 = arith.constant 0 : index
    %771 = vector.load %arg27[%c1_179, %c0_180, %c0_181] : memref<3x2x32xf32, #tpu.memory_space<vmem>>, vector<1x2x32xf32>
    %772 = vector.shape_cast %771 : vector<1x2x32xf32> to vector<2x32xf32>
    %773 = vector.shape_cast %653 : vector<2x32xf32> to vector<1x2x32xf32>
    tpu.vector_store %arg27[%c1_179, %c0_180, %c0_181], %773 {strides = array<i32>} : memref<3x2x32xf32, #tpu.memory_space<vmem>>, vector<1x2x32xf32>,
    %c1_182 = arith.constant 1 : index
    %c0_183 = arith.constant 0 : index
    %c0_184 = arith.constant 0 : index
    %774 = vector.load %arg28[%c1_182, %c0_183, %c0_184] : memref<3x2x32xf32, #tpu.memory_space<vmem>>, vector<1x2x32xf32>
    %775 = vector.shape_cast %774 : vector<1x2x32xf32> to vector<2x32xf32>
    %776 = vector.shape_cast %651 : vector<2x32xf32> to vector<1x2x32xf32>
    tpu.vector_store %arg28[%c1_182, %c0_183, %c0_184], %776 {strides = array<i32>} : memref<3x2x32xf32, #tpu.memory_space<vmem>>, vector<1x2x32xf32>,
    %c2_185 = arith.constant 2 : index
    %c0_186 = arith.constant 0 : index
    %c0_187 = arith.constant 0 : index
    %777 = vector.load %arg27[%c2_185, %c0_186, %c0_187] : memref<3x2x32xf32, #tpu.memory_space<vmem>>, vector<1x2x32xf32>
    %778 = vector.shape_cast %777 : vector<1x2x32xf32> to vector<2x32xf32>
    %779 = vector.shape_cast %673 : vector<2x32xf32> to vector<1x2x32xf32>
    tpu.vector_store %arg27[%c2_185, %c0_186, %c0_187], %779 {strides = array<i32>} : memref<3x2x32xf32, #tpu.memory_space<vmem>>, vector<1x2x32xf32>,
    %c2_188 = arith.constant 2 : index
    %c0_189 = arith.constant 0 : index
    %c0_190 = arith.constant 0 : index
    %780 = vector.load %arg28[%c2_188, %c0_189, %c0_190] : memref<3x2x32xf32, #tpu.memory_space<vmem>>, vector<1x2x32xf32>
    %781 = vector.shape_cast %780 : vector<1x2x32xf32> to vector<2x32xf32>
    %782 = vector.shape_cast %671 : vector<2x32xf32> to vector<1x2x32xf32>
    tpu.vector_store %arg28[%c2_188, %c0_189, %c0_190], %782 {strides = array<i32>} : memref<3x2x32xf32, #tpu.memory_space<vmem>>, vector<1x2x32xf32>,
    %c0_191 = arith.constant 0 : index
    %c0_192 = arith.constant 0 : index
    %783 = vector.load %arg26[%c0_191, %c0_192] : memref<2x2xf32, #tpu.memory_space<vmem>>, vector<2x2xf32>
    %784 = tpu.concatenate %763, %764 in 1 : vector<2x1xf32>, vector<2x1xf32> -> vector<2x2xf32>
    %785 = arith.addf %783, %784 : vector<2x2xf32>
    %c0_193 = arith.constant 0 : index
    %c0_194 = arith.constant 0 : index
    %786 = vector.load %arg26[%c0_193, %c0_194] : memref<2x2xf32, #tpu.memory_space<vmem>>, vector<2x2xf32>
    tpu.vector_store %arg26[%c0_193, %c0_194], %785 {strides = array<i32>} : memref<2x2xf32, #tpu.memory_space<vmem>>, vector<2x2xf32>,
    return
  }
  func.func @transform_0(%arg0: i32, %arg1: i32) -> (i32, i32, i32) {
    %c0_i32 = arith.constant 0 : i32
    %c0_i32_0 = arith.constant 0 : i32
    return %arg1, %arg0, %c0_i32 : i32, i32, i32
  }
  func.func @transform_1(%arg0: i32, %arg1: i32) -> (i32, i32) {
    %c0_i32 = arith.constant 0 : i32
    %c0_i32_0 = arith.constant 0 : i32
    %c0_i32_1 = arith.constant 0 : i32
    return %c0_i32, %c0_i32_0 : i32, i32
  }
  func.func @transform_2(%arg0: i32, %arg1: i32) -> (i32, i32) {
    %c0_i32 = arith.constant 0 : i32
    %c0_i32_0 = arith.constant 0 : i32
    %c0_i32_1 = arith.constant 0 : i32
    return %c0_i32, %c0_i32_0 : i32, i32
  }
  func.func @transform_3(%arg0: i32, %arg1: i32) -> (i32, i32) {
    %c0_i32 = arith.constant 0 : i32
    %c0_i32_0 = arith.constant 0 : i32
    %c0_i32_1 = arith.constant 0 : i32
    return %c0_i32, %c0_i32_0 : i32, i32
  }
  func.func @transform_4(%arg0: i32, %arg1: i32) -> (i32, i32) {
    %c0_i32 = arith.constant 0 : i32
    %c0_i32_0 = arith.constant 0 : i32
    %c0_i32_1 = arith.constant 0 : i32
    return %c0_i32, %c0_i32_0 : i32, i32
  }
  func.func @transform_5(%arg0: i32, %arg1: i32) -> (i32, i32) {
    %c0_i32 = arith.constant 0 : i32
    %c0_i32_0 = arith.constant 0 : i32
    %c0_i32_1 = arith.constant 0 : i32
    return %c0_i32, %c0_i32_0 : i32, i32
  }
  func.func @transform_6(%arg0: i32, %arg1: i32) -> (i32, i32) {
    %c0_i32 = arith.constant 0 : i32
    %c0_i32_0 = arith.constant 0 : i32
    %c0_i32_1 = arith.constant 0 : i32
    return %c0_i32, %c0_i32_0 : i32, i32
  }
  func.func @transform_7(%arg0: i32, %arg1: i32) -> (i32, i32, i32) {
    %c0_i32 = arith.constant 0 : i32
    %c0_i32_0 = arith.constant 0 : i32
    %c0_i32_1 = arith.constant 0 : i32
    %c0_i32_2 = arith.constant 0 : i32
    return %c0_i32, %c0_i32_0, %c0_i32_1 : i32, i32, i32
  }
  func.func @transform_8(%arg0: i32, %arg1: i32) -> (i32, i32) {
    %c0_i32 = arith.constant 0 : i32
    %c0_i32_0 = arith.constant 0 : i32
    %c0_i32_1 = arith.constant 0 : i32
    return %c0_i32, %c0_i32_0 : i32, i32
  }
  func.func @transform_9(%arg0: i32, %arg1: i32) -> (i32, i32) {
    %c0_i32 = arith.constant 0 : i32
    %c0_i32_0 = arith.constant 0 : i32
    %c0_i32_1 = arith.constant 0 : i32
    return %c0_i32, %c0_i32_0 : i32, i32
  }
  func.func @transform_10(%arg0: i32, %arg1: i32) -> (i32, i32) {
    %c0_i32 = arith.constant 0 : i32
    %c0_i32_0 = arith.constant 0 : i32
    %c0_i32_1 = arith.constant 0 : i32
    return %c0_i32, %c0_i32_0 : i32, i32
  }
  func.func @transform_11(%arg0: i32, %arg1: i32) -> (i32, i32) {
    %c0_i32 = arith.constant 0 : i32
    %c0_i32_0 = arith.constant 0 : i32
    %c0_i32_1 = arith.constant 0 : i32
    return %c0_i32, %c0_i32_0 : i32, i32
  }
  func.func @transform_12(%arg0: i32, %arg1: i32) -> (i32, i32) {
    %c0_i32 = arith.constant 0 : i32
    %c0_i32_0 = arith.constant 0 : i32
    %c0_i32_1 = arith.constant 0 : i32
    return %c0_i32, %c0_i32_0 : i32, i32
  }
  func.func @transform_13(%arg0: i32, %arg1: i32) -> (i32, i32) {
    %c0_i32 = arith.constant 0 : i32
    %c0_i32_0 = arith.constant 0 : i32
    %c0_i32_1 = arith.constant 0 : i32
    return %c0_i32, %c0_i32_0 : i32, i32
  }
  func.func @transform_14(%arg0: i32, %arg1: i32) -> (i32, i32, i32) {
    %c0_i32 = arith.constant 0 : i32
    %c0_i32_0 = arith.constant 0 : i32
    %c0_i32_1 = arith.constant 0 : i32
    %c0_i32_2 = arith.constant 0 : i32
    return %c0_i32, %c0_i32_0, %c0_i32_1 : i32, i32, i32
  }
  func.func @transform_15(%arg0: i32, %arg1: i32) -> (i32, i32, i32) {
    %c0_i32 = arith.constant 0 : i32
    %c0_i32_0 = arith.constant 0 : i32
    %c0_i32_1 = arith.constant 0 : i32
    %c0_i32_2 = arith.constant 0 : i32
    return %c0_i32, %c0_i32_0, %c0_i32_1 : i32, i32, i32
  }
  func.func @transform_16(%arg0: i32, %arg1: i32) -> (i32, i32, i32) {
    %c0_i32 = arith.constant 0 : i32
    %c0_i32_0 = arith.constant 0 : i32
    %c0_i32_1 = arith.constant 0 : i32
    %c0_i32_2 = arith.constant 0 : i32
    return %c0_i32, %c0_i32_0, %c0_i32_1 : i32, i32, i32
  }
  func.func @transform_17(%arg0: i32, %arg1: i32) -> (i32, i32) {
    %c0_i32 = arith.constant 0 : i32
    %c0_i32_0 = arith.constant 0 : i32
    %c0_i32_1 = arith.constant 0 : i32
    return %c0_i32, %c0_i32_0 : i32, i32
  }
  func.func @transform_18(%arg0: i32, %arg1: i32) -> (i32, i32) {
    %c0_i32 = arith.constant 0 : i32
    %c0_i32_0 = arith.constant 0 : i32
    %c0_i32_1 = arith.constant 0 : i32
    return %c0_i32, %c0_i32_0 : i32, i32
  }
  func.func @transform_19(%arg0: i32, %arg1: i32) -> (i32, i32) {
    %c0_i32 = arith.constant 0 : i32
    %c0_i32_0 = arith.constant 0 : i32
    %c0_i32_1 = arith.constant 0 : i32
    return %c0_i32, %c0_i32_0 : i32, i32
  }
  func.func @transform_20(%arg0: i32, %arg1: i32) -> (i32, i32) {
    %c0_i32 = arith.constant 0 : i32
    %c0_i32_0 = arith.constant 0 : i32
    %c0_i32_1 = arith.constant 0 : i32
    return %c0_i32, %c0_i32_0 : i32, i32
  }
  func.func @transform_21(%arg0: i32, %arg1: i32) -> (i32, i32) {
    %c0_i32 = arith.constant 0 : i32
    %c0_i32_0 = arith.constant 0 : i32
    %c0_i32_1 = arith.constant 0 : i32
    return %c0_i32, %c0_i32_0 : i32, i32
  }
  func.func @transform_22(%arg0: i32, %arg1: i32) -> (i32, i32) {
    %c0_i32 = arith.constant 0 : i32
    %c0_i32_0 = arith.constant 0 : i32
    %c0_i32_1 = arith.constant 0 : i32
    return %c0_i32, %c0_i32_0 : i32, i32
  }
  func.func @transform_23(%arg0: i32, %arg1: i32) -> (i32, i32, i32) {
    %c0_i32 = arith.constant 0 : i32
    %c0_i32_0 = arith.constant 0 : i32
    return %arg1, %arg0, %c0_i32 : i32, i32, i32
  }
  func.func @transform_24(%arg0: i32, %arg1: i32) -> (i32, i32) {
    %c0_i32 = arith.constant 0 : i32
    %c0_i32_0 = arith.constant 0 : i32
    return %arg0, %c0_i32 : i32, i32
  }
}

</mosaic_0001>

<bundles_post_ra>
// kernel: cflow_forward.1
= control target key start
LH: loop header
LB: loop body
LE: loop exit
PB: predicated region body
PF: predicated region fallthrough
CT: control target
= control target key end

     0   :  { %vm80_vm0 = vcmask 254976   ;;  %v4348_v2 = vmov 0.0   ;;  %v3051_v3 = vmov 0   ;;  %vm181_vm1 = vcmask 261120   ;;  %s4308_s2 = inlined_call_operand.vmem [shape: f32[32,128], index: 2, kind: input, shape index: {}]   ;;  %s4309_s0 = inlined_call_operand.vmem [shape: f32[2,2,4], index: 0, kind: input, shape index: {}]   ;;  %s4310_s1 = inlined_call_operand.vmem [shape: f32[1,128], index: 1, kind: input, shape index: {}]   ;;  %s4311_s7 = inlined_call_operand.vmem [shape: f32[3,1,128], index: 7, kind: input, shape index: {}]   ;;  %s4312_s4 = inlined_call_operand.vmem [shape: f32[32,128], index: 4, kind: input, shape index: {}]   ;;  %s4313_s3 = inlined_call_operand.vmem [shape: f32[32,128], index: 3, kind: input, shape index: {}]   ;;  %s4314_s5 = inlined_call_operand.vmem [shape: f32[32,128], index: 5, kind: input, shape index: {}]   ;;  %s4315_s6 = inlined_call_operand.vmem [shape: f32[32,128], index: 6, kind: input, shape index: {}]   ;;  %s4316_s8 = inlined_call_operand.vmem [shape: f32[32,32], index: 8, kind: input, shape index: {}]   ;;  %s4317_s9 = inlined_call_operand.vmem [shape: f32[1,32], index: 9, kind: input, shape index: {}]   ;;  %s4318_s10 = inlined_call_operand.vmem [shape: f32[32,32], index: 10, kind: input, shape index: {}]   ;;  %s4319_s11 = inlined_call_operand.vmem [shape: f32[1,32], index: 11, kind: input, shape index: {}]   ;;  %s4320_s12 = inlined_call_operand.vmem [shape: f32[32,128], index: 12, kind: input, shape index: {}]   ;;  %s4321_s13 = inlined_call_operand.vmem [shape: f32[1,128], index: 13, kind: input, shape index: {}]   ;;  %s4322_s16 = inlined_call_operand.vmem [shape: f32[2,1,4], index: 16, kind: input, shape index: {}]   ;;  %s4323_s15 = inlined_call_operand.vmem [shape: f32[2,32,4], index: 15, kind: input, shape index: {}]   ;;  %s4324_s14 = inlined_call_operand.vmem [shape: f32[2,2,32], index: 14, kind: input, shape index: {}]   ;;  %s4325_s17 = inlined_call_operand.vmem [shape: f32[16,4], index: 17, kind: input, shape index: {}]   ;;  %s4326_s18 = inlined_call_operand.vmem [shape: f32[1,4], index: 18, kind: input, shape index: {}]   ;;  %s4327_s19 = inlined_call_operand.vmem [shape: f32[1,4], index: 19, kind: input, shape index: {}]   ;;  %s4328_s20 = inlined_call_operand.vmem [shape: f32[32,4], index: 20, kind: input, shape index: {}]   ;;  %s4329_s21 = inlined_call_operand.vmem [shape: f32[1,4], index: 21, kind: input, shape index: {}]   ;;  %s4330_s22 = inlined_call_operand.vmem [shape: f32[1,4], index: 22, kind: input, shape index: {}]   ;;  %s4331_s23 = inlined_call_operand.vmem [shape: f32[2,2,4], index: 23, kind: output, shape index: {0}]   ;;  %s4332_s24 = inlined_call_operand.vmem [shape: f32[2,2], index: 24, kind: output, shape index: {1}]  }
   0x1   :  { %4355 = sst [smem:[#allocation4_spill]] %s4308_s2  ;;  %81 = vst.msk [vmem:[#allocation2] sm:$0x3] %vm80_vm0, %v4348_v2  ;;  %2740 = vset.pattern.permute.xlu0 %v3051_v3  ;;  %v3054_v48 = vmov 1  }
   0x2   :  { %4356 = sst [smem:[#allocation5_spill]] %s4309_s0  ;;  %82 = vst.msk [vmem:[#allocation2 + $0x2] sm:$0x3] %vm80_vm0, %v4348_v2 }
   0x3   :  { %4357 = sst [smem:[#allocation6_spill]] %s4310_s1  ;;  %83 = vst.msk [vmem:[#allocation2 + $0x4] sm:$0x3] %vm80_vm0, %v4348_v2  ;;  %s4346_s1 = smov 64  }
   0x4   :  { %4358 = sst [smem:[#allocation7_spill]] %s4311_s7  ;;  %84 = vst.msk [vmem:[#allocation3] sm:$0x3] %vm80_vm0, %v4348_v2 }
   0x5   :  { %4359 = sst [smem:[#allocation8_spill]] %s4312_s4  ;;  %85 = vst.msk [vmem:[#allocation3 + $0x2] sm:$0x3] %vm80_vm0, %v4348_v2 }
   0x6   :  { %4360 = sst [smem:[#allocation9_spill]] %s4313_s3  ;;  %86 = vst.msk [vmem:[#allocation3 + $0x4] sm:$0x3] %vm80_vm0, %v4348_v2 }
   0x7   :  { %4361 = sst [smem:[#allocation10_spill]] %s4314_s5 }
   0x8   :  { %4362 = sst [smem:[#allocation11_spill]] %s4315_s6  ;;  %v164_v7 = vld [vmem:[#allocation2] sm:$0x3] }
   0x9   :  { %4363 = sst [smem:[#allocation12_spill]] %s4316_s8  ;;  %s4342_s8 = smov 32   ;;  %v167_v44 = vld [vmem:[#allocation2 + $0x2] sm:$0x3] }
   0xa   :  { %4364 = sst [smem:[#allocation13_spill]] %s4326_s18 }
   0xb   :  { %4365 = sst [smem:[#allocation14_spill]] %s4327_s19  ;;  %v165_v8 = vld [vmem:[#allocation3] sm:$0x3]  ;;  %s4379_s19 = smov 64  }
   0xc   :  { %4366 = sst [smem:[#allocation15_spill]] %s4330_s22  ;;  %228 = vrot.lane.b32.xlu1 %v165_v8, %s4342_s8  ;;  %v169_v61 = vld [vmem:[#allocation3 + $0x2] sm:$0x3]  ;;  %s3059_s22 = smov 126  }
   0xd   :  { %4367 = sst [smem:[#allocation16_spill]] %s4331_s23  ;;  %s4377_s23 = smov 32  }
   0xe   :  { %4368 = sst [smem:[#allocation17_spill]] %s4332_s24  ;;  %s3057_s24 = smov 2  }
   0xf   :  { %s4369_s27 = sld [smem:[#allocation4_spill]] }
  0x10   :  { %s4370_s2 = sld [smem:[#allocation5_spill]] }
  0x11   :  { %s4371_s3 = sld [smem:[#allocation6_spill]] }
  0x12   :  { %s4372_s5 = sld [smem:[#allocation7_spill]] }
  0x13   :  { %s4373_s6 = sld [smem:[#allocation8_spill]] }
  0x14   :  { %s4374_s0 = sld [smem:[#allocation9_spill]] }
  0x15   :  { %v3188_v0 = vld [vmem:[%s4369_s27 + $0x18] sm:$0xff]  ;;  %v3193_v1 = vld [vmem:[%s4369_s27 + $0x10] sm:$0xff]  ;;  %v3209_v5 = vld [vmem:[%s4369_s27 + $0x8] sm:$0xff]  ;;  %s4375_s4 = sld [smem:[#allocation10_spill]] }
  0x16   :  { %197 = vmatpush.msra.mxu0 %v3188_v0  ;;  %v3204_v4 = vld [vmem:[%s4370_s2] sm:$0x3]  ;;  %s4378_s28 = sld [smem:[#allocation12_spill]] }
  0x17   :  { %177 = vperm.xlu0 %2740, %v3204_v4   ;;  %v3220_v6 = vld [vmem:[%s4369_s27] sm:$0xff]  ;;  %s4391_s25 = sld [smem:[#allocation17_spill]] }
  0x18   :  { %198 = vmatpush.msra.mxu0 %v3193_v1  ;;  %v3233_v9 = vld [vmem:[%s4371_s3] ss:$0 sm:$0xff]  ;;  %v3321_v51 = vld [vmem:[%s4372_s5 + $0x1] ss:$0 sm:$0xff] }
  0x19   :  { %v3242_v12 = vld [vmem:[%s4372_s5] ss:$0 sm:$0xff]  ;;  %v3254_v37 = vld [vmem:[%s4373_s6 + $0x18] sm:$0xff]  ;;  %v3259_v38 = vld [vmem:[%s4373_s6 + $0x10] sm:$0xff] }
  0x1a   :  { %199 = vmatpush.msra.mxu0 %v3209_v5  ;;  %288 = vmatpush.msra.mxu2 %v3254_v37  ;;  %v3265_v39 = vld [vmem:[%s4374_s0 + $0x18] sm:$0xff]  ;;  %v3270_v40 = vld [vmem:[%s4373_s6 + $0x8] sm:$0xff]  ;;  %v3276_v41 = vld [vmem:[%s4374_s0 + $0x10] sm:$0xff] }
  0x1b   :  { %265 = vmatpush.msra.mxu1 %v3265_v39  ;;  %v3282_v42 = vld [vmem:[%s4374_s0 + $0x8] sm:$0xff]  ;;  %v3287_v43 = vld [vmem:[%s4373_s6] sm:$0xff] }
  0x1c   :  { %200 = vmatpush.msra.mxu0 %v3220_v6  ;;  %289 = vmatpush.msra.mxu2 %v3259_v38  ;;  %v3294_v45 = vld [vmem:[%s4374_s0] sm:$0xff] }
  0x1d   :  { %2650 = vmatmul.msk.f32.vlgmr.msra.gmra.mxu0 %vm181_vm1, %v164_v7  ;;  %266 = vmatpush.msra.mxu1 %v3276_v41 }
  0x1e   :  { %290 = vmatpush.msra.mxu2 %v3270_v40 }
  0x1f   :  { %267 = vmatpush.msra.mxu1 %v3282_v42  ;;  %2741 = vset.pattern.permute.xlu0 %v3054_v48 }
  0x20   :  { %291 = vmatpush.msra.mxu2 %v3287_v43 }
  0x21   :  { %2653 = vmatmul.msk.f32.vlgmr.msra.gmra.mxu2 %vm181_vm1, %v167_v44  ;;  %268 = vmatpush.msra.mxu1 %v3294_v45 }
  0x22   :  { %509 = vmatpush.msrb.mxu2 %v3265_v39 }
  0x23   :  { %445 = vmatpush.msrb.mxu1 %v3188_v0 }
  0x24   :  { %510 = vmatpush.msrb.mxu2 %v3276_v41 }
  0x25   :  { %446 = vmatpush.msrb.mxu1 %v3193_v1 }
  0x26   :  { %511 = vmatpush.msrb.mxu2 %v3282_v42 }
  0x27   :  { %447 = vmatpush.msrb.mxu1 %v3209_v5 }
  0x28   :  { %512 = vmatpush.msrb.mxu2 %v3294_v45 }
  0x29   :  { %448 = vmatpush.msrb.mxu1 %v3220_v6 }
  0x2a   :  { %680 = vmatpush.msra.mxu2 %v3188_v0 }
  0x2c   :  { %681 = vmatpush.msra.mxu2 %v3193_v1 }
  0x2e   :  { %682 = vmatpush.msra.mxu2 %v3209_v5 }
  0x30   :  { %683 = vmatpush.msra.mxu2 %v3220_v6 }
  0x7e   :  { %v229_v32 = vpop.permute.xlu1 %228 }
  0x89   :  { %v3235_v10 = vpop.permute.xlu0 %177 }
  0x8a   :  { %v180_v11 = vmul.f32 %v3233_v9, %v3235_v10 }
  0x9a   :  { %v202_v13 = vpop.f32.mrf.mxu0 }
  0x9b   :  { %v205_v14 = vadd.f32 %v202_v13, %v180_v11 }
  0x9d   :  { %v206_v15 = vadd.f32 %v3242_v12, %v205_v14 }
  0x9f   :  { %2764 = vtanh.f32 %v206_v15  ;;  %v2651_v17 = vmul.f32 -1.442695, %v206_v15 }
  0xa1   :  { %2766 = vpow2.f32 %v2651_v17 }
  0xa4   :  { %v293_v50 = vpop.f32.mrf.mxu2 }
  0xa5   :  { %v2765_v16 = vpop.eup %2764 }
  0xa6   :  { %233 = vrot.lane.b32.xlu0 %v2765_v16, %s4342_s8 }
  0xa7   :  { %v2767_v18 = vpop.eup %2766 }
  0xa8   :  { %v210_v19 = vadd.f32 1.0, %v2767_v18 }
  0xaa   :  { %2768 = vrcp.f32 %v210_v19  ;;  %v222_v25 = vand.u32 2147483648, %v210_v19  ;;  %vm216_vm3 = vweird.f32 %v210_v19  ;;  %v220_v26 = vand.u32 2147483647, %v210_v19 }
  0xac   :  { %v223_v28 = vor.u32 1.1754944e-38, %v222_v25  ;;  %vm221_vm5 = vcmp.eq.f32.partialorder %v220_v26, 8.507059e+37 }
  0xae   :  { %429 = vperm.xlu0 %2741, %v3204_v4  }
  0xb0   :  { %v2769_v20 = vpop.eup %2768 }
  0xb1   :  { %v212_v21 = vmul.f32 %v2769_v20, %v210_v19  ;;  %vm217_vm2 = vweird.f32 %v2769_v20 }
  0xb2   :  { %vm218_vm4 = vmor %vm216_vm3, %vm217_vm2 }
  0xb3   :  { %v213_v22 = vsub.f32 1.0, %v212_v21 }
  0xb5   :  { %v214_v23 = vmul.f32 %v2769_v20, %v213_v22 }
  0xb6   :  { %2744 = vset.pattern.permute.xlu0 %v3051_v3 }
  0xb7   :  { %v215_v24 = vadd.f32 %v2769_v20, %v214_v23 }
  0xb9   :  { %v219_v27 = vsel %vm218_vm4, %v2769_v20, %v215_v24 }
  0xba   :  { %v224_v29 = vsel %vm221_vm5, %v223_v28, %v219_v27 }
  0xbb   :  { %v231_v33 = vmul.f32 %v229_v32, %v224_v29 }
 0x118   :  { %v234_v30 = vpop.permute.xlu0 %233 }
 0x119   :  { %v236_v31 = vmul.f32 %v234_v30, %v224_v29 }
 0x11b   :  { %238 = vrot.lane.b32.xlu1 %v236_v31, %s4342_s8 }
 0x120   :  { %v3323_v54 = vpop.permute.xlu0 %429 }
 0x121   :  { %v432_v56 = vmul.f32 %v3233_v9, %v3323_v54 }
 0x18d   :  { %v239_v34 = vpop.permute.xlu1 %238 }
 0x18e   :  { %v3247_v35 = vadd.f32 %v239_v34, %v231_v33 }
 0x190   :  { %2770 = vtanh.f32 %v3247_v35 }
 0x196   :  { %v2771_v36 = vpop.eup %2770 }
 0x197   :  { %244 = vrot.lane.b32.xlu2 %v2771_v36, %s4342_s8 }
 0x1f1   :  { %v245_v46 = vpop.permute.xlu2 %244 }
 0x1f2   :  { %v247_v47 = vmul.f32 %v245_v46, %v224_v29 }
 0x1f4   :  { %249 = vrot.lane.b32.xlu2 %v247_v47, %s4346_s1 }
 0x24e   :  { %v250_v49 = vpop.permute.xlu2 %249 }
 0x24f   :  { %2652 = vmatmul.msk.f32.vlgmr.msra.gmra.mxu1 %vm181_vm1, %v250_v49 }
 0x257   :  { %2658 = vmatmul.msk.f32.vlgmr.msrb.gmra.mxu1 %vm181_vm1, %v250_v49 }
 0x2cc   :  { %v270_v52 = vpop.f32.mrf.mxu1 }
 0x2cd   :  { %v294_v53 = vadd.f32 %v293_v50, %v270_v52 }
 0x2cf   :  { %v296_v55 = vadd.f32 %v3321_v51, %v294_v53 }
 0x2d1   :  { %2772 = vtanh.f32 %v296_v55  ;;  %v2654_v8 = vmul.f32 -1.442695, %v296_v55 }
 0x2d4   :  { %v450_v57 = vpop.f32.mrf.mxu1 }
 0x2d5   :  { %v453_v58 = vadd.f32 %v450_v57, %v432_v56 }
 0x2d7   :  { %v2773_v59 = vpop.eup %2772  ;;  %v454_v60 = vadd.f32 %v3242_v12, %v453_v58 }
 0x2d8   :  { %323 = vrot.lane.b32.xlu1 %v2773_v59, %s4342_s8 }
 0x2d9   :  { %2774 = vtanh.f32 %v454_v60  ;;  %v2659_v63 = vmul.f32 -1.442695, %v454_v60 }
 0x2db   :  { %2776 = vpow2.f32 %v2659_v63  ;;  %v3353_v63 = vld [vmem:[%s4375_s4 + $0x10] sm:$0xff] }
 0x2df   :  { %v2775_v62 = vpop.eup %2774 }
 0x2e0   :  { %477 = vrot.lane.b32.xlu2 %v2775_v62, %s4342_s8  ;;  %318 = vrot.lane.b32.xlu1 %v169_v61, %s4342_s8 }
 0x2e1   :  { %v2777_v3 = vpop.eup %2776 }
 0x2e2   :  { %v458_v7 = vadd.f32 1.0, %v2777_v3 }
 0x2e4   :  { %2778 = vrcp.f32 %v458_v7  ;;  %v470_v20 = vand.u32 2147483648, %v458_v7  ;;  %vm464_vm7 = vweird.f32 %v458_v7  ;;  %v468_v21 = vand.u32 2147483647, %v458_v7 }
 0x2e5   :  { %2780 = vpow2.f32 %v2654_v8  ;;  %v3372_v8 = vld [vmem:[%s4375_s4] sm:$0xff] }
 0x2e6   :  { %v471_v24 = vor.u32 1.1754944e-38, %v470_v20  ;;  %vm469_vm9 = vcmp.eq.f32.partialorder %v468_v21, 8.507059e+37 }
 0x2ea   :  { %v2779_v11 = vpop.eup %2778 }
 0x2eb   :  { %v2781_v13 = vpop.eup %2780  ;;  %v460_v14 = vmul.f32 %v2779_v11, %v458_v7  ;;  %vm465_vm6 = vweird.f32 %v2779_v11  ;;  %v3364_v7 = vld [vmem:[%s4375_s4 + $0x8] sm:$0xff] }
 0x2ec   :  { %v300_v15 = vadd.f32 1.0, %v2781_v13  ;;  %vm466_vm8 = vmor %vm464_vm7, %vm465_vm6 }
 0x2ed   :  { %v461_v16 = vsub.f32 1.0, %v460_v14 }
 0x2ee   :  { %2782 = vrcp.f32 %v300_v15  ;;  %v312_v31 = vand.u32 2147483648, %v300_v15  ;;  %vm306_vm11 = vweird.f32 %v300_v15  ;;  %v310_v32 = vand.u32 2147483647, %v300_v15 }
 0x2ef   :  { %v462_v17 = vmul.f32 %v2779_v11, %v461_v16  ;;  %v4353_v16 = vmov 2  }
 0x2f0   :  { %v313_v34 = vor.u32 1.1754944e-38, %v312_v31  ;;  %vm311_vm13 = vcmp.eq.f32.partialorder %v310_v32, 8.507059e+37  ;;  %2742 = vset.pattern.permute.xlu2 %v4353_v16  ;;  %v173_v32 = vld [vmem:[#allocation3 + $0x4] sm:$0x3] }
 0x2f1   :  { %v463_v18 = vadd.f32 %v2779_v11, %v462_v17 }
 0x2f3   :  { %v467_v22 = vsel %vm466_vm8, %v2779_v11, %v463_v18 }
 0x2f4   :  { %v2783_v19 = vpop.eup %2782  ;;  %v472_v26 = vsel %vm469_vm9, %v471_v24, %v467_v22 }
 0x2f5   :  { %v302_v23 = vmul.f32 %v2783_v19, %v300_v15  ;;  %vm307_vm10 = vweird.f32 %v2783_v19  ;;  %v475_v53 = vmul.f32 %v472_v26, %v3247_v35  ;;  %v3348_v35 = vld [vmem:[%s4375_s4 + $0x18] sm:$0xff]  ;;  %v171_v15 = vld [vmem:[#allocation2 + $0x4] sm:$0x3] }
 0x2f6   :  { %vm308_vm12 = vmor %vm306_vm11, %vm307_vm10  ;;  %355 = vmatpush.msra.mxu3 %v3348_v35 }
 0x2f7   :  { %v303_v28 = vsub.f32 1.0, %v302_v23 }
 0x2f8   :  { %356 = vmatpush.msra.mxu3 %v3353_v63 }
 0x2f9   :  { %v304_v29 = vmul.f32 %v2783_v19, %v303_v28 }
 0x2fa   :  { %357 = vmatpush.msra.mxu3 %v3364_v7 }
 0x2fb   :  { %v305_v30 = vadd.f32 %v2783_v19, %v304_v29 }
 0x2fc   :  { %358 = vmatpush.msra.mxu3 %v3372_v8 }
 0x2fd   :  { %v309_v33 = vsel %vm308_vm12, %v2783_v19, %v305_v30 }
 0x2fe   :  { %v314_v44 = vsel %vm311_vm13, %v313_v34, %v309_v33  ;;  %529 = vmatpush.msrb.mxu3 %v3254_v37 }
 0x300   :  { %530 = vmatpush.msrb.mxu3 %v3259_v38 }
 0x302   :  { %531 = vmatpush.msrb.mxu3 %v3270_v40 }
 0x304   :  { %532 = vmatpush.msrb.mxu3 %v3287_v43 }
 0x33a   :  { %v478_v25 = vpop.permute.xlu2 %477 }
 0x33b   :  { %v480_v27 = vmul.f32 %v478_v25, %v472_v26 }
 0x33d   :  { %482 = vrot.lane.b32.xlu0 %v480_v27, %s4342_s8 }
 0x34a   :  { %v324_v36 = vpop.permute.xlu1 %323 }
 0x34b   :  { %v326_v46 = vmul.f32 %v324_v36, %v314_v44 }
 0x34d   :  { %328 = vrot.lane.b32.xlu2 %v326_v46, %s4342_s8 }
 0x352   :  { %v319_v47 = vpop.permute.xlu1 %318 }
 0x353   :  { %v321_v49 = vmul.f32 %v319_v47, %v314_v44 }
 0x3a7   :  { %v329_v50 = vpop.permute.xlu2 %328 }
 0x3a8   :  { %v3334_v52 = vadd.f32 %v329_v50, %v321_v49 }
 0x3aa   :  { %2784 = vtanh.f32 %v3334_v52 }
 0x3af   :  { %v483_v55 = vpop.permute.xlu0 %482 }
 0x3b0   :  { %v2785_v56 = vpop.eup %2784  ;;  %v3338_v57 = vadd.f32 %v483_v55, %v475_v53 }
 0x3b1   :  { %334 = vrot.lane.b32.xlu1 %v2785_v56, %s4342_s8 }
 0x3b2   :  { %2786 = vtanh.f32 %v3338_v57 }
 0x3b8   :  { %v2787_v58 = vpop.eup %2786 }
 0x3b9   :  { %488 = vrot.lane.b32.xlu2 %v2787_v58, %s4342_s8  ;;  %s4376_s8 = sld [smem:[#allocation11_spill]] }
 0x3bf   :  { %v3359_v3 = vld [vmem:[%s4376_s8 + $0x18] sm:$0xff]  ;;  %v3380_v11 = vld [vmem:[%s4376_s8 + $0x10] sm:$0xff]  ;;  %v3385_v13 = vld [vmem:[%s4376_s8 + $0x8] sm:$0xff] }
 0x3c0   :  { %378 = vmatpush.msrb.mxu0 %v3359_v3  ;;  %617 = vmatpush.msra.mxu1 %v3359_v3  ;;  %v3393_v14 = vld [vmem:[%s4376_s8] sm:$0xff] }
 0x3c1   :  { %664 = vperm.xlu2 %2742, %v3204_v4  }
 0x3c2   :  { %379 = vmatpush.msrb.mxu0 %v3380_v11  ;;  %618 = vmatpush.msra.mxu1 %v3380_v11 }
 0x3c4   :  { %380 = vmatpush.msrb.mxu0 %v3385_v13  ;;  %619 = vmatpush.msra.mxu1 %v3385_v13 }
 0x3c6   :  { %381 = vmatpush.msrb.mxu0 %v3393_v14  ;;  %620 = vmatpush.msra.mxu1 %v3393_v14 }
 0x3c7   :  { %2656 = vmatmul.msk.f32.vlgmr.msrb.gmra.mxu0 %vm181_vm1, %v171_v15 }
 0x3c8   :  { %592 = vmatpush.msra.mxu0 %v3348_v35  ;;  %827 = vmatpush.msrb.mxu1 %v3348_v35 }
 0x3ca   :  { %593 = vmatpush.msra.mxu0 %v3353_v63  ;;  %828 = vmatpush.msrb.mxu1 %v3353_v63 }
 0x3cc   :  { %594 = vmatpush.msra.mxu0 %v3364_v7  ;;  %829 = vmatpush.msrb.mxu1 %v3364_v7 }
 0x3ce   :  { %595 = vmatpush.msra.mxu0 %v3372_v8  ;;  %830 = vmatpush.msrb.mxu1 %v3372_v8 }
 0x3d0   :  { %764 = vmatpush.msrb.mxu0 %v3254_v37 }
 0x3d2   :  { %765 = vmatpush.msrb.mxu0 %v3259_v38 }
 0x3d4   :  { %766 = vmatpush.msrb.mxu0 %v3270_v40 }
 0x3d6   :  { %767 = vmatpush.msrb.mxu0 %v3287_v43 }
 0x413   :  { %v489_v59 = vpop.permute.xlu2 %488 }
 0x414   :  { %v491_v60 = vmul.f32 %v489_v59, %v472_v26 }
 0x416   :  { %493 = vrot.lane.b32.xlu1 %v491_v60, %s4346_s1 }
 0x41b   :  { %v665_v20 = vpop.permute.xlu2 %664 }
 0x41c   :  { %v667_v21 = vmul.f32 %v3233_v9, %v665_v20 }
 0x423   :  { %v335_v61 = vpop.permute.xlu1 %334 }
 0x424   :  { %v337_v62 = vmul.f32 %v335_v61, %v314_v44 }
 0x426   :  { %339 = vrot.lane.b32.xlu0 %v337_v62, %s4346_s1 }
 0x444   :  { %v383_v25 = vpop.f32.mrf.mxu0 }
 0x488   :  { %v494_v17 = vpop.permute.xlu1 %493 }
 0x489   :  { %2660 = vmatmul.msk.f32.vlgmr.msrb.gmra.mxu2 %vm181_vm1, %v494_v17 }
 0x48a   :  { %852 = vmatpush.msrb.mxu2 %v3359_v3 }
 0x48c   :  { %853 = vmatpush.msrb.mxu2 %v3380_v11 }
 0x48e   :  { %854 = vmatpush.msrb.mxu2 %v3385_v13 }
 0x490   :  { %855 = vmatpush.msrb.mxu2 %v3393_v14 }
 0x491   :  { %2666 = vmatmul.msk.f32.vlgmr.msra.gmra.mxu2 %vm181_vm1, %v494_v17 }
 0x492   :  { %1034 = vmatpush.msra.mxu2 %v3265_v39 }
 0x494   :  { %1035 = vmatpush.msra.mxu2 %v3276_v41 }
 0x496   :  { %1036 = vmatpush.msra.mxu2 %v3282_v42 }
 0x498   :  { %v340_v18 = vpop.permute.xlu0 %339  ;;  %1037 = vmatpush.msra.mxu2 %v3294_v45 }
 0x499   :  { %2655 = vmatmul.msk.f32.vlgmr.msra.gmra.mxu3 %vm181_vm1, %v340_v18 }
 0x49a   :  { %744 = vmatpush.msra.mxu3 %v3265_v39  ;;  %v3437_v39 = vld [vmem:[%s4372_s5 + $0x2] ss:$0 sm:$0xff] }
 0x49c   :  { %745 = vmatpush.msra.mxu3 %v3276_v41 }
 0x49e   :  { %746 = vmatpush.msra.mxu3 %v3282_v42 }
 0x4a0   :  { %747 = vmatpush.msra.mxu3 %v3294_v45 }
 0x4a1   :  { %2661 = vmatmul.msk.f32.vlgmr.msrb.gmra.mxu3 %vm181_vm1, %v340_v18 }
 0x50c   :  { %v514_v19 = vpop.f32.mrf.mxu2 }
 0x514   :  { %v685_v22 = vpop.f32.mrf.mxu2 }
 0x515   :  { %v688_v23 = vadd.f32 %v685_v22, %v667_v21 }
 0x517   :  { %v689_v24 = vadd.f32 %v3242_v12, %v688_v23 }
 0x519   :  { %2788 = vtanh.f32 %v689_v24  ;;  %v2667_v33 = vmul.f32 -1.442695, %v689_v24 }
 0x51c   :  { %v360_v41 = vpop.f32.mrf.mxu3 }
 0x51d   :  { %v384_v42 = vadd.f32 %v383_v25, %v360_v41 }
 0x51f   :  { %v2789_v45 = vpop.eup %2788  ;;  %v386_v26 = vadd.f32 %v3437_v39, %v384_v42 }
 0x520   :  { %712 = vrot.lane.b32.xlu2 %v2789_v45, %s4377_s23 }
 0x521   :  { %2790 = vtanh.f32 %v386_v26  ;;  %v2657_v49 = vmul.f32 -1.442695, %v386_v26 }
 0x524   :  { %v534_v27 = vpop.f32.mrf.mxu3 }
 0x525   :  { %v535_v28 = vadd.f32 %v534_v27, %v514_v19 }
 0x527   :  { %v2791_v29 = vpop.eup %2790  ;;  %v537_v30 = vadd.f32 %v3321_v51, %v535_v28 }
 0x528   :  { %413 = vrot.lane.b32.xlu1 %v2791_v29, %s4377_s23 }
 0x529   :  { %2792 = vtanh.f32 %v537_v30  ;;  %v2662_v56 = vmul.f32 -1.442695, %v537_v30 }
 0x52a   :  { %2794 = vpow2.f32 %v2667_v33 }
 0x52f   :  { %v2793_v31 = vpop.eup %2792 }
 0x530   :  { %560 = vrot.lane.b32.xlu0 %v2793_v31, %s4377_s23  ;;  %v2795_v34 = vpop.eup %2794 }
 0x531   :  { %v693_v36 = vadd.f32 1.0, %v2795_v34 }
 0x533   :  { %2796 = vrcp.f32 %v693_v36  ;;  %v705_v55 = vand.u32 2147483648, %v693_v36  ;;  %vm699_vm15 = vweird.f32 %v693_v36  ;;  %v703_v58 = vand.u32 2147483647, %v693_v36 }
 0x534   :  { %2798 = vpow2.f32 %v2657_v49 }
 0x535   :  { %v706_v61 = vor.u32 1.1754944e-38, %v705_v55  ;;  %2800 = vpow2.f32 %v2662_v56  ;;  %vm704_vm3 = vcmp.eq.f32.partialorder %v703_v58, 8.507059e+37 }
 0x538   :  { %408 = vrot.lane.b32.xlu0 %v173_v32, %s4377_s23 }
 0x539   :  { %v2797_v44 = vpop.eup %2796 }
 0x53a   :  { %v695_v46 = vmul.f32 %v2797_v44, %v693_v36  ;;  %vm700_vm14 = vweird.f32 %v2797_v44  ;;  %v2799_v59 = vpop.eup %2798 }
 0x53b   :  { %vm701_vm2 = vmor %vm699_vm15, %vm700_vm14  ;;  %v390_v62 = vadd.f32 1.0, %v2799_v59  ;;  %v2801_v19 = vpop.eup %2800 }
 0x53c   :  { %v696_v47 = vsub.f32 1.0, %v695_v46  ;;  %v541_v20 = vadd.f32 1.0, %v2801_v19 }
 0x53d   :  { %2802 = vrcp.f32 %v390_v62  ;;  %v402_v26 = vand.u32 2147483648, %v390_v62  ;;  %vm396_vm5 = vweird.f32 %v390_v62  ;;  %v400_v27 = vand.u32 2147483647, %v390_v62 }
 0x53e   :  { %v697_v50 = vmul.f32 %v2797_v44, %v696_v47  ;;  %2804 = vrcp.f32 %v541_v20  ;;  %v553_v36 = vand.u32 2147483648, %v541_v20  ;;  %vm547_vm9 = vweird.f32 %v541_v20 }
 0x53f   :  { %v403_v30 = vor.u32 1.1754944e-38, %v402_v26  ;;  %vm401_vm7 = vcmp.eq.f32.partialorder %v400_v27, 8.507059e+37 }
 0x540   :  { %v698_v53 = vadd.f32 %v2797_v44, %v697_v50  ;;  %v554_v47 = vor.u32 1.1754944e-38, %v553_v36 }
 0x542   :  { %v702_v60 = vsel %vm701_vm2, %v2797_v44, %v698_v53  ;;  %v551_v44 = vand.u32 2147483647, %v541_v20 }
 0x543   :  { %v3445_v17 = vsel %vm704_vm3, %v706_v61, %v702_v60  ;;  %v2803_v21 = vpop.eup %2802 }
 0x544   :  { %v392_v22 = vmul.f32 %v2803_v21, %v390_v62  ;;  %v2805_v24 = vpop.eup %2804  ;;  %vm397_vm4 = vweird.f32 %v2803_v21  ;;  %vm552_vm11 = vcmp.eq.f32.partialorder %v551_v44, 8.507059e+37  ;;  %v710_v56 = vmul.f32 %v3445_v17, %v3338_v57 }
 0x545   :  { %v543_v41 = vmul.f32 %v2805_v24, %v541_v20  ;;  %vm398_vm6 = vmor %vm396_vm5, %vm397_vm4  ;;  %vm548_vm8 = vweird.f32 %v2805_v24 }
 0x546   :  { %v393_v23 = vsub.f32 1.0, %v392_v22  ;;  %vm549_vm10 = vmor %vm547_vm9, %vm548_vm8 }
 0x547   :  { %v544_v45 = vsub.f32 1.0, %v543_v41 }
 0x548   :  { %v394_v25 = vmul.f32 %v2803_v21, %v393_v23 }
 0x549   :  { %v545_v29 = vmul.f32 %v2805_v24, %v544_v45 }
 0x54a   :  { %v395_v42 = vadd.f32 %v2803_v21, %v394_v25 }
 0x54b   :  { %v546_v34 = vadd.f32 %v2805_v24, %v545_v29 }
 0x54c   :  { %v399_v28 = vsel %vm398_vm6, %v2803_v21, %v395_v42 }
 0x54d   :  { %v404_v31 = vsel %vm401_vm7, %v403_v30, %v399_v28  ;;  %v550_v46 = vsel %vm549_vm10, %v2805_v24, %v546_v34 }
 0x54e   :  { %v555_v50 = vsel %vm552_vm11, %v554_v47, %v550_v46 }
 0x54f   :  { %v558_v19 = vmul.f32 %v555_v50, %v3334_v52 }
 0x57a   :  { %v713_v15 = vpop.permute.xlu2 %712 }
 0x57b   :  { %v715_v18 = vmul.f32 %v713_v15, %v3445_v17 }
 0x57d   :  { %717 = vrot.lane.b32.xlu0 %v715_v18, %s4377_s23 }
 0x59a   :  { %v414_v32 = vpop.permute.xlu1 %413 }
 0x59b   :  { %v416_v33 = vmul.f32 %v414_v32, %v404_v31 }
 0x59d   :  { %418 = vrot.lane.b32.xlu2 %v416_v33, %s4377_s23 }
 0x5a2   :  { %v561_v49 = vpop.permute.xlu0 %560 }
 0x5a3   :  { %v563_v53 = vmul.f32 %v561_v49, %v555_v50 }
 0x5a5   :  { %565 = vrot.lane.b32.xlu1 %v563_v53, %s4377_s23 }
 0x5aa   :  { %v409_v55 = vpop.permute.xlu0 %408 }
 0x5ab   :  { %v411_v60 = vmul.f32 %v409_v55, %v404_v31 }
 0x5ef   :  { %v718_v58 = vpop.permute.xlu0 %717 }
 0x5f0   :  { %v3453_v59 = vadd.f32 %v718_v58, %v710_v56 }
 0x5f2   :  { %2806 = vtanh.f32 %v3453_v59 }
 0x5f7   :  { %v419_v61 = vpop.permute.xlu2 %418 }
 0x5f8   :  { %v2807_v62 = vpop.eup %2806  ;;  %v3456_v15 = vadd.f32 %v419_v61, %v411_v60 }
 0x5f9   :  { %723 = vrot.lane.b32.xlu0 %v2807_v62, %s4377_s23 }
 0x5fa   :  { %2808 = vtanh.f32 %v3456_v15 }
 0x600   :  { %v2809_v18 = vpop.eup %2808 }
 0x601   :  { %424 = vrot.lane.b32.xlu2 %v2809_v18, %s4377_s23 }
 0x617   :  { %v566_v57 = vpop.permute.xlu1 %565 }
 0x618   :  { %v3462_v20 = vadd.f32 %v566_v57, %v558_v19 }
 0x61a   :  { %2810 = vtanh.f32 %v3462_v20 }
 0x620   :  { %v2811_v21 = vpop.eup %2810 }
 0x621   :  { %571 = vrot.lane.b32.xlu1 %v2811_v21, %s4377_s23 }
 0x65b   :  { %v425_v22 = vpop.permute.xlu2 %424 }
 0x65c   :  { %v427_v23 = vmul.f32 %v425_v22, %v404_v31 }
 0x65e   :  { %601 = vrot.lane.b32.xlu2 %v427_v23, %s4346_s1 }
 0x66b   :  { %v724_v24 = vpop.permute.xlu0 %723 }
 0x66c   :  { %v726_v25 = vmul.f32 %v724_v24, %v3445_v17 }
 0x66e   :  { %728 = vrot.lane.b32.xlu0 %v726_v25, %s4346_s1 }
 0x693   :  { %v572_v41 = vpop.permute.xlu1 %571 }
 0x694   :  { %v574_v42 = vmul.f32 %v572_v41, %v555_v50 }
 0x696   :  { %576 = vrot.lane.b32.xlu1 %v574_v42, %s4346_s1 }
 0x6b8   :  { %v602_v52 = vpop.permute.xlu2 %601 }
 0x6b9   :  { %2664 = vmatmul.msk.f32.vlgmr.msra.gmra.mxu1 %vm181_vm1, %v602_v52 }
 0x6ba   :  { %970 = vmatpush.msra.mxu1 %v3188_v0 }
 0x6bc   :  { %971 = vmatpush.msra.mxu1 %v3193_v1 }
 0x6be   :  { %972 = vmatpush.msra.mxu1 %v3209_v5 }
 0x6c0   :  { %973 = vmatpush.msra.mxu1 %v3220_v6 }
 0x6e0   :  { %v3475_v45 = vpop.permute.xlu0 %728 }
 0x6e1   :  { %2668 = vmatmul.msk.f32.vlgmr.msra.gmra.mxu3 %vm181_vm1, %v3475_v45 }
 0x708   :  { %v577_v17 = vpop.permute.xlu1 %576 }
 0x709   :  { %2663 = vmatmul.msk.f32.vlgmr.msra.gmra.mxu0 %vm181_vm1, %v577_v17 }
 0x711   :  { %2669 = vmatmul.msk.f32.vlgmr.msrb.gmra.mxu0 %vm181_vm1, %v577_v17 }
 0x736   :  { %v622_v26 = vpop.f32.mrf.mxu1 }
 0x764   :  { %v749_v1 = vpop.f32.mrf.mxu3 }
 0x786   :  { %v597_v27 = vpop.f32.mrf.mxu0 }
 0x787   :  { %v623_v28 = vadd.f32 %v622_v26, %v597_v27 }
 0x789   :  { %v625_v0 = vadd.f32 %v3437_v39, %v623_v28 }
 0x78b   :  { %2812 = vtanh.f32 %v625_v0  ;;  %v2665_v36 = vmul.f32 -1.442695, %v625_v0 }
 0x78e   :  { %v769_v5 = vpop.f32.mrf.mxu0 }
 0x78f   :  { %v770_v29 = vadd.f32 %v769_v5, %v749_v1 }
 0x791   :  { %v2813_v6 = vpop.eup %2812  ;;  %v772_v30 = vadd.f32 %v3321_v51, %v770_v29 }
 0x792   :  { %648 = vrot.lane.b32.xlu1 %v2813_v6, %s4377_s23 }
 0x793   :  { %2814 = vtanh.f32 %v772_v30  ;;  %v2670_v32 = vmul.f32 -1.442695, %v772_v30 }
 0x795   :  { %2816 = vpow2.f32 %v2670_v32 }
 0x799   :  { %v2815_v31 = vpop.eup %2814 }
 0x79a   :  { %795 = vrot.lane.b32.xlu2 %v2815_v31, %s4377_s23 }
 0x79b   :  { %v2817_v33 = vpop.eup %2816 }
 0x79c   :  { %v776_v34 = vadd.f32 1.0, %v2817_v33 }
 0x79e   :  { %2818 = vrcp.f32 %v776_v34  ;;  %v788_v58 = vand.u32 2147483648, %v776_v34  ;;  %vm782_vm13 = vweird.f32 %v776_v34  ;;  %v786_v60 = vand.u32 2147483647, %v776_v34 }
 0x79f   :  { %2820 = vpow2.f32 %v2665_v36 }
 0x7a0   :  { %v789_v18 = vor.u32 1.1754944e-38, %v788_v58  ;;  %vm787_vm15 = vcmp.eq.f32.partialorder %v786_v60, 8.507059e+37  ;;  %v4354_v58 = vmov 3  }
 0x7a1   :  { %2743 = vset.pattern.permute.xlu1 %v4354_v58  ;;  %2748 = vset.pattern.permute.xlu2 %v4354_v58 }
 0x7a4   :  { %v2819_v44 = vpop.eup %2818 }
 0x7a5   :  { %v2821_v46 = vpop.eup %2820  ;;  %v778_v47 = vmul.f32 %v2819_v44, %v776_v34  ;;  %vm783_vm12 = vweird.f32 %v2819_v44 }
 0x7a6   :  { %v629_v49 = vadd.f32 1.0, %v2821_v46  ;;  %vm784_vm14 = vmor %vm782_vm13, %vm783_vm12 }
 0x7a7   :  { %v779_v50 = vsub.f32 1.0, %v778_v47 }
 0x7a8   :  { %2822 = vrcp.f32 %v629_v49  ;;  %v641_v25 = vand.u32 2147483648, %v629_v49  ;;  %vm635_vm3 = vweird.f32 %v629_v49  ;;  %v639_v41 = vand.u32 2147483647, %v629_v49 }
 0x7a9   :  { %v780_v53 = vmul.f32 %v2819_v44, %v779_v50 }
 0x7aa   :  { %v642_v52 = vor.u32 1.1754944e-38, %v641_v25  ;;  %vm640_vm5 = vcmp.eq.f32.partialorder %v639_v41, 8.507059e+37 }
 0x7ab   :  { %v781_v55 = vadd.f32 %v2819_v44, %v780_v53 }
 0x7ad   :  { %v785_v61 = vsel %vm784_vm14, %v2819_v44, %v781_v55 }
 0x7ae   :  { %v2823_v56 = vpop.eup %2822  ;;  %v790_v57 = vsel %vm787_vm15, %v789_v18, %v785_v61 }
 0x7af   :  { %v631_v62 = vmul.f32 %v2823_v56, %v629_v49  ;;  %vm636_vm2 = vweird.f32 %v2823_v56  ;;  %v793_v28 = vmul.f32 %v790_v57, %v3462_v20 }
 0x7b0   :  { %vm637_vm4 = vmor %vm635_vm3, %vm636_vm2 }
 0x7b1   :  { %v632_v22 = vsub.f32 1.0, %v631_v62 }
 0x7b3   :  { %v633_v23 = vmul.f32 %v2823_v56, %v632_v22 }
 0x7b5   :  { %v634_v24 = vadd.f32 %v2823_v56, %v633_v23 }
 0x7b7   :  { %v638_v42 = vsel %vm637_vm4, %v2823_v56, %v634_v24 }
 0x7b8   :  { %v643_v26 = vsel %vm640_vm5, %v642_v52, %v638_v42 }
 0x7b9   :  { %v646_v29 = vmul.f32 %v643_v26, %v3456_v15 }
 0x7f4   :  { %v796_v19 = vpop.permute.xlu2 %795 }
 0x7f5   :  { %v798_v21 = vmul.f32 %v796_v19, %v790_v57 }
 0x7f7   :  { %800 = vrot.lane.b32.xlu1 %v798_v21, %s4377_s23 }
 0x804   :  { %v649_v17 = vpop.permute.xlu1 %648 }
 0x805   :  { %v651_v27 = vmul.f32 %v649_v17, %v643_v26 }
 0x807   :  { %653 = vrot.lane.b32.xlu0 %v651_v27, %s4377_s23 }
 0x869   :  { %v801_v0 = vpop.permute.xlu1 %800 }
 0x86a   :  { %v3488_v1 = vadd.f32 %v801_v0, %v793_v28 }
 0x86c   :  { %2824 = vtanh.f32 %v3488_v1 }
 0x872   :  { %v2825_v5 = vpop.eup %2824 }
 0x873   :  { %806 = vrot.lane.b32.xlu0 %v2825_v5, %s4377_s23 }
 0x879   :  { %v654_v6 = vpop.permute.xlu0 %653 }
 0x87a   :  { %v656_v30 = vadd.f32 %v654_v6, %v646_v29 }
 0x87c   :  { %2826 = vtanh.f32 %v656_v30 }
 0x882   :  { %v2827_v31 = vpop.eup %2826 }
 0x883   :  { %659 = vrot.lane.b32.xlu2 %v2827_v31, %s4377_s23  ;;  %v3540_v31 = vld [vmem:[%s4378_s28] sm:$0xff] }
 0x8dd   :  { %v660_v32 = vpop.permute.xlu2 %659 }
 0x8de   :  { %v662_v33 = vmul.f32 %v660_v32, %v643_v26 }
 0x8e0   :  { %836 = vrot.lane.b32.xlu1 %v662_v33, %s4346_s1 }
 0x8e5   :  { %v807_v20 = vpop.permute.xlu0 %806 }
 0x8e6   :  { %v809_v34 = vmul.f32 %v807_v20, %v790_v57 }
 0x8e8   :  { %811 = vrot.lane.b32.xlu2 %v809_v34, %s4346_s1 }
 0x942   :  { %v3496_v36 = vpop.permute.xlu2 %811 }
 0x943   :  { %2671 = vmatmul.msk.f32.vlgmr.msrb.gmra.mxu1 %vm181_vm1, %v3496_v36 }
 0x944   :  { %1137 = vmatpush.msrb.mxu1 %v3359_v3 }
 0x946   :  { %1138 = vmatpush.msrb.mxu1 %v3380_v11 }
 0x948   :  { %1139 = vmatpush.msrb.mxu1 %v3385_v13 }
 0x94a   :  { %1140 = vmatpush.msrb.mxu1 %v3393_v14 }
 0x94b   :  { %2676 = vmatmul.msk.f32.vlgmr.msra.gmra.mxu1 %vm181_vm1, %v3475_v45 }
 0x952   :  { %v837_v15 = vpop.permute.xlu1 %836 }
 0x953   :  { %2672 = vmatmul.msk.f32.vlgmr.msrb.gmra.mxu2 %vm181_vm1, %v837_v15 }
 0x9c0   :  { %v832_v44 = vpop.f32.mrf.mxu1 }
 0x9c8   :  { %v975_v27 = vpop.f32.mrf.mxu1 }
 0x9d6   :  { %v857_v46 = vpop.f32.mrf.mxu2 }
 0x9d7   :  { %v858_v47 = vadd.f32 %v857_v46, %v832_v44 }
 0x9d9   :  { %v860_v49 = vadd.f32 %v3437_v39, %v858_v47 }
 0x9db   :  { %2828 = vtanh.f32 %v860_v49  ;;  %v2673_v53 = vmul.f32 -1.442695, %v860_v49 }
 0x9dd   :  { %2830 = vpow2.f32 %v2673_v53 }
 0x9e1   :  { %v2829_v50 = vpop.eup %2828 }
 0x9e2   :  { %883 = vrot.lane.b32.xlu0 %v2829_v50, %s4377_s23 }
 0x9e3   :  { %v2831_v55 = vpop.eup %2830 }
 0x9e4   :  { %v864_v56 = vadd.f32 1.0, %v2831_v55 }
 0x9e6   :  { %2832 = vrcp.f32 %v864_v56  ;;  %v876_v39 = vand.u32 2147483648, %v864_v56  ;;  %vm870_vm7 = vweird.f32 %v864_v56  ;;  %v874_v19 = vand.u32 2147483647, %v864_v56 }
 0x9e8   :  { %v877_v21 = vor.u32 1.1754944e-38, %v876_v39  ;;  %vm875_vm9 = vcmp.eq.f32.partialorder %v874_v19, 8.507059e+37 }
 0x9ec   :  { %v2833_v45 = vpop.eup %2832 }
 0x9ed   :  { %v866_v60 = vmul.f32 %v2833_v45, %v864_v56  ;;  %vm871_vm6 = vweird.f32 %v2833_v45 }
 0x9ee   :  { %vm872_vm8 = vmor %vm870_vm7, %vm871_vm6 }
 0x9ef   :  { %v867_v61 = vsub.f32 1.0, %v866_v60 }
 0x9f1   :  { %v868_v62 = vmul.f32 %v2833_v45, %v867_v61  ;;  %v135_v61 = vld [vmem:[%s4318_s10 + $0x18] sm:$0xff] }
 0x9f2   :  { %945 = vmatpush.msra.mxu0 %v135_v61 }
 0x9f3   :  { %v869_v18 = vadd.f32 %v2833_v45, %v868_v62  ;;  %v134_v62 = vld [vmem:[%s4318_s10 + $0x10] sm:$0xff] }
 0x9f4   :  { %946 = vmatpush.msra.mxu0 %v134_v62 }
 0x9f5   :  { %v873_v57 = vsel %vm872_vm8, %v2833_v45, %v869_v18  ;;  %v2755_v18 = vld [vmem:[%s4317_s9] ss:$0 sm:$0xff]  ;;  %vm1328_vm8 = vcmask 130048  }
 0x9f6   :  { %v878_v23 = vsel %vm875_vm9, %v877_v21, %v873_v57 }
 0x9f7   :  { %v881_v25 = vmul.f32 %v878_v23, %v656_v30  ;;  %v3523_v30 = vld [vmem:[%s4378_s28 + $0x18] sm:$0xff] }
 0x9f8   :  { %918 = vmatpush.msrb.mxu3 %v3523_v30 }
 0xa54   :  { %v884_v22 = vpop.permute.xlu0 %883 }
 0xa55   :  { %v886_v24 = vmul.f32 %v884_v22, %v878_v23 }
 0xa57   :  { %888 = vrot.lane.b32.xlu1 %v886_v24, %s4377_s23  ;;  %v139_v24 = vld [vmem:[%s4320_s12 + $0x10] sm:$0xff] }
 0xa5f   :  { %954 = vperm.xlu1 %2743, %v3204_v4  }
 0xac9   :  { %v889_v41 = vpop.permute.xlu1 %888 }
 0xaca   :  { %v3513_v42 = vadd.f32 %v889_v41, %v881_v25  ;;  %v138_v25 = vld [vmem:[%s4320_s12 + $0x8] sm:$0xff] }
 0xacc   :  { %2834 = vtanh.f32 %v3513_v42 }
 0xad1   :  { %v955_v52 = vpop.permute.xlu1 %954 }
 0xad2   :  { %v2835_v17 = vpop.eup %2834  ;;  %v957_v26 = vmul.f32 %v3233_v9, %v955_v52  ;;  %v3528_v9 = vld [vmem:[%s4378_s28 + $0x10] sm:$0xff]  ;;  %v137_v52 = vld [vmem:[%s4320_s12] sm:$0xff] }
 0xad3   :  { %894 = vrot.lane.b32.xlu2 %v2835_v17, %s4377_s23  ;;  %919 = vmatpush.msrb.mxu3 %v3528_v9  ;;  %v2756_v17 = vld [vmem:[%s4319_s11] ss:$0 sm:$0xff] }
 0xad4   :  { %v978_v28 = vadd.f32 %v975_v27, %v957_v26 }
 0xad6   :  { %v979_v0 = vadd.f32 %v3242_v12, %v978_v28  ;;  %v3534_v12 = vld [vmem:[%s4378_s28 + $0x8] sm:$0xff] }
 0xad7   :  { %920 = vmatpush.msrb.mxu3 %v3534_v12 }
 0xad8   :  { %2836 = vtanh.f32 %v979_v0  ;;  %v2677_v4 = vmul.f32 -1.442695, %v979_v0 }
 0xad9   :  { %921 = vmatpush.msrb.mxu3 %v3540_v31 }
 0xada   :  { %2838 = vpow2.f32 %v2677_v4 }
 0xadb   :  { %1054 = vmatpush.msra.mxu3 %v3254_v37 }
 0xadd   :  { %1055 = vmatpush.msra.mxu3 %v3259_v38 }
 0xade   :  { %v2837_v5 = vpop.eup %2836 }
 0xadf   :  { %1002 = vrot.lane.b32.xlu2 %v2837_v5, %s4377_s23  ;;  %1056 = vmatpush.msra.mxu3 %v3270_v40 }
 0xae0   :  { %v2839_v29 = vpop.eup %2838 }
 0xae1   :  { %v983_v6 = vadd.f32 1.0, %v2839_v29  ;;  %1057 = vmatpush.msra.mxu3 %v3287_v43 }
 0xae3   :  { %2840 = vrcp.f32 %v983_v6  ;;  %v995_v47 = vand.u32 2147483648, %v983_v6  ;;  %vm989_vm11 = vweird.f32 %v983_v6  ;;  %v993_v49 = vand.u32 2147483647, %v983_v6 }
 0xae5   :  { %v996_v50 = vor.u32 1.1754944e-38, %v995_v47  ;;  %vm994_vm13 = vcmp.eq.f32.partialorder %v993_v49, 8.507059e+37  ;;  %v3644_v47 = vld [vmem:[%s4324_s14] sm:$0x3] }
 0xae6   :  { %v4352_v49 = vperm.slane %v3644_v47, 0 }
 0xae9   :  { %v2841_v32 = vpop.eup %2840 }
 0xaea   :  { %v985_v33 = vmul.f32 %v2841_v32, %v983_v6  ;;  %vm990_vm10 = vweird.f32 %v2841_v32  ;;  %v147_v6 = vld [vmem:[%s4323_s15 + $0x18] sm:$0xff] }
 0xaeb   :  { %vm991_vm12 = vmor %vm989_vm11, %vm990_vm10 }
 0xaec   :  { %v986_v20 = vsub.f32 1.0, %v985_v33  ;;  %v145_v33 = vld [vmem:[%s4323_s15 + $0x8] sm:$0xff] }
 0xaee   :  { %v987_v44 = vmul.f32 %v2841_v32, %v986_v20  ;;  %v3614_v20 = vld [vmem:[%s4369_s27 + $0x18] sm:$0xff] }
 0xaf0   :  { %v988_v46 = vadd.f32 %v2841_v32, %v987_v44  ;;  %v3632_v44 = vld [vmem:[%s4369_s27] sm:$0xff] }
 0xaf2   :  { %v992_v37 = vsel %vm991_vm12, %v2841_v32, %v988_v46  ;;  %v146_v32 = vld [vmem:[%s4323_s15 + $0x10] sm:$0xff]  ;;  %v3638_v46 = vld [vmem:[%s4370_s2 + $0x2] sm:$0x3] }
 0xaf3   :  { %v997_v38 = vsel %vm994_vm13, %v996_v50, %v992_v37  ;;  %v2757_v37 = vld [vmem:[%s4321_s13] ss:$0 sm:$0xff]  ;;  %v4351_v50 = vperm.slane %v3644_v47, 1 }
 0xaf4   :  { %v1000_v55 = vmul.f32 %v997_v38, %v3453_v59  ;;  %v133_v59 = vld [vmem:[%s4318_s10 + $0x8] sm:$0xff] }
 0xaf5   :  { %947 = vmatpush.msra.mxu0 %v133_v59 }
 0xb2d   :  { %v895_v34 = vpop.permute.xlu2 %894 }
 0xb2e   :  { %v897_v15 = vmul.f32 %v895_v34, %v878_v23  ;;  %v140_v23 = vld [vmem:[%s4320_s12 + $0x18] sm:$0xff]  ;;  %v3620_v34 = vld [vmem:[%s4369_s27 + $0x10] sm:$0xff] }
 0xb2f   :  { %1201 = vmatpush.msrb.mxu2 %v140_v23 }
 0xb30   :  { %902 = vrot.lane.b32.xlu0 %v897_v15, %s4379_s19  ;;  %v3626_v15 = vld [vmem:[%s4369_s27 + $0x8] sm:$0xff] }
 0xb31   :  { %1202 = vmatpush.msrb.mxu2 %v139_v24 }
 0xb33   :  { %1203 = vmatpush.msrb.mxu2 %v138_v25 }
 0xb35   :  { %1204 = vmatpush.msrb.mxu2 %v137_v52 }
 0xb39   :  { %v1003_v53 = vpop.permute.xlu2 %1002 }
 0xb3a   :  { %v1005_v40 = vmul.f32 %v1003_v53, %v997_v38  ;;  %v1210_v53 = vmul.f32 %v4352_v49, %v3235_v10 }
 0xb3c   :  { %1007 = vrot.lane.b32.xlu0 %v1005_v40, %s4377_s23 }
 0xb44   :  { %1421 = vperm.xlu0 %2744, %v3638_v46  }
 0xb4c   :  { %2745 = vset.pattern.permute.xlu0 %v4353_v16 }
 0xba2   :  { %v903_v43 = vpop.permute.xlu0 %902 }
 0xba3   :  { %2674 = vmatmul.msk.f32.vlgmr.msrb.gmra.mxu3 %vm181_vm1, %v903_v43  ;;  %2682 = vmatmul.msk.f32.vlgmr.msrb.gmra.mxu1 %vm181_vm1, %v903_v43  ;;  %v1213_v43 = vmul.f32 %v4351_v50, %v3323_v54 }
 0xba4   :  { %1234 = vmatpush.msrb.mxu3 %v147_v6  ;;  %v3006_v6 = vld [vmem:[%s4370_s2] sm:$0x3] }
 0xba6   :  { %1235 = vmatpush.msrb.mxu3 %v146_v32 }
 0xba8   :  { %1236 = vmatpush.msrb.mxu3 %v145_v33 }
 0xbab   :  { %2679 = vmatmul.msk.f32.vlgmr.msra.gmra.mxu3 %vm181_vm1, %v3496_v36  ;;  %v132_v36 = vld [vmem:[%s4318_s10] sm:$0xff] }
 0xbac   :  { %948 = vmatpush.msra.mxu0 %v132_v36 }
 0xbae   :  { %v1008_v56 = vpop.permute.xlu0 %1007  ;;  %1117 = vmatpush.msrb.mxu0 %v3348_v35 }
 0xbaf   :  { %v3555_v45 = vadd.f32 %v1008_v56, %v1000_v55 }
 0xbb0   :  { %1118 = vmatpush.msrb.mxu0 %v3353_v63 }
 0xbb1   :  { %2842 = vtanh.f32 %v3555_v45 }
 0xbb2   :  { %1119 = vmatpush.msrb.mxu0 %v3364_v7 }
 0xbb4   :  { %1120 = vmatpush.msrb.mxu0 %v3372_v8 }
 0xbb6   :  { %v3674_v62 = vpop.permute.xlu0 %1421 }
 0xbb7   :  { %v2843_v60 = vpop.eup %2842 }
 0xbb8   :  { %1013 = vrot.lane.b32.xlu1 %v2843_v60, %s4377_s23 }
 0xc26   :  { %v923_v39 = vpop.f32.mrf.mxu3 }
 0xc27   :  { %v924_v19 = vadd.f32 %v2755_v18, %v923_v39 }
 0xc29   :  { %2844 = vtanh.f32 %v924_v19  ;;  %v3689_v19 = vld [vmem:[%s4372_s5] ss:$0 sm:$0xff] }
 0xc2a   :  { %v1014_v57 = vpop.permute.xlu1 %1013 }
 0xc2b   :  { %v1016_v21 = vmul.f32 %v1014_v57, %v997_v38 }
 0xc2d   :  { %1018 = vrot.lane.b32.xlu2 %v1016_v21, %s4379_s19 }
 0xc2e   :  { %v1059_v28 = vpop.f32.mrf.mxu3 }
 0xc2f   :  { %v2845_v22 = vpop.eup %2844 }
 0xc30   :  { %2675 = vmatmul.msk.f32.vlgmr.msra.gmra.mxu0 %vm181_vm1, %v2845_v22 }
 0xc87   :  { %v1019_v41 = vpop.permute.xlu2 %1018 }
 0xc88   :  { %2678 = vmatmul.msk.f32.vlgmr.msra.gmra.mxu2 %vm181_vm1, %v1019_v41 }
 0xcad   :  { %v950_v26 = vpop.f32.mrf.mxu0 }
 0xcae   :  { %v951_v27 = vadd.f32 %v2756_v17, %v950_v26 }
 0xcb0   :  { %2684 = vmatmul.msk.f32.vlgmr.msrb.gmra.mxu2 %vm181_vm1, %v951_v27 }
 0xd0b   :  { %v1039_v0 = vpop.f32.mrf.mxu2 }
 0xd0c   :  { %v1060_v5 = vadd.f32 %v1059_v28, %v1039_v0 }
 0xd0e   :  { %v1062_v4 = vadd.f32 %v3321_v51, %v1060_v5  ;;  %v144_v51 = vld [vmem:[%s4323_s15] sm:$0xff] }
 0xd0f   :  { %1237 = vmatpush.msrb.mxu3 %v144_v51 }
 0xd10   :  { %2846 = vtanh.f32 %v1062_v4  ;;  %v2680_v10 = vmul.f32 -1.442695, %v1062_v4 }
 0xd11   :  { %1437 = vmatpush.msra.mxu3 %v3614_v20 }
 0xd13   :  { %1438 = vmatpush.msra.mxu3 %v3620_v34 }
 0xd15   :  { %1439 = vmatpush.msra.mxu3 %v3626_v15 }
 0xd16   :  { %v2847_v29 = vpop.eup %2846 }
 0xd17   :  { %1085 = vrot.lane.b32.xlu1 %v2847_v29, %s4377_s23  ;;  %1440 = vmatpush.msra.mxu3 %v3632_v44 }
 0xd33   :  { %v1206_v38 = vpop.f32.mrf.mxu2 }
 0xd34   :  { %v3655_v40 = vadd.f32 %v2757_v37, %v1206_v38 }
 0xd36   :  { %v1211_v55 = vadd.f32 %v1210_v53, %v3655_v40 }
 0xd38   :  { %v1214_v56 = vadd.f32 %v1213_v43, %v1211_v55 }
 0xd3a   :  { %2848 = vtanh.f32 %v1214_v56 }
 0xd3b   :  { %2850 = vpow2.f32 %v2680_v10 }
 0xd40   :  { %v2849_v60 = vpop.eup %2848 }
 0xd41   :  { %2685 = vmatmul.msk.f32.vlgmr.msrb.gmra.mxu3 %vm181_vm1, %v2849_v60  ;;  %v2851_v54 = vpop.eup %2850 }
 0xd42   :  { %1609 = vmatpush.msrb.mxu3 %v3359_v3  ;;  %v1066_v3 = vadd.f32 1.0, %v2851_v54 }
 0xd44   :  { %1610 = vmatpush.msrb.mxu3 %v3380_v11  ;;  %2852 = vrcp.f32 %v1066_v3  ;;  %v2758_v11 = vld [vmem:[%s4322_s16] ss:$0 sm:$0xff]  ;;  %v1078_v24 = vand.u32 2147483648, %v1066_v3  ;;  %vm1072_vm15 = vweird.f32 %v1066_v3 }
 0xd46   :  { %1611 = vmatpush.msrb.mxu3 %v3385_v13  ;;  %v1079_v26 = vor.u32 1.1754944e-38, %v1078_v24 }
 0xd48   :  { %1612 = vmatpush.msrb.mxu3 %v3393_v14 }
 0xd49   :  { %2690 = vmatmul.msk.f32.vlgmr.msra.gmra.mxu3 %vm181_vm1, %v1019_v41  ;;  %v1076_v41 = vand.u32 2147483647, %v1066_v3 }
 0xd4a   :  { %1819 = vmatpush.msra.mxu3 %v3348_v35  ;;  %v2853_v61 = vpop.eup %2852 }
 0xd4b   :  { %v1068_v35 = vmul.f32 %v2853_v61, %v1066_v3  ;;  %vm1073_vm14 = vweird.f32 %v2853_v61  ;;  %vm1077_vm3 = vcmp.eq.f32.partialorder %v1076_v41, 8.507059e+37  ;;  %v3736_v41 = vld [vmem:[%s4325_s17 + $0x8] sm:$0xff] }
 0xd4c   :  { %1820 = vmatpush.msra.mxu3 %v3353_v63  ;;  %v3679_v63 = vld [vmem:[%s4371_s3] ss:$0 sm:$0xff]  ;;  %vm1074_vm2 = vmor %vm1072_vm15, %vm1073_vm14  ;;  %1345 = vmatpush.msra.mxu1 %v3736_v41 }
 0xd4d   :  { %v1069_v36 = vsub.f32 1.0, %v1068_v35  ;;  %v3712_v35 = vld [vmem:[%s4324_s14 + $0x2] sm:$0x3]  ;;  %s3058_s14 = smov 96  }
 0xd4e   :  { %1821 = vmatpush.msra.mxu3 %v3364_v7  ;;  %v1424_v7 = vmul.f32 %v3679_v63, %v3674_v62 }
 0xd4f   :  { %v1070_v21 = vmul.f32 %v2853_v61, %v1069_v36 }
 0xd50   :  { %1822 = vmatpush.msra.mxu3 %v3372_v8 }
 0xd51   :  { %v1071_v22 = vadd.f32 %v2853_v61, %v1070_v21 }
 0xd53   :  { %v1075_v52 = vsel %vm1074_vm2, %v2853_v61, %v1071_v22 }
 0xd54   :  { %v1080_v27 = vsel %vm1077_vm3, %v1079_v26, %v1075_v52  ;;  %v3741_v52 = vld [vmem:[%s4325_s17] sm:$0xff]  ;;  %v3749_v26 = vld [vmem:[%s4373_s6 + $0x18] sm:$0xff]  ;;  %s4386_s17 = sld [smem:[#allocation15_spill]] }
 0xd55   :  { %v1083_v54 = vmul.f32 %v1080_v27, %v3488_v1  ;;  %v4349_v1 = vperm.slane %v3712_v35, 1  ;;  %1346 = vmatpush.msra.mxu1 %v3741_v52 }
 0xd57   :  { %1521 = vmatpush.msrb.mxu1 %v3749_v26 }
 0xd89   :  { %v1086_v17 = vpop.permute.xlu1 %1085 }
 0xd8a   :  { %v1088_v28 = vmul.f32 %v1086_v17, %v1080_v27 }
 0xdc4   :  { %v1239_v13 = vpop.f32.mrf.mxu3 }
 0xdc5   :  { %v1240_v14 = vadd.f32 %v2758_v11, %v1239_v13 }
 0xdc7   :  { %2854 = vtanh.f32 %v1240_v14 }
 0xdcc   :  { %v1442_v8 = vpop.f32.mrf.mxu3 }
 0xdcd   :  { %v3683_v59 = vpop.eup %2854  ;;  %v1445_v18 = vadd.f32 %v1442_v8, %v1424_v7  ;;  %v4350_v7 = vperm.slane %v3712_v35, 0 }
 0xdce   :  { %v1243_v39 = vmul.f32 1.442695, %v3683_v59 }
 0xdcf   :  { %v1446_v57 = vadd.f32 %v3689_v19, %v1445_v18 }
 0xdd0   :  { %2856 = vpow2.f32 %v1243_v39 }
 0xdd1   :  { %2858 = vtanh.f32 %v1446_v57  ;;  %v2691_v0 = vmul.f32 -1.442695, %v1446_v57 }
 0xdd3   :  { %2860 = vpow2.f32 %v2691_v0  ;;  %v3767_v0 = vld [vmem:[%s4373_s6] sm:$0xff] }
 0xdd6   :  { %v2857_v23 = vpop.eup %2856 }
 0xdd7   :  { %v2859_v25 = vpop.eup %2858  ;;  %1246 = vrot.lane.b32.xlu2 %v2857_v23, %s3057_s24 }
 0xdd8   :  { %1469 = vrot.lane.b32.xlu1 %v2859_v25, %s4377_s23 }
 0xdd9   :  { %v2861_v5 = vpop.eup %2860 }
 0xdda   :  { %v1450_v4 = vadd.f32 1.0, %v2861_v5 }
 0xddc   :  { %2862 = vrcp.f32 %v1450_v4  ;;  %v1462_v55 = vand.u32 2147483648, %v1450_v4  ;;  %vm1456_vm5 = vweird.f32 %v1450_v4  ;;  %v1460_v56 = vand.u32 2147483647, %v1450_v4 }
 0xdde   :  { %v1463_v3 = vor.u32 1.1754944e-38, %v1462_v55  ;;  %vm1461_vm7 = vcmp.eq.f32.partialorder %v1460_v56, 8.507059e+37  ;;  %v3796_v55 = vld [vmem:[%s4374_s0] sm:$0xff]  ;;  %v151_v56 = vld [vmem:[%s4323_s15 + $0x38] sm:$0xff] }
 0xddf   :  { %1090 = vrot.lane.b32.xlu2 %v1088_v28, %s4377_s23  ;;  %v3761_v28 = vld [vmem:[%s4373_s6 + $0x8] sm:$0xff]  ;;  %1300 = vmatpush.msra.mxu0 %v151_v56 }
 0xde2   :  { %v2863_v33 = vpop.eup %2862 }
 0xde3   :  { %v1452_v37 = vmul.f32 %v2863_v33, %v1450_v4  ;;  %vm1457_vm4 = vweird.f32 %v2863_v33 }
 0xde4   :  { %vm1458_vm6 = vmor %vm1456_vm5, %vm1457_vm4 }
 0xde5   :  { %v1453_v38 = vsub.f32 1.0, %v1452_v37 }
 0xde7   :  { %v1454_v53 = vmul.f32 %v2863_v33, %v1453_v38 }
 0xde9   :  { %v1455_v43 = vadd.f32 %v2863_v33, %v1454_v53  ;;  %v3777_v53 = vld [vmem:[%s4374_s0 + $0x18] sm:$0xff] }
 0xdeb   :  { %v1459_v10 = vsel %vm1458_vm6, %v2863_v33, %v1455_v43  ;;  %v3790_v43 = vld [vmem:[%s4374_s0 + $0x8] sm:$0xff] }
 0xe31   :  { %v1247_v29 = vpop.permute.xlu2 %1246 }
 0xe32   :  { %v1249_v32 = vmul.f32 %v3006_v6, %v1247_v29 }
 0xe34   :  { %v3698_v51 = vadd.f32 %v1249_v32, %v1240_v14  ;;  %v1464_v14 = vsel %vm1461_vm7, %v1463_v3, %v1459_v10  ;;  %v149_v10 = vld [vmem:[%s4323_s15 + $0x28] sm:$0xff] }
 0xe35   :  { %v1467_v8 = vmul.f32 %v1464_v14, %v3555_v45 }
 0xe36   :  { %1258 = vperm.xlu0 %2745, %v3698_v51   ;;  %1269 = vperm.xlu1 %2743, %v3698_v51  }
 0xe39   :  { %v1091_v60 = vpop.permute.xlu2 %1090 }
 0xe3a   :  { %v3704_v11 = vadd.f32 %v1091_v60, %v1083_v54  ;;  %v150_v60 = vld [vmem:[%s4323_s15 + $0x30] sm:$0xff]  ;;  %v148_v54 = vld [vmem:[%s4323_s15 + $0x20] sm:$0xff] }
 0xe3b   :  { %1301 = vmatpush.msra.mxu0 %v150_v60 }
 0xe3c   :  { %2864 = vtanh.f32 %v3704_v11 }
 0xe3d   :  { %1302 = vmatpush.msra.mxu0 %v149_v10 }
 0xe3e   :  { %2746 = vset.pattern.permute.xlu0 %v3054_v48 }
 0xe3f   :  { %1303 = vmatpush.msra.mxu0 %v148_v54 }
 0xe42   :  { %v2865_v48 = vpop.eup %2864 }
 0xe4a   :  { %v1470_v13 = vpop.permute.xlu1 %1469 }
 0xe4b   :  { %v1472_v61 = vmul.f32 %v1470_v13, %v1464_v14 }
 0xe4d   :  { %1474 = vrot.lane.b32.xlu2 %v1472_v61, %s4377_s23  ;;  %v3836_v61 = vld [vmem:[%s4376_s8 + $0x10] sm:$0xff] }
 0xe55   :  { %1096 = vrot.lane.b32.xlu2 %v2865_v48, %s4377_s23  ;;  %v3842_v48 = vld [vmem:[%s4376_s8 + $0x8] sm:$0xff] }
 0xea7   :  { %v1475_v36 = vpop.permute.xlu2 %1474 }
 0xea8   :  { %v3717_v18 = vadd.f32 %v1475_v36, %v1467_v8  ;;  %v1270_v39 = vpop.permute.xlu1 %1269  ;;  %v1259_v57 = vpop.permute.xlu0 %1258  ;;  %v3848_v8 = vld [vmem:[%s4376_s8] sm:$0xff]  ;;  %v3855_v36 = vld [vmem:[%s4375_s4 + $0x18] sm:$0xff] }
 0xea9   :  { %v1273_v21 = vmul.f32 %v4349_v1, %v1270_v39  ;;  %v1262_v22 = vmul.f32 %v4350_v7, %v1259_v57  ;;  %v3861_v39 = vld [vmem:[%s4375_s4 + $0x10] sm:$0xff]  ;;  %v3867_v57 = vld [vmem:[%s4375_s4 + $0x8] sm:$0xff] }
 0xeaa   :  { %2866 = vtanh.f32 %v3717_v18 }
 0xeab   :  { %1275 = vrot.lane.b32.xlu0 %v1273_v21, %s4377_s23  ;;  %1264 = vrot.lane.b32.xlu1 %v1262_v22, %s4377_s23  ;;  %2868 = vtanh.f32 %v3655_v40  ;;  %v3873_v21 = vld [vmem:[%s4375_s4] sm:$0xff]  ;;  %v1142_v22 = vpop.f32.mrf.mxu1 }
 0xeaf   :  { %v1097_v23 = vpop.permute.xlu2 %1096 }
 0xeb0   :  { %v1099_v24 = vmul.f32 %v1097_v23, %v1080_v27  ;;  %v2867_v45 = vpop.eup %2866  ;;  %v3755_v27 = vld [vmem:[%s4373_s6 + $0x10] sm:$0xff]  ;;  %s4388_s6 = sld [smem:[#allocation14_spill]] }
 0xeb1   :  { %v3729_v25 = vpop.eup %2868  ;;  %1522 = vmatpush.msrb.mxu1 %v3755_v27 }
 0xeb2   :  { %1101 = vrot.lane.b32.xlu2 %v1099_v24, %s4379_s19 }
 0xeb3   :  { %1480 = vrot.lane.b32.xlu1 %v2867_v45, %s4377_s23  ;;  %1523 = vmatpush.msrb.mxu1 %v3761_v28 }
 0xeb5   :  { %1524 = vmatpush.msrb.mxu1 %v3767_v0 }
 0xebb   :  { %1326 = vrot.lane.b32.xlu1 %v3729_v25, %s4377_s23 }
 0xf0c   :  { %v1102_v17 = vpop.permute.xlu2 %1101 }
 0xf0d   :  { %2681 = vmatmul.msk.f32.vlgmr.msrb.gmra.mxu0 %vm181_vm1, %v1102_v17 }
 0xf0e   :  { %1501 = vmatpush.msrb.mxu0 %v3777_v53 }
 0xf1d   :  { %v1265_v5 = vpop.permute.xlu1 %1264  ;;  %v1276_v29 = vpop.permute.xlu0 %1275 }
 0xf1e   :  { %v1267_v4 = vadd.f32 %v1265_v5, %v3655_v40  ;;  %v3784_v40 = vld [vmem:[%s4374_s0 + $0x10] sm:$0xff]  ;;  %s4387_s0 = sld [smem:[#allocation13_spill]] }
 0xf1f   :  { %1502 = vmatpush.msrb.mxu0 %v3784_v40 }
 0xf20   :  { %v1278_v6 = vadd.f32 %v1276_v29, %v1267_v4 }
 0xf21   :  { %1503 = vmatpush.msrb.mxu0 %v3790_v43 }
 0xf22   :  { %2870 = vtanh.f32 %v1278_v6  ;;  %v3885_v6 = vld [vmem:[%s4372_s5 + $0x1] ss:$0 sm:$0xff] }
 0xf23   :  { %1504 = vmatpush.msrb.mxu0 %v3796_v55 }
 0xf25   :  { %v1481_v32 = vpop.permute.xlu1 %1480 }
 0xf26   :  { %v1483_v33 = vmul.f32 %v1481_v32, %v1464_v14  ;;  %v3830_v14 = vld [vmem:[%s4376_s8 + $0x18] sm:$0xff] }
 0xf28   :  { %v2871_v37 = vpop.eup %2870  ;;  %1485 = vrot.lane.b32.xlu2 %v1483_v33, %s4379_s19 }
 0xf29   :  { %1284 = vrot.lane.b32.xlu0 %v2871_v37, %s3058_s14 }
 0xf2d   :  { %v1327_v38 = vpop.permute.xlu1 %1326 }
 0xf2e   :  { %2687 = vmatmul.msk.f32.vlgmr.msra.gmra.mxu1 %vm1328_vm8, %v1327_v38  ;;  %v3893_v38 = vld [vmem:[%s4372_s5 + $0x2] ss:$0 sm:$0xff] }
 0xf2f   :  { %1736 = vmatpush.msra.mxu1 %v3777_v53 }
 0xf31   :  { %1656 = vperm.xlu0 %2746, %v3638_v46   ;;  %1737 = vmatpush.msra.mxu1 %v3784_v40 }
 0xf33   :  { %1738 = vmatpush.msra.mxu1 %v3790_v43 }
 0xf35   :  { %1739 = vmatpush.msra.mxu1 %v3796_v55 }
 0xf36   :  { %2693 = vmatmul.msk.f32.vlgmr.msrb.gmra.mxu1 %vm181_vm1, %v1102_v17 }
 0xf37   :  { %1907 = vmatpush.msrb.mxu1 %v3614_v20 }
 0xf39   :  { %1908 = vmatpush.msrb.mxu1 %v3620_v34  ;;  %2747 = vset.pattern.permute.xlu0 %v4353_v16 }
 0xf3b   :  { %1909 = vmatpush.msrb.mxu1 %v3626_v15 }
 0xf3d   :  { %1910 = vmatpush.msrb.mxu1 %v3632_v44 }
 0xf82   :  { %v1486_v13 = vpop.permute.xlu2 %1485 }
 0xf8a   :  { %v1122_v23 = vpop.f32.mrf.mxu0 }
 0xf8b   :  { %v1143_v33 = vadd.f32 %v1142_v22, %v1122_v23 }
 0xf8d   :  { %v1145_v56 = vadd.f32 %v3893_v38, %v1143_v33 }
 0xf9b   :  { %v1285_v3 = vpop.permute.xlu0 %1284 }
 0xf9c   :  { %2686 = vmatmul.msk.f32.vlgmr.msra.gmra.mxu0 %vm181_vm1, %v1285_v3 }
 0xf9d   :  { %1672 = vmatpush.msra.mxu0 %v3614_v20 }
 0xf9f   :  { %1673 = vmatpush.msra.mxu0 %v3620_v34 }
 0xfa1   :  { %1674 = vmatpush.msra.mxu0 %v3626_v15 }
 0xfa3   :  { %1675 = vmatpush.msra.mxu0 %v3632_v44  ;;  %v3880_v29 = vpop.permute.xlu0 %1656 }
 0xfa4   :  { %2692 = vmatmul.msk.f32.vlgmr.msrb.gmra.mxu0 %vm181_vm1, %v1486_v13  ;;  %v1659_v37 = vmul.f32 %v3679_v63, %v3880_v29 }
 0xfa5   :  { %1844 = vmatpush.msrb.mxu0 %v3830_v14 }
 0xfa7   :  { %1845 = vmatpush.msrb.mxu0 %v3836_v61 }
 0xfa9   :  { %1846 = vmatpush.msrb.mxu0 %v3842_v48 }
 0xfab   :  { %1847 = vmatpush.msrb.mxu0 %v3848_v8  ;;  %v3876_v24 = vpop.f32.mrf.mxu1 }
 0xfac   :  { %2698 = vmatmul.msk.f32.vlgmr.msra.gmra.mxu0 %vm181_vm1, %v1486_v13 }
 0xfad   :  { %2054 = vmatpush.msra.mxu0 %v3855_v36 }
 0xfaf   :  { %2055 = vmatpush.msra.mxu0 %v3861_v39 }
 0xfb1   :  { %2056 = vmatpush.msra.mxu0 %v3867_v57 }
 0xfb3   :  { %2057 = vmatpush.msra.mxu0 %v3873_v21  ;;  %v1526_v17 = vpop.f32.mrf.mxu1 }
0x1019   :  { %v3878_v45 = vpop.f32.mrf.mxu0 }
0x1021   :  { %v1506_v5 = vpop.f32.mrf.mxu0 }
0x1022   :  { %v1527_v4 = vadd.f32 %v1526_v17, %v1506_v5 }
0x1024   :  { %v1529_v32 = vadd.f32 %v3885_v6, %v1527_v4 }
0x1026   :  { %2872 = vtanh.f32 %v1529_v32  ;;  %v2694_v4 = vmul.f32 -1.442695, %v1529_v32 }
0x1027   :  { %2874 = vtanh.f32 %v1145_v56 }
0x1029   :  { %v1677_v60 = vpop.f32.mrf.mxu0 }
0x102a   :  { %v1680_v10 = vadd.f32 %v1677_v60, %v1659_v37  ;;  %v2683_v37 = vmul.f32 -1.442695, %v1145_v56 }
0x102c   :  { %v2873_v54 = vpop.eup %2872  ;;  %v1681_v3 = vadd.f32 %v3689_v19, %v1680_v10 }
0x102d   :  { %1552 = vrot.lane.b32.xlu1 %v2873_v54, %s4377_s23  ;;  %v2875_v13 = vpop.eup %2874 }
0x102e   :  { %2876 = vtanh.f32 %v1681_v3  ;;  %v2699_v23 = vmul.f32 -1.442695, %v1681_v3 }
0x1030   :  { %2878 = vpow2.f32 %v2699_v23 }
0x1034   :  { %v2877_v22 = vpop.eup %2876 }
0x1035   :  { %1168 = vrot.lane.b32.xlu1 %v2875_v13, %s4377_s23  ;;  %1704 = vrot.lane.b32.xlu2 %v2877_v22, %s4377_s23 }
0x1036   :  { %v2879_v17 = vpop.eup %2878 }
0x1037   :  { %v1685_v5 = vadd.f32 1.0, %v2879_v17 }
0x1039   :  { %2880 = vrcp.f32 %v1685_v5  ;;  %v1697_v22 = vand.u32 2147483648, %v1685_v5  ;;  %vm1691_vm10 = vweird.f32 %v1685_v5  ;;  %v1695_v23 = vand.u32 2147483647, %v1685_v5 }
0x103a   :  { %2882 = vpow2.f32 %v2694_v4 }
0x103b   :  { %2884 = vpow2.f32 %v2683_v37  ;;  %v1698_v56 = vor.u32 1.1754944e-38, %v1697_v22  ;;  %vm1696_vm12 = vcmp.eq.f32.partialorder %v1695_v23, 8.507059e+37 }
0x103f   :  { %v2881_v33 = vpop.eup %2880 }
0x1040   :  { %v2883_v60 = vpop.eup %2882  ;;  %v1687_v10 = vmul.f32 %v2881_v33, %v1685_v5  ;;  %vm1692_vm9 = vweird.f32 %v2881_v33 }
0x1041   :  { %v1533_v54 = vadd.f32 1.0, %v2883_v60  ;;  %v2885_v1 = vpop.eup %2884  ;;  %vm1693_vm11 = vmor %vm1691_vm10, %vm1692_vm9 }
0x1042   :  { %v1688_v2 = vsub.f32 1.0, %v1687_v10  ;;  %v1149_v13 = vadd.f32 1.0, %v2885_v1 }
0x1043   :  { %2886 = vrcp.f32 %v1533_v54  ;;  %v1545_v16 = vand.u32 2147483648, %v1533_v54  ;;  %vm1539_vm14 = vweird.f32 %v1533_v54 }
0x1044   :  { %v1689_v7 = vmul.f32 %v2881_v33, %v1688_v2  ;;  %2888 = vrcp.f32 %v1149_v13  ;;  %v1161_v58 = vand.u32 2147483648, %v1149_v13  ;;  %vm1155_vm4 = vweird.f32 %v1149_v13 }
0x1045   :  { %v1546_v23 = vor.u32 1.1754944e-38, %v1545_v16 }
0x1046   :  { %v1690_v50 = vadd.f32 %v2881_v33, %v1689_v7 }
0x1048   :  { %v1694_v32 = vsel %vm1693_vm11, %v2881_v33, %v1690_v50  ;;  %v1543_v50 = vand.u32 2147483647, %v1533_v54 }
0x1049   :  { %v2887_v3 = vpop.eup %2886  ;;  %v3900_v37 = vsel %vm1696_vm12, %v1698_v56, %v1694_v32 }
0x104a   :  { %v1535_v17 = vmul.f32 %v2887_v3, %v1533_v54  ;;  %v2889_v2 = vpop.eup %2888  ;;  %vm1540_vm13 = vweird.f32 %v2887_v3  ;;  %vm1544_vm2 = vcmp.eq.f32.partialorder %v1543_v50, 8.507059e+37  ;;  %v1702_v50 = vmul.f32 %v3900_v37, %v3717_v18 }
0x104b   :  { %v1151_v7 = vmul.f32 %v2889_v2, %v1149_v13  ;;  %vm1541_vm15 = vmor %vm1539_vm14, %vm1540_vm13  ;;  %vm1156_vm3 = vweird.f32 %v2889_v2 }
0x104c   :  { %v1536_v10 = vsub.f32 1.0, %v1535_v17  ;;  %vm1157_vm5 = vmor %vm1155_vm4, %vm1156_vm3 }
0x104d   :  { %v1152_v5 = vsub.f32 1.0, %v1151_v7 }
0x104e   :  { %v1537_v1 = vmul.f32 %v2887_v3, %v1536_v10 }
0x104f   :  { %v1153_v22 = vmul.f32 %v2889_v2, %v1152_v5 }
0x1050   :  { %v1538_v49 = vadd.f32 %v2887_v3, %v1537_v1  ;;  %v1162_v1 = vor.u32 1.1754944e-38, %v1161_v58 }
0x1051   :  { %v1154_v17 = vadd.f32 %v2889_v2, %v1153_v22 }
0x1052   :  { %v1542_v33 = vsel %vm1541_vm15, %v2887_v3, %v1538_v49 }
0x1053   :  { %v1547_v56 = vsel %vm1544_vm2, %v1546_v23, %v1542_v33  ;;  %v1158_v10 = vsel %vm1157_vm5, %v2889_v2, %v1154_v17 }
0x1054   :  { %v1550_v16 = vmul.f32 %v1547_v56, %v3704_v11 }
0x108f   :  { %v1705_v4 = vpop.permute.xlu2 %1704 }
0x1090   :  { %v1707_v60 = vmul.f32 %v1705_v4, %v3900_v37 }
0x1092   :  { %1709 = vrot.lane.b32.xlu0 %v1707_v60, %s4377_s23  ;;  %v1159_v60 = vand.u32 2147483647, %v1149_v13 }
0x1094   :  { %vm1160_vm6 = vcmp.eq.f32.partialorder %v1159_v60, 8.507059e+37 }
0x1095   :  { %v1163_v54 = vsel %vm1160_vm6, %v1162_v1, %v1158_v10  ;;  %v4380_v1 = vmov 3  }
0x1096   :  { %v1166_v11 = vmul.f32 %v1163_v54, %v3513_v42  ;;  %v3938_v42 = vld [vmem:[%s4328_s20 + $0x8] sm:$0xff] }
0x109f   :  { %v1553_v32 = vpop.permute.xlu1 %1552 }
0x10a0   :  { %v1555_v4 = vmul.f32 %v1553_v32, %v1547_v56  ;;  %v3927_v32 = vld [vmem:[%s4328_s20 + $0x18] sm:$0xff] }
0x10a1   :  { %1375 = vmatpush.msra.mxu2 %v3927_v32 }
0x10a2   :  { %1557 = vrot.lane.b32.xlu2 %v1555_v4, %s4377_s23  ;;  %v3944_v4 = vld [vmem:[%s4328_s20] sm:$0xff] }
0x10a7   :  { %v1169_v7 = vpop.permute.xlu1 %1168 }
0x10a8   :  { %v1171_v49 = vmul.f32 %v1169_v7, %v1163_v54 }
0x10aa   :  { %1173 = vrot.lane.b32.xlu1 %v1171_v49, %s4377_s23 }
0x10fc   :  { %v1558_v3 = vpop.permute.xlu2 %1557 }
0x10fd   :  { %v3907_v5 = vadd.f32 %v1558_v3, %v1550_v16 }
0x10ff   :  { %2890 = vtanh.f32 %v3907_v5 }
0x1104   :  { %v1710_v13 = vpop.permute.xlu0 %1709 }
0x1105   :  { %v2891_v33 = vpop.eup %2890  ;;  %v3912_v2 = vadd.f32 %v1710_v13, %v1702_v50 }
0x1106   :  { %1563 = vrot.lane.b32.xlu2 %v2891_v33, %s4377_s23 }
0x1107   :  { %2892 = vtanh.f32 %v3912_v2 }
0x110d   :  { %v2893_v58 = vpop.eup %2892 }
0x110e   :  { %1359 = vrot.lane.b32.xlu2 %v3729_v25, %s4379_s19  ;;  %1715 = vrot.lane.b32.xlu0 %v2893_v58, %s4377_s23  ;;  %v3933_v25 = vld [vmem:[%s4328_s20 + $0x10] sm:$0xff]  ;;  %s4389_s20 = sld [smem:[#allocation16_spill]] }
0x110f   :  { %1376 = vmatpush.msra.mxu2 %v3933_v25 }
0x1111   :  { %1377 = vmatpush.msra.mxu2 %v3938_v42 }
0x1113   :  { %1378 = vmatpush.msra.mxu2 %v3944_v4 }
0x1115   :  { %1584 = vmatpush.msrb.mxu2 %v3855_v36 }
0x1117   :  { %1585 = vmatpush.msrb.mxu2 %v3861_v39 }
0x1119   :  { %1586 = vmatpush.msrb.mxu2 %v3867_v57 }
0x111b   :  { %1587 = vmatpush.msrb.mxu2 %v3873_v21 }
0x111c   :  { %v1174_v22 = vpop.permute.xlu1 %1173 }
0x111d   :  { %v3920_v23 = vadd.f32 %v1174_v22, %v1166_v11 }
0x111f   :  { %2894 = vtanh.f32 %v3920_v23 }
0x1125   :  { %v2895_v18 = vpop.eup %2894 }
0x1126   :  { %1179 = vrot.lane.b32.xlu1 %v2895_v18, %s4377_s23 }
0x1160   :  { %v1564_v17 = vpop.permute.xlu2 %1563 }
0x1161   :  { %v1566_v60 = vmul.f32 %v1564_v17, %v1547_v56 }
0x1163   :  { %1568 = vrot.lane.b32.xlu0 %v1566_v60, %s4379_s19 }
0x1168   :  { %v1360_v10 = vpop.permute.xlu2 %1359 }
0x1169   :  { %2688 = vmatmul.msk.f32.vlgmr.msra.gmra.mxu2 %vm181_vm1, %v1360_v10 }
0x116a   :  { %1756 = vmatpush.msra.mxu2 %v3749_v26 }
0x116b   :  { %1891 = vperm.xlu0 %2747, %v3638_v46  }
0x116c   :  { %1757 = vmatpush.msra.mxu2 %v3755_v27 }
0x116e   :  { %1758 = vmatpush.msra.mxu2 %v3761_v28 }
0x1170   :  { %1759 = vmatpush.msra.mxu2 %v3767_v0 }
0x1173   :  { %2750 = vset.pattern.permute.xlu0 %v4380_v1 }
0x1180   :  { %v1716_v7 = vpop.permute.xlu0 %1715 }
0x1181   :  { %v1718_v56 = vmul.f32 %v1716_v7, %v3900_v37 }
0x1183   :  { %1720 = vrot.lane.b32.xlu1 %v1718_v56, %s4379_s19 }
0x1198   :  { %v1180_v49 = vpop.permute.xlu1 %1179 }
0x1199   :  { %v1182_v16 = vmul.f32 %v1180_v49, %v1163_v54 }
0x119b   :  { %1593 = vrot.lane.b32.xlu2 %v1182_v16, %s4379_s19 }
0x11d5   :  { %v1569_v3 = vpop.permute.xlu0 %1568 }
0x11d6   :  { %2695 = vmatmul.msk.f32.vlgmr.msrb.gmra.mxu2 %vm181_vm1, %v1569_v3 }
0x11d7   :  { %1971 = vmatpush.msrb.mxu2 %v3777_v53 }
0x11d9   :  { %1972 = vmatpush.msrb.mxu2 %v3784_v40 }
0x11db   :  { %1973 = vmatpush.msrb.mxu2 %v3790_v43 }
0x11dd   :  { %1974 = vmatpush.msrb.mxu2 %v3796_v55  ;;  %v1892_v50 = vpop.permute.xlu0 %1891 }
0x11de   :  { %2701 = vmatmul.msk.f32.vlgmr.msra.gmra.mxu2 %vm181_vm1, %v1569_v3  ;;  %v1894_v33 = vmul.f32 %v3679_v63, %v1892_v50 }
0x11df   :  { %2142 = vmatpush.msra.mxu2 %v3523_v30 }
0x11e1   :  { %2143 = vmatpush.msra.mxu2 %v3528_v9 }
0x11e3   :  { %2144 = vmatpush.msra.mxu2 %v3534_v12 }
0x11e5   :  { %2145 = vmatpush.msra.mxu2 %v3540_v31 }
0x11ec   :  { %v3988_v30 = vpop.f32.mrf.mxu2 }
0x11f5   :  { %v1594_v46 = vpop.permute.xlu2 %1593  ;;  %v1721_v37 = vpop.permute.xlu1 %1720 }
0x11f6   :  { %2696 = vmatmul.msk.f32.vlgmr.msrb.gmra.mxu3 %vm181_vm1, %v1594_v46  ;;  %2700 = vmatmul.msk.f32.vlgmr.msra.gmra.mxu1 %vm181_vm1, %v1721_v37 }
0x11f7   :  { %1991 = vmatpush.msrb.mxu3 %v3749_v26  ;;  %2079 = vmatpush.msra.mxu1 %v3830_v14 }
0x11f9   :  { %1992 = vmatpush.msrb.mxu3 %v3755_v27  ;;  %2080 = vmatpush.msra.mxu1 %v3836_v61 }
0x11fb   :  { %1993 = vmatpush.msrb.mxu3 %v3761_v28  ;;  %2081 = vmatpush.msra.mxu1 %v3842_v48 }
0x11fd   :  { %1994 = vmatpush.msrb.mxu3 %v3767_v0  ;;  %2082 = vmatpush.msra.mxu1 %v3848_v8 }
0x11fe   :  { %2706 = vmatmul.msk.f32.vlgmr.msrb.gmra.mxu1 %vm181_vm1, %v1721_v37 }
0x11ff   :  { %2255 = vmatpush.msrb.mxu1 %v3777_v53 }
0x1201   :  { %2256 = vmatpush.msrb.mxu1 %v3784_v40 }
0x1203   :  { %2257 = vmatpush.msrb.mxu1 %v3790_v43 }
0x1205   :  { %2258 = vmatpush.msrb.mxu1 %v3796_v55 }
0x1259   :  { %v1589_v9 = vpop.f32.mrf.mxu2 }
0x1261   :  { %v1761_v12 = vpop.f32.mrf.mxu2 }
0x1273   :  { %v1741_v31 = vpop.f32.mrf.mxu1 }
0x1274   :  { %v1762_v54 = vadd.f32 %v1761_v12, %v1741_v31 }
0x1276   :  { %v1764_v13 = vadd.f32 %v3885_v6, %v1762_v54 }
0x1278   :  { %2896 = vtanh.f32 %v1764_v13  ;;  %v2702_v1 = vmul.f32 -1.442695, %v1764_v13 }
0x1279   :  { %v1614_v58 = vpop.f32.mrf.mxu3 }
0x127a   :  { %v1615_v53 = vadd.f32 %v1614_v58, %v1589_v9 }
0x127b   :  { %v1912_v11 = vpop.f32.mrf.mxu1 }
0x127c   :  { %v1617_v40 = vadd.f32 %v3893_v38, %v1615_v53  ;;  %v1915_v43 = vadd.f32 %v1912_v11, %v1894_v33 }
0x127e   :  { %v2897_v22 = vpop.eup %2896  ;;  %v1916_v55 = vadd.f32 %v3689_v19, %v1915_v43  ;;  %2898 = vtanh.f32 %v1617_v40  ;;  %v2697_v56 = vmul.f32 -1.442695, %v1617_v40 }
0x127f   :  { %1787 = vrot.lane.b32.xlu1 %v2897_v22, %s4377_s23 }
0x1280   :  { %2900 = vtanh.f32 %v1916_v55  ;;  %v2707_v63 = vmul.f32 -1.442695, %v1916_v55 }
0x1282   :  { %2902 = vpow2.f32 %v2707_v63 }
0x1284   :  { %v2899_v18 = vpop.eup %2898 }
0x1286   :  { %v2901_v17 = vpop.eup %2900 }
0x1287   :  { %1640 = vrot.lane.b32.xlu1 %v2899_v18, %s4377_s23  ;;  %1939 = vrot.lane.b32.xlu2 %v2901_v17, %s4377_s23 }
0x1288   :  { %v2903_v60 = vpop.eup %2902 }
0x1289   :  { %v1920_v10 = vadd.f32 1.0, %v2903_v60 }
0x128b   :  { %2904 = vrcp.f32 %v1920_v10  ;;  %v1932_v54 = vand.u32 2147483648, %v1920_v10  ;;  %vm1926_vm9 = vweird.f32 %v1920_v10  ;;  %v1930_v50 = vand.u32 2147483647, %v1920_v10 }
0x128c   :  { %2906 = vpow2.f32 %v2702_v1 }
0x128d   :  { %2908 = vpow2.f32 %v2697_v56  ;;  %v1933_v58 = vor.u32 1.1754944e-38, %v1932_v54  ;;  %vm1931_vm11 = vcmp.eq.f32.partialorder %v1930_v50, 8.507059e+37 }
0x1291   :  { %v2905_v7 = vpop.eup %2904 }
0x1292   :  { %v2907_v19 = vpop.eup %2906  ;;  %v1922_v49 = vmul.f32 %v2905_v7, %v1920_v10  ;;  %vm1927_vm7 = vweird.f32 %v2905_v7 }
0x1293   :  { %v1768_v16 = vadd.f32 1.0, %v2907_v19  ;;  %v2909_v46 = vpop.eup %2908  ;;  %vm1928_vm10 = vmor %vm1926_vm9, %vm1927_vm7 }
0x1294   :  { %v1923_v3 = vsub.f32 1.0, %v1922_v49  ;;  %v1621_v9 = vadd.f32 1.0, %v2909_v46 }
0x1295   :  { %2910 = vrcp.f32 %v1768_v16  ;;  %v1780_v60 = vand.u32 2147483648, %v1768_v16  ;;  %vm1774_vm13 = vweird.f32 %v1768_v16  ;;  %v1778_v10 = vand.u32 2147483647, %v1768_v16 }
0x1296   :  { %v1924_v37 = vmul.f32 %v2905_v7, %v1923_v3  ;;  %2912 = vrcp.f32 %v1621_v9  ;;  %vm1627_vm3 = vweird.f32 %v1621_v9 }
0x1297   :  { %v1781_v56 = vor.u32 1.1754944e-38, %v1780_v60  ;;  %vm1779_vm15 = vcmp.eq.f32.partialorder %v1778_v10, 8.507059e+37 }
0x1298   :  { %v1925_v31 = vadd.f32 %v2905_v7, %v1924_v37  ;;  %v1633_v37 = vand.u32 2147483648, %v1621_v9 }
0x129a   :  { %v1929_v33 = vsel %vm1928_vm10, %v2905_v7, %v1925_v31  ;;  %v1631_v31 = vand.u32 2147483647, %v1621_v9  ;;  %v1634_v50 = vor.u32 1.1754944e-38, %v1633_v37 }
0x129b   :  { %v2911_v12 = vpop.eup %2910  ;;  %v1934_v11 = vsel %vm1931_vm11, %v1933_v58, %v1929_v33 }
0x129c   :  { %v1770_v13 = vmul.f32 %v2911_v12, %v1768_v16  ;;  %v2913_v43 = vpop.eup %2912  ;;  %vm1775_vm12 = vweird.f32 %v2911_v12  ;;  %vm1632_vm5 = vcmp.eq.f32.partialorder %v1631_v31, 8.507059e+37 }
0x129d   :  { %v1623_v18 = vmul.f32 %v2913_v43, %v1621_v9  ;;  %vm1776_vm14 = vmor %vm1774_vm13, %vm1775_vm12  ;;  %vm1628_vm2 = vweird.f32 %v2913_v43 }
0x129e   :  { %v1771_v40 = vsub.f32 1.0, %v1770_v13  ;;  %vm1629_vm4 = vmor %vm1627_vm3, %vm1628_vm2 }
0x129f   :  { %v1624_v63 = vsub.f32 1.0, %v1623_v18 }
0x12a0   :  { %v1772_v55 = vmul.f32 %v2911_v12, %v1771_v40  ;;  %v1937_v40 = vmul.f32 %v1934_v11, %v3912_v2 }
0x12a1   :  { %v1625_v7 = vmul.f32 %v2913_v43, %v1624_v63 }
0x12a2   :  { %v1773_v17 = vadd.f32 %v2911_v12, %v1772_v55 }
0x12a3   :  { %v1626_v46 = vadd.f32 %v2913_v43, %v1625_v7 }
0x12a4   :  { %v1777_v1 = vsel %vm1776_vm14, %v2911_v12, %v1773_v17 }
0x12a5   :  { %v1782_v49 = vsel %vm1779_vm15, %v1781_v56, %v1777_v1  ;;  %v1630_v54 = vsel %vm1629_vm4, %v2913_v43, %v1626_v46 }
0x12a6   :  { %v1635_v13 = vsel %vm1632_vm5, %v1634_v50, %v1630_v54  ;;  %v1785_v33 = vmul.f32 %v1782_v49, %v3907_v5 }
0x12a7   :  { %v1638_v5 = vmul.f32 %v1635_v13, %v3920_v23 }
0x12e1   :  { %v1940_v53 = vpop.permute.xlu2 %1939 }
0x12e2   :  { %v1942_v22 = vmul.f32 %v1940_v53, %v1934_v11 }
0x12e4   :  { %1944 = vrot.lane.b32.xlu0 %v1942_v22, %s4377_s23 }
0x12f1   :  { %v1788_v19 = vpop.permute.xlu1 %1787 }
0x12f2   :  { %v1790_v3 = vmul.f32 %v1788_v19, %v1782_v49  ;;  %v3025_v19 = vld [vmem:[%s4318_s10 + $0x18] sm:$0xff] }
0x12f4   :  { %1792 = vrot.lane.b32.xlu2 %v1790_v3, %s4377_s23  ;;  %v3028_v3 = vld [vmem:[%s4318_s10] sm:$0xff] }
0x12f9   :  { %v1641_v16 = vpop.permute.xlu1 %1640 }
0x12fa   :  { %v1643_v12 = vmul.f32 %v1641_v16, %v1635_v13 }
0x12fc   :  { %1645 = vrot.lane.b32.xlu1 %v1643_v12, %s4377_s23 }
0x134e   :  { %v1793_v58 = vpop.permute.xlu2 %1792 }
0x134f   :  { %v4001_v53 = vadd.f32 %v1793_v58, %v1785_v33 }
0x1351   :  { %2914 = vtanh.f32 %v4001_v53 }
0x1356   :  { %v1945_v9 = vpop.permute.xlu0 %1944 }
0x1357   :  { %v2915_v22 = vpop.eup %2914  ;;  %v4005_v55 = vadd.f32 %v1945_v9, %v1937_v40 }
0x1358   :  { %1798 = vrot.lane.b32.xlu2 %v2915_v22, %s4377_s23 }
0x1359   :  { %2916 = vtanh.f32 %v4005_v55 }
0x135f   :  { %v2917_v43 = vpop.eup %2916 }
0x1360   :  { %1950 = vrot.lane.b32.xlu0 %v2917_v43, %s4377_s23 }
0x136e   :  { %v1646_v18 = vpop.permute.xlu1 %1645 }
0x136f   :  { %v4011_v17 = vadd.f32 %v1646_v18, %v1638_v5 }
0x1371   :  { %2918 = vtanh.f32 %v4011_v17 }
0x1377   :  { %v2919_v63 = vpop.eup %2918 }
0x1378   :  { %1651 = vrot.lane.b32.xlu1 %v2919_v63, %s4377_s23 }
0x13b2   :  { %v1799_v2 = vpop.permute.xlu2 %1798 }
0x13b3   :  { %v1801_v60 = vmul.f32 %v1799_v2, %v1782_v49  ;;  %v3026_v49 = vld [vmem:[%s4318_s10 + $0x10] sm:$0xff] }
0x13b5   :  { %1803 = vrot.lane.b32.xlu2 %v1801_v60, %s4379_s19 }
0x13d2   :  { %v1951_v10 = vpop.permute.xlu0 %1950 }
0x13d3   :  { %v1953_v1 = vmul.f32 %v1951_v10, %v1934_v11  ;;  %v3027_v11 = vld [vmem:[%s4318_s10 + $0x8] sm:$0xff] }
0x13d5   :  { %1955 = vrot.lane.b32.xlu0 %v1953_v1, %s4379_s19 }
0x13ea   :  { %v1652_v7 = vpop.permute.xlu1 %1651 }
0x13eb   :  { %v1654_v56 = vmul.f32 %v1652_v7, %v1635_v13 }
0x13ed   :  { %1828 = vrot.lane.b32.xlu1 %v1654_v56, %s4379_s19 }
0x140f   :  { %v1804_v23 = vpop.permute.xlu2 %1803 }
0x1410   :  { %2703 = vmatmul.msk.f32.vlgmr.msra.gmra.mxu3 %vm181_vm1, %v1804_v23 }
0x1411   :  { %2166 = vmatpush.msra.mxu3 %v3025_v19 }
0x1413   :  { %2167 = vmatpush.msra.mxu3 %v3026_v49 }
0x1415   :  { %2168 = vmatpush.msra.mxu3 %v3027_v11 }
0x1417   :  { %2169 = vmatpush.msra.mxu3 %v3028_v3 }
0x1418   :  { %2709 = vmatmul.msk.f32.vlgmr.msrb.gmra.mxu3 %vm181_vm1, %v1804_v23 }
0x1419   :  { %2338 = vmatpush.msrb.mxu3 %v3855_v36 }
0x141b   :  { %2339 = vmatpush.msrb.mxu3 %v3861_v39 }
0x141d   :  { %2340 = vmatpush.msrb.mxu3 %v3867_v57 }
0x141f   :  { %2341 = vmatpush.msrb.mxu3 %v3873_v21 }
0x1447   :  { %v4036_v46 = vpop.permute.xlu0 %1955 }
0x1448   :  { %2708 = vmatmul.msk.f32.vlgmr.msrb.gmra.mxu2 %vm181_vm1, %v4036_v46 }
0x1449   :  { %2275 = vmatpush.msrb.mxu2 %v3749_v26 }
0x144b   :  { %2276 = vmatpush.msrb.mxu2 %v3755_v27 }
0x144d   :  { %2277 = vmatpush.msrb.mxu2 %v3761_v28 }
0x144f   :  { %2278 = vmatpush.msrb.mxu2 %v3767_v0 }
0x145f   :  { %v1829_v36 = vpop.permute.xlu1 %1828 }
0x1460   :  { %2704 = vmatmul.msk.f32.vlgmr.msrb.gmra.mxu0 %vm181_vm1, %v1829_v36 }
0x1461   :  { %2191 = vmatpush.msrb.mxu0 %v3614_v20 }
0x1463   :  { %2192 = vmatpush.msrb.mxu0 %v3620_v34 }
0x1465   :  { %2193 = vmatpush.msrb.mxu0 %v3626_v15 }
0x1467   :  { %2194 = vmatpush.msrb.mxu0 %v3632_v44 }
0x1493   :  { %v1824_v39 = vpop.f32.mrf.mxu3 }
0x149b   :  { %v1996_v57 = vpop.f32.mrf.mxu3 }
0x14cb   :  { %v1976_v26 = vpop.f32.mrf.mxu2 }
0x14cc   :  { %v1997_v21 = vadd.f32 %v1996_v57, %v1976_v26 }
0x14ce   :  { %v1999_v27 = vadd.f32 %v3885_v6, %v1997_v21 }
0x14d0   :  { %2920 = vtanh.f32 %v1999_v27  ;;  %v2710_v44 = vmul.f32 -1.442695, %v1999_v27 }
0x14d6   :  { %v2921_v28 = vpop.eup %2920 }
0x14d7   :  { %2022 = vrot.lane.b32.xlu0 %v2921_v28, %s4377_s23 }
0x14dd   :  { %v1849_v0 = vpop.f32.mrf.mxu0 }
0x14de   :  { %v1850_v37 = vadd.f32 %v1849_v0, %v1824_v39 }
0x14e0   :  { %v1852_v20 = vadd.f32 %v3893_v38, %v1850_v37 }
0x14e2   :  { %2922 = vtanh.f32 %v1852_v20  ;;  %v2705_v15 = vmul.f32 -1.442695, %v1852_v20 }
0x14e4   :  { %2924 = vpow2.f32 %v2705_v15 }
0x14e5   :  { %2926 = vpow2.f32 %v2710_v44 }
0x14e8   :  { %v2923_v34 = vpop.eup %2922 }
0x14e9   :  { %1875 = vrot.lane.b32.xlu2 %v2923_v34, %s4377_s23 }
0x14ea   :  { %v2925_v31 = vpop.eup %2924 }
0x14eb   :  { %v1856_v54 = vadd.f32 1.0, %v2925_v31  ;;  %v2927_v50 = vpop.eup %2926 }
0x14ec   :  { %v2003_v16 = vadd.f32 1.0, %v2927_v50 }
0x14ed   :  { %2928 = vrcp.f32 %v1856_v54  ;;  %v1868_v5 = vand.u32 2147483648, %v1856_v54  ;;  %vm1862_vm7 = vweird.f32 %v1856_v54  ;;  %v1866_v18 = vand.u32 2147483647, %v1856_v54 }
0x14ee   :  { %2930 = vrcp.f32 %v2003_v16  ;;  %v2015_v23 = vand.u32 2147483648, %v2003_v16  ;;  %vm2009_vm12 = vweird.f32 %v2003_v16  ;;  %v2013_v19 = vand.u32 2147483647, %v2003_v16 }
0x14ef   :  { %v1869_v60 = vor.u32 1.1754944e-38, %v1868_v5  ;;  %vm1867_vm10 = vcmp.eq.f32.partialorder %v1866_v18, 8.507059e+37 }
0x14f0   :  { %v2016_v11 = vor.u32 1.1754944e-38, %v2015_v23  ;;  %vm2014_vm14 = vcmp.eq.f32.partialorder %v2013_v19, 8.507059e+37 }
0x14f3   :  { %v2929_v13 = vpop.eup %2928 }
0x14f4   :  { %v1858_v12 = vmul.f32 %v2929_v13, %v1856_v54  ;;  %v2931_v33 = vpop.eup %2930  ;;  %vm1863_vm6 = vweird.f32 %v2929_v13 }
0x14f5   :  { %v2005_v40 = vmul.f32 %v2931_v33, %v2003_v16  ;;  %vm1864_vm9 = vmor %vm1862_vm7, %vm1863_vm6  ;;  %vm2010_vm11 = vweird.f32 %v2931_v33 }
0x14f6   :  { %v1859_v58 = vsub.f32 1.0, %v1858_v12  ;;  %vm2011_vm13 = vmor %vm2009_vm12, %vm2010_vm11 }
0x14f7   :  { %v2006_v9 = vsub.f32 1.0, %v2005_v40 }
0x14f8   :  { %v1860_v22 = vmul.f32 %v2929_v13, %v1859_v58 }
0x14f9   :  { %v2007_v63 = vmul.f32 %v2931_v33, %v2006_v9 }
0x14fa   :  { %v1861_v43 = vadd.f32 %v2929_v13, %v1860_v22 }
0x14fb   :  { %v2008_v7 = vadd.f32 %v2931_v33, %v2007_v63 }
0x14fc   :  { %v1865_v2 = vsel %vm1864_vm9, %v2929_v13, %v1861_v43 }
0x14fd   :  { %v1870_v1 = vsel %vm1867_vm10, %v1869_v60, %v1865_v2  ;;  %v2012_v49 = vsel %vm2011_vm13, %v2931_v33, %v2008_v7 }
0x14fe   :  { %v2017_v36 = vsel %vm2014_vm14, %v2016_v11, %v2012_v49  ;;  %v1873_v28 = vmul.f32 %v1870_v1, %v4011_v17  ;;  %v3034_v11 = vld [vmem:[%s4371_s3] ss:$0 sm:$0xff]  ;;  %vm87_vm14 = vcmask 9216  }
0x14ff   :  { %v2020_v57 = vmul.f32 %v2017_v36, %v4001_v53 }
0x1543   :  { %v1876_v10 = vpop.permute.xlu2 %1875 }
0x1544   :  { %v1878_v56 = vmul.f32 %v1876_v10, %v1870_v1  ;;  %v4095_v10 = vld [vmem:[%s4370_s2 + $0x2] sm:$0x3] }
0x1546   :  { %1880 = vrot.lane.b32.xlu1 %v1878_v56, %s4377_s23 }
0x1549   :  { %v2023_v3 = vpop.permute.xlu0 %2022 }
0x154a   :  { %v2025_v39 = vmul.f32 %v2023_v3, %v2017_v36 }
0x154c   :  { %2027 = vrot.lane.b32.xlu2 %v2025_v39, %s4377_s23 }
0x15a6   :  { %v2028_v26 = vpop.permute.xlu2 %2027 }
0x15a7   :  { %v4056_v21 = vadd.f32 %v2028_v26, %v2020_v57  ;;  %v3035_v57 = vld [vmem:[%s4372_s5] ss:$0 sm:$0xff] }
0x15a9   :  { %2932 = vtanh.f32 %v4056_v21 }
0x15af   :  { %v2933_v27 = vpop.eup %2932 }
0x15b0   :  { %2033 = vrot.lane.b32.xlu1 %v2933_v27, %s4377_s23 }
0x15b8   :  { %v1881_v0 = vpop.permute.xlu1 %1880 }
0x15b9   :  { %v1883_v37 = vadd.f32 %v1881_v0, %v1873_v28 }
0x15bb   :  { %2934 = vtanh.f32 %v1883_v37 }
0x15c1   :  { %v2935_v20 = vpop.eup %2934 }
0x15c2   :  { %1886 = vrot.lane.b32.xlu0 %v2935_v20, %s4377_s23 }
0x1622   :  { %v2034_v34 = vpop.permute.xlu1 %2033 }
0x1623   :  { %v2036_v15 = vmul.f32 %v2034_v34, %v2017_v36 }
0x1625   :  { %2038 = vrot.lane.b32.xlu2 %v2036_v15, %s4379_s19 }
0x1634   :  { %v1887_v53 = vpop.permute.xlu0 %1886 }
0x1635   :  { %v1889_v44 = vmul.f32 %v1887_v53, %v1870_v1  ;;  %v4381_v1 = vmov 2  }
0x1637   :  { %2063 = vrot.lane.b32.xlu0 %v1889_v44, %s4379_s19 }
0x167f   :  { %v4064_v31 = vpop.permute.xlu2 %2038 }
0x1680   :  { %2711 = vmatmul.msk.f32.vlgmr.msra.gmra.mxu0 %vm181_vm1, %v4064_v31 }
0x1681   :  { %2358 = vmatpush.msra.mxu0 %v3830_v14  ;;  %v3029_v14 = vld [vmem:[%s4320_s12 + $0x18] sm:$0xff] }
0x1683   :  { %2359 = vmatpush.msra.mxu0 %v3836_v61  ;;  %v3030_v61 = vld [vmem:[%s4320_s12 + $0x10] sm:$0xff] }
0x1685   :  { %2360 = vmatpush.msra.mxu0 %v3842_v48  ;;  %v3031_v48 = vld [vmem:[%s4320_s12 + $0x8] sm:$0xff] }
0x1687   :  { %2361 = vmatpush.msra.mxu0 %v3848_v8 }
0x1688   :  { %2716 = vmatmul.msk.f32.vlgmr.msrb.gmra.mxu0 %vm181_vm1, %v4036_v46 }
0x1689   :  { %2548 = vmatpush.msrb.mxu0 %v3736_v41  ;;  %v3032_v41 = vld [vmem:[%s4320_s12] sm:$0xff] }
0x168b   :  { %2549 = vmatpush.msrb.mxu0 %v3741_v52 }
0x16a9   :  { %v2064_v17 = vpop.permute.xlu0 %2063 }
0x16aa   :  { %2712 = vmatmul.msk.f32.vlgmr.msra.gmra.mxu1 %vm181_vm1, %v2064_v17 }
0x16ab   :  { %2419 = vmatpush.msra.mxu1 %v3029_v14 }
0x16ad   :  { %2420 = vmatpush.msra.mxu1 %v3030_v61 }
0x16af   :  { %2421 = vmatpush.msra.mxu1 %v3031_v48 }
0x16b1   :  { %2422 = vmatpush.msra.mxu1 %v3032_v41 }
0x16fd   :  { %v2059_v52 = vpop.f32.mrf.mxu0 }
0x1705   :  { %v2196_v36 = vpop.f32.mrf.mxu0 }
0x1727   :  { %v2084_v8 = vpop.f32.mrf.mxu1 }
0x1728   :  { %v2085_v46 = vadd.f32 %v2084_v8, %v2059_v52 }
0x172a   :  { %v2087_v54 = vadd.f32 %v3893_v38, %v2085_v46 }
0x172c   :  { %2936 = vtanh.f32 %v2087_v54  ;;  %v2713_v16 = vmul.f32 -1.442695, %v2087_v54 }
0x172e   :  { %2938 = vpow2.f32 %v2713_v16  ;;  %v3036_v16 = vld [vmem:[%s4323_s15 + $0x18] sm:$0xff] }
0x1732   :  { %v2937_v50 = vpop.eup %2936 }
0x1733   :  { %2110 = vrot.lane.b32.xlu1 %v2937_v50, %s4377_s23 }
0x1734   :  { %v2939_v13 = vpop.eup %2938 }
0x1735   :  { %v2091_v12 = vadd.f32 1.0, %v2939_v13  ;;  %v3037_v13 = vld [vmem:[%s4323_s15 + $0x10] sm:$0xff] }
0x1737   :  { %2940 = vrcp.f32 %v2091_v12  ;;  %v2103_v43 = vand.u32 2147483648, %v2091_v12  ;;  %vm2097_vm2 = vweird.f32 %v2091_v12  ;;  %v2101_v5 = vand.u32 2147483647, %v2091_v12 }
0x1739   :  { %v2104_v18 = vor.u32 1.1754944e-38, %v2103_v43  ;;  %vm2102_vm4 = vcmp.eq.f32.partialorder %v2101_v5, 8.507059e+37 }
0x173d   :  { %v2941_v33 = vpop.eup %2940 }
0x173e   :  { %v2093_v58 = vmul.f32 %v2941_v33, %v2091_v12  ;;  %vm2098_vm15 = vweird.f32 %v2941_v33  ;;  %v3038_v12 = vld [vmem:[%s4323_s15 + $0x8] sm:$0xff] }
0x173f   :  { %vm2099_vm3 = vmor %vm2097_vm2, %vm2098_vm15  ;;  %vm1389_vm2 = vcmask 15360  }
0x1740   :  { %v2094_v40 = vsub.f32 1.0, %v2093_v58 }
0x1742   :  { %v2095_v22 = vmul.f32 %v2941_v33, %v2094_v40 }
0x1744   :  { %v2096_v9 = vadd.f32 %v2941_v33, %v2095_v22 }
0x1746   :  { %v2100_v38 = vsel %vm2099_vm3, %v2941_v33, %v2096_v9  ;;  %v3039_v33 = vld [vmem:[%s4323_s15] sm:$0xff] }
0x1747   :  { %v2105_v2 = vsel %vm2102_vm4, %v2104_v18, %v2100_v38  ;;  %v3040_v18 = vld [vmem:[%s4317_s9] ss:$0 sm:$0xff] }
0x1748   :  { %v2108_v7 = vmul.f32 %v2105_v2, %v1883_v37 }
0x17a5   :  { %v2111_v63 = vpop.permute.xlu1 %2110 }
0x17a6   :  { %v2113_v60 = vmul.f32 %v2111_v63, %v2105_v2  ;;  %v3041_v63 = vld [vmem:[%s4323_s15 + $0x38] sm:$0xff] }
0x17a8   :  { %2115 = vrot.lane.b32.xlu2 %v2113_v60, %s4377_s23  ;;  %v3043_v60 = vld [vmem:[%s4323_s15 + $0x28] sm:$0xff] }
0x17b0   :  { %2175 = vperm.xlu2 %2748, %v4095_v10  }
0x17b8   :  { %2749 = vset.pattern.permute.xlu2 %v4381_v1  ;;  %v3044_v1 = vld [vmem:[%s4323_s15 + $0x20] sm:$0xff] }
0x1802   :  { %v2116_v56 = vpop.permute.xlu2 %2115 }
0x1803   :  { %v4099_v23 = vadd.f32 %v2116_v56, %v2108_v7 }
0x1805   :  { %2942 = vtanh.f32 %v4099_v23 }
0x180a   :  { %v2176_v19 = vpop.permute.xlu2 %2175 }
0x180b   :  { %v2943_v49 = vpop.eup %2942  ;;  %v2178_v3 = vmul.f32 %v3034_v11, %v2176_v19  ;;  %v3045_v19 = vld [vmem:[%s4319_s11] ss:$0 sm:$0xff] }
0x180c   :  { %2121 = vrot.lane.b32.xlu0 %v2943_v49, %s4377_s23 }
0x180d   :  { %v2199_v39 = vadd.f32 %v2196_v36, %v2178_v3 }
0x180f   :  { %v2200_v26 = vadd.f32 %v3035_v57, %v2199_v39  ;;  %v3046_v57 = vld [vmem:[%s4321_s13] ss:$0 sm:$0xff] }
0x1811   :  { %2944 = vtanh.f32 %v2200_v26  ;;  %v2717_v28 = vmul.f32 -1.442695, %v2200_v26 }
0x1813   :  { %2946 = vpow2.f32 %v2717_v28 }
0x1817   :  { %v2945_v27 = vpop.eup %2944 }
0x1818   :  { %2223 = vrot.lane.b32.xlu0 %v2945_v27, %s4377_s23  ;;  %v4383_v27 = vperm.slane %v3644_v47, 1 }
0x1819   :  { %v2947_v0 = vpop.eup %2946 }
0x181a   :  { %v2204_v37 = vadd.f32 1.0, %v2947_v0  ;;  %v2429_v28 = vmul.f32 %v3880_v29, %v4383_v27 }
0x181c   :  { %2948 = vrcp.f32 %v2204_v37  ;;  %v2216_v61 = vand.u32 2147483648, %v2204_v37  ;;  %vm2210_vm6 = vweird.f32 %v2204_v37  ;;  %v2214_v48 = vand.u32 2147483647, %v2204_v37 }
0x181e   :  { %v2217_v52 = vor.u32 1.1754944e-38, %v2216_v61  ;;  %vm2215_vm9 = vcmp.eq.f32.partialorder %v2214_v48, 8.507059e+37 }
0x1822   :  { %v2949_v20 = vpop.eup %2948 }
0x1823   :  { %v2206_v34 = vmul.f32 %v2949_v20, %v2204_v37  ;;  %vm2211_vm5 = vweird.f32 %v2949_v20 }
0x1824   :  { %vm2212_vm7 = vmor %vm2210_vm6, %vm2211_vm5  ;;  %vm1407_vm5 = vcmask 25600  }
0x1825   :  { %v2207_v15 = vsub.f32 1.0, %v2206_v34 }
0x1827   :  { %v2208_v17 = vmul.f32 %v2949_v20, %v2207_v15 }
0x1829   :  { %v2209_v14 = vadd.f32 %v2949_v20, %v2208_v17 }
0x182b   :  { %v2213_v41 = vsel %vm2212_vm7, %v2949_v20, %v2209_v14 }
0x182c   :  { %v2218_v8 = vsel %vm2215_vm9, %v2217_v52, %v2213_v41 }
0x182d   :  { %v2221_v58 = vmul.f32 %v2218_v8, %v4005_v55 }
0x187e   :  { %v2122_v53 = vpop.permute.xlu0 %2121 }
0x187f   :  { %v2124_v44 = vmul.f32 %v2122_v53, %v2105_v2  ;;  %v3042_v2 = vld [vmem:[%s4323_s15 + $0x30] sm:$0xff] }
0x1881   :  { %2126 = vrot.lane.b32.xlu1 %v2124_v44, %s4379_s19 }
0x188a   :  { %v2224_v46 = vpop.permute.xlu0 %2223 }
0x188b   :  { %v2226_v54 = vmul.f32 %v2224_v46, %v2218_v8 }
0x188d   :  { %2228 = vrot.lane.b32.xlu1 %v2226_v54, %s4377_s23  ;;  %v3047_v54 = vld [vmem:[%s4322_s16] ss:$0 sm:$0xff] }
0x18f3   :  { %v2127_v50 = vpop.permute.xlu1 %2126 }
0x18f4   :  { %2714 = vmatmul.msk.f32.vlgmr.msra.gmra.mxu2 %vm181_vm1, %v2127_v50  ;;  %2722 = vmatmul.msk.f32.vlgmr.msra.gmra.mxu0 %vm181_vm1, %v2127_v50 }
0x18f5   :  { %2447 = vmatpush.msra.mxu2 %v3036_v16 }
0x18f7   :  { %2448 = vmatpush.msra.mxu2 %v3037_v13 }
0x18f9   :  { %2449 = vmatpush.msra.mxu2 %v3038_v12 }
0x18fb   :  { %2450 = vmatpush.msra.mxu2 %v3039_v33 }
0x18fc   :  { %2719 = vmatmul.msk.f32.vlgmr.msrb.gmra.mxu2 %vm181_vm1, %v4064_v31 }
0x18ff   :  { %v2229_v40 = vpop.permute.xlu1 %2228 }
0x1900   :  { %v4129_v22 = vadd.f32 %v2229_v40, %v2221_v58 }
0x1902   :  { %2950 = vtanh.f32 %v4129_v22 }
0x1908   :  { %v2951_v9 = vpop.eup %2950 }
0x1909   :  { %2234 = vrot.lane.b32.xlu2 %v2951_v9, %s4377_s23 }
0x1963   :  { %v2235_v43 = vpop.permute.xlu2 %2234 }
0x1964   :  { %v2237_v5 = vmul.f32 %v2235_v43, %v2218_v8 }
0x1966   :  { %2239 = vrot.lane.b32.xlu0 %v2237_v5, %s4379_s19 }
0x1977   :  { %v2147_v38 = vpop.f32.mrf.mxu2 }
0x1978   :  { %v2148_v31 = vadd.f32 %v3040_v18, %v2147_v38 }
0x197a   :  { %2952 = vtanh.f32 %v2148_v31 }
0x197f   :  { %v2280_v11 = vpop.f32.mrf.mxu2 }
0x1980   :  { %v2953_v55 = vpop.eup %2952 }
0x1981   :  { %2715 = vmatmul.msk.f32.vlgmr.msra.gmra.mxu3 %vm181_vm1, %v2953_v55  ;;  %v1252_v55 = vsel %vm87_vm14, %v3683_v59, 0.0  ;;  %v4206_v59 = vld [vmem:[%s4322_s16 + $0x1] ss:$0 sm:$0xff] }
0x1982   :  { %2507 = vmatpush.msra.mxu3 %v3041_v63 }
0x1984   :  { %2508 = vmatpush.msra.mxu3 %v3042_v2  ;;  %v4384_v2 = vperm.slane %v3712_v35, 0 }
0x1986   :  { %2509 = vmatpush.msra.mxu3 %v3043_v60 }
0x1988   :  { %2510 = vmatpush.msra.mxu3 %v3044_v1 }
0x19d8   :  { %v2240_v7 = vpop.permute.xlu0 %2239 }
0x19d9   :  { %2612 = vst.msk [vmem:[#allocation2] sm:$0x3] %vm80_vm0, %v2240_v7  ;;  %2718 = vmatmul.msk.f32.vlgmr.msrb.gmra.mxu1 %vm181_vm1, %v2240_v7  ;;  %v4385_v7 = vperm.slane %v3712_v35, 1 }
0x19da   :  { %2572 = vmatpush.msrb.mxu1 %v3927_v32 }
0x19dc   :  { %2573 = vmatpush.msrb.mxu1 %v3933_v25 }
0x19de   :  { %2574 = vmatpush.msrb.mxu1 %v3938_v42  ;;  %v4382_v42 = vperm.slane %v3644_v47, 0 }
0x19e0   :  { %2575 = vmatpush.msrb.mxu1 %v3944_v4  ;;  %v2427_v4 = vmul.f32 %v3674_v62, %v4382_v42 }
0x1a04   :  { %v2171_v56 = vpop.f32.mrf.mxu3 }
0x1a05   :  { %v2172_v49 = vadd.f32 %v3045_v19, %v2171_v56 }
0x1a07   :  { %2724 = vmatmul.msk.f32.vlgmr.msra.gmra.mxu1 %vm181_vm1, %v2172_v49  ;;  %v1306_v49 = vadd.f32 %v4206_v59, %v3878_v45  ;;  %v4218_v45 = vld [vmem:[%s4329_s21] ss:$0 sm:$0xff] }
0x1a56   :  { %v2260_v3 = vpop.f32.mrf.mxu1 }
0x1a57   :  { %v2281_v36 = vadd.f32 %v2280_v11, %v2260_v3 }
0x1a59   :  { %v2283_v39 = vadd.f32 %v3885_v6, %v2281_v36 }
0x1a5b   :  { %2954 = vtanh.f32 %v2283_v39  ;;  %v2720_v20 = vmul.f32 -1.442695, %v2283_v39  ;;  %v1381_v39 = vadd.f32 %v4218_v45, %v3988_v30  ;;  %v4232_v30 = vld [vmem:[%s4387_s0] ss:$0 sm:$0xff] }
0x1a61   :  { %v2955_v32 = vpop.eup %2954 }
0x1a62   :  { %2306 = vrot.lane.b32.xlu1 %v2955_v32, %s4377_s23  ;;  %v4225_v32 = vld [vmem:[%s4386_s17] ss:$0 sm:$0xff] }
0x1a84   :  { %v2424_v25 = vpop.f32.mrf.mxu1 }
0x1a85   :  { %v4168_v26 = vadd.f32 %v3046_v57, %v2424_v25 }
0x1a87   :  { %v2428_v6 = vadd.f32 %v2427_v4, %v4168_v26 }
0x1a89   :  { %v2430_v0 = vadd.f32 %v2429_v28, %v2428_v6 }
0x1a8b   :  { %2956 = vtanh.f32 %v2430_v0 }
0x1a8c   :  { %2958 = vpow2.f32 %v2720_v20 }
0x1a91   :  { %v2957_v37 = vpop.eup %2956 }
0x1a92   :  { %2725 = vmatmul.msk.f32.vlgmr.msra.gmra.mxu2 %vm181_vm1, %v2957_v37  ;;  %v2959_v62 = vpop.eup %2958 }
0x1a93   :  { %v2287_v34 = vadd.f32 1.0, %v2959_v62  ;;  %v1349_v62 = vadd.f32 %v4232_v30, %v3876_v24  ;;  %v3048_v24 = vld [vmem:[%s4370_s2] sm:$0x3] }
0x1a95   :  { %2960 = vrcp.f32 %v2287_v34  ;;  %v2299_v47 = vand.u32 2147483648, %v2287_v34  ;;  %vm2293_vm11 = vweird.f32 %v2287_v34  ;;  %v2297_v29 = vand.u32 2147483647, %v2287_v34 }
0x1a97   :  { %v2300_v48 = vor.u32 1.1754944e-38, %v2299_v47  ;;  %vm2298_vm13 = vcmp.eq.f32.partialorder %v2297_v29, 8.507059e+37 }
0x1a9b   :  { %v2961_v15 = vpop.eup %2960 }
0x1a9c   :  { %v2289_v53 = vmul.f32 %v2961_v15, %v2287_v34  ;;  %vm2294_vm10 = vweird.f32 %v2961_v15 }
0x1a9d   :  { %vm2295_vm12 = vmor %vm2293_vm11, %vm2294_vm10 }
0x1a9e   :  { %v2290_v44 = vsub.f32 1.0, %v2289_v53 }
0x1aa0   :  { %v2291_v17 = vmul.f32 %v2961_v15, %v2290_v44 }
0x1aa2   :  { %v2292_v14 = vadd.f32 %v2961_v15, %v2291_v17  ;;  %v4241_v17 = vld [vmem:[%s4388_s6] ss:$0 sm:$0xff] }
0x1aa4   :  { %v2296_v61 = vsel %vm2295_vm12, %v2961_v15, %v2292_v14 }
0x1aa5   :  { %v2301_v52 = vsel %vm2298_vm13, %v2300_v48, %v2296_v61 }
0x1aa6   :  { %v2304_v33 = vmul.f32 %v2301_v52, %v4056_v21 }
0x1ad4   :  { %v2307_v41 = vpop.permute.xlu1 %2306 }
0x1ad5   :  { %v2309_v8 = vmul.f32 %v2307_v41, %v2301_v52 }
0x1ad7   :  { %2311 = vrot.lane.b32.xlu2 %v2309_v8, %s4377_s23 }
0x1b15   :  { %v2452_v46 = vpop.f32.mrf.mxu2 }
0x1b16   :  { %v2453_v50 = vadd.f32 %v3047_v54, %v2452_v46 }
0x1b18   :  { %2962 = vtanh.f32 %v2453_v50 }
0x1b1e   :  { %v2963_v16 = vpop.eup %2962 }
0x1b1f   :  { %v2456_v13 = vmul.f32 1.442695, %v2963_v16  ;;  %v2464_v36 = vsel %vm87_vm14, %v2963_v16, 0.0 }
0x1b21   :  { %2964 = vpow2.f32 %v2456_v13 }
0x1b27   :  { %v2965_v12 = vpop.eup %2964 }
0x1b28   :  { %2459 = vrot.lane.b32.xlu0 %v2965_v12, %s3057_s24  ;;  %v2363_v12 = vpop.f32.mrf.mxu0 }
0x1b31   :  { %v2312_v58 = vpop.permute.xlu2 %2311 }
0x1b32   :  { %v4181_v40 = vadd.f32 %v2312_v58, %v2304_v33 }
0x1b34   :  { %2966 = vtanh.f32 %v4181_v40 }
0x1b35   :  { %2968 = vtanh.f32 %v4168_v26 }
0x1b36   :  { %2970 = vtanh.f32 %v1306_v49 }
0x1b37   :  { %2972 = vtanh.f32 %v1381_v39 }
0x1b3a   :  { %v2967_v9 = vpop.eup %2966 }
0x1b3b   :  { %2317 = vrot.lane.b32.xlu1 %v2967_v9, %s4377_s23  ;;  %v2969_v21 = vpop.eup %2968  ;;  %v3049_v9 = vld [vmem:[%s4372_s5 + $0x2] ss:$0 sm:$0xff] }
0x1b3c   :  { %v2971_v35 = vpop.eup %2970 }
0x1b3d   :  { %v1317_v3 = vsel %vm87_vm14, %v2971_v35, 0.0  ;;  %v2973_v25 = vpop.eup %2972  ;;  %v1309_v37 = vmul.f32 1.442695, %v2971_v35 }
0x1b3e   :  { %v1387_v42 = vmul.f32 %v2973_v25, %v4225_v32 }
0x1b40   :  { %v1388_v4 = vand.u32 2147483647, %v1387_v42 }
0x1b42   :  { %2974 = vrcp.f32 %v1388_v4  ;;  %v1403_v61 = vand.u32 2147483648, %v1388_v4  ;;  %vm1402_vm4 = vcmp.eq.f32.partialorder %v1388_v4, 8.507059e+37 }
0x1b44   :  { %v1404_v54 = vor.u32 1.1754944e-38, %v1403_v61 }
0x1b48   :  { %v2975_v27 = vpop.eup %2974 }
0x1b49   :  { %v1393_v20 = vmul.f32 %v2975_v27, %v1388_v4  ;;  %vm1398_vm15 = vweird.f32 %v2975_v27 }
0x1b4b   :  { %v1394_v34 = vsub.f32 1.0, %v1393_v20 }
0x1b9a   :  { %v2460_v43 = vpop.permute.xlu0 %2459 }
0x1b9b   :  { %v2462_v5 = vmul.f32 %v4095_v10, %v2460_v43 }
0x1b9d   :  { %v4186_v38 = vadd.f32 %v2462_v5, %v2453_v50 }
0x1b9f   :  { %2480 = vperm.xlu0 %2750, %v4186_v38   ;;  %2470 = vperm.xlu2 %2749, %v4186_v38  }
0x1ba7   :  { %2556 = vrot.lane.b32.xlu0 %v2969_v21, %s4379_s19 }
0x1bad   :  { %v2318_v18 = vpop.permute.xlu1 %2317 }
0x1bae   :  { %v2320_v31 = vmul.f32 %v2318_v18, %v2301_v52 }
0x1bb0   :  { %2322 = vrot.lane.b32.xlu1 %v2320_v31, %s4379_s19 }
0x1bd1   :  { %1253 = vadd.xlane.f32.xlu0 %v1252_v55 }
0x1bf9   :  { %v2471_v63 = vpop.permute.xlu2 %2470 }
0x1bfa   :  { %v2473_v60 = vmul.f32 %v2471_v63, %v4384_v2 }
0x1bfc   :  { %2475 = vrot.lane.b32.xlu2 %v2473_v60, %s4377_s23 }
0x1c11   :  { %v2481_v1 = vpop.permute.xlu0 %2480 }
0x1c12   :  { %v2483_v56 = vmul.f32 %v2481_v1, %v4385_v7 }
0x1c14   :  { %2485 = vrot.lane.b32.xlu1 %v2483_v56, %s4377_s23 }
0x1c19   :  { %v2557_v19 = vpop.permute.xlu0 %2556 }
0x1c1a   :  { %2728 = vmatmul.msk.f32.vlgmr.msrb.gmra.mxu1 %vm181_vm1, %v2557_v19 }
0x1c1c   :  { %2530 = vrot.lane.b32.xlu1 %v2969_v21, %s4377_s23 }
0x1c22   :  { %v2323_v11 = vpop.permute.xlu1 %2322 }
0x1c23   :  { %2619 = vst.msk [vmem:[#allocation2 + $0x2] sm:$0x3] %vm80_vm0, %v2323_v11  ;;  %2721 = vmatmul.msk.f32.vlgmr.msrb.gmra.mxu3 %vm181_vm1, %v2323_v11 }
0x1c24   :  { %1313 = vrot.lane.b32.xlu1 %v1306_v49, %s3059_s22 }
0x1c4e   :  { %1318 = vadd.xlane.f32.xlu1 %v1317_v3 }
0x1c56   :  { %2465 = vadd.xlane.f32.xlu1 %v2464_v36  ;;  %v2476_v57 = vpop.permute.xlu2 %2475 }
0x1c57   :  { %v2478_v28 = vadd.f32 %v2476_v57, %v4168_v26  ;;  %v1395_v26 = vmul.f32 %v2975_v27, %v1394_v34 }
0x1c59   :  { %v1396_v14 = vadd.f32 %v2975_v27, %v1395_v26 }
0x1c86   :  { %v2486_v6 = vpop.permute.xlu1 %2485 }
0x1c87   :  { %v2488_v0 = vadd.f32 %v2486_v6, %v2478_v28 }
0x1c89   :  { %2976 = vtanh.f32 %v2488_v0 }
0x1c8a   :  { %2978 = vpow2.f32 %v1309_v37 }
0x1c8b   :  { %2980 = vtanh.f32 %v1349_v62 }
0x1c8e   :  { %v2531_v15 = vpop.permute.xlu1 %2530 }
0x1c8f   :  { %v2977_v53 = vpop.eup %2976  ;;  %2727 = vmatmul.msk.f32.vlgmr.msrb.gmra.mxu0 %vm1328_vm8, %v2531_v15  ;;  %vm1397_vm8 = vweird.f32 %v1388_v4 }
0x1c90   :  { %2491 = vrot.lane.b32.xlu2 %v2977_v53, %s3058_s14  ;;  %v2979_v44 = vpop.eup %2978  ;;  %vm1399_vm3 = vmor %vm1397_vm8, %vm1398_vm15  ;;  %vm2636_vm15 = vcmask 7168  }
0x1c91   :  { %v2981_v47 = vpop.eup %2980  ;;  %v1311_v29 = vmul.f32 %v3048_v24, %v2979_v44  ;;  %v1400_v8 = vsel %vm1399_vm3, %v2975_v27, %v1396_v14 }
0x1c92   :  { %v1355_v52 = vmul.f32 %v2981_v47, %v4241_v17  ;;  %v1405_v16 = vsel %vm1402_vm4, %v1404_v54, %v1400_v8 }
0x1c96   :  { %v1314_v48 = vpop.permute.xlu1 %1313 }
0x1c97   :  { %v1316_v41 = vadd.f32 %v1314_v48, %v1311_v29 }
0x1c99   :  { %v1390_v46 = vsel %vm1389_vm2, %v1316_v41, %v3698_v51 }
0x1c9a   :  { %v1391_v50 = vsub.f32 %v1390_v46, %v1355_v52 }
0x1c9c   :  { %v1406_v13 = vmul.f32 %v1405_v16, %v1391_v50 }
0x1c9e   :  { %1408 = vst.msk [vmem:[%s4389_s20] sm:$0x3] %vm1407_vm5, %v1406_v13  ;;  %v1409_v36 = vmul.f32 %v1406_v13, %v1406_v13 }
0x1ca0   :  { %v1410_v39 = vsel %vm1407_vm5, %v1409_v36, 0.0 }
0x1ca6   :  { %v2343_v33 = vpop.f32.mrf.mxu3 }
0x1ca7   :  { %v2364_v58 = vadd.f32 %v2363_v12, %v2343_v33  ;;  %v1254_v33 = vpop.xlane.xlu0 %1253 }
0x1ca9   :  { %v2366_v43 = vadd.f32 %v3049_v9, %v2364_v58 }
0x1cab   :  { %2982 = vtanh.f32 %v2366_v43  ;;  %v2723_v5 = vmul.f32 -1.442695, %v2366_v43 }
0x1cad   :  { %2984 = vpow2.f32 %v2723_v5 }
0x1cb1   :  { %v2983_v51 = vpop.eup %2982 }
0x1cb2   :  { %2389 = vrot.lane.b32.xlu2 %v2983_v51, %s4377_s23 }
0x1cb3   :  { %v2985_v21 = vpop.eup %2984 }
0x1cb4   :  { %v2370_v31 = vadd.f32 1.0, %v2985_v21 }
0x1cb6   :  { %2986 = vrcp.f32 %v2370_v31  ;;  %v2382_v7 = vand.u32 2147483648, %v2370_v31  ;;  %vm2376_vm7 = vweird.f32 %v2370_v31  ;;  %v2380_v56 = vand.u32 2147483647, %v2370_v31 }
0x1cb8   :  { %v2383_v49 = vor.u32 1.1754944e-38, %v2382_v7  ;;  %vm2381_vm10 = vcmp.eq.f32.partialorder %v2380_v56, 8.507059e+37 }
0x1cbc   :  { %v2987_v55 = vpop.eup %2986 }
0x1cbd   :  { %v2372_v63 = vmul.f32 %v2987_v55, %v2370_v31  ;;  %vm2377_vm6 = vweird.f32 %v2987_v55 }
0x1cbe   :  { %vm2378_vm9 = vmor %vm2376_vm7, %vm2377_vm6 }
0x1cbf   :  { %v2373_v2 = vsub.f32 1.0, %v2372_v63 }
0x1cc1   :  { %v2374_v60 = vmul.f32 %v2987_v55, %v2373_v2 }
0x1cc3   :  { %v2375_v1 = vadd.f32 %v2987_v55, %v2374_v60 }
0x1cc5   :  { %v2379_v19 = vsel %vm2378_vm9, %v2987_v55, %v2375_v1 }
0x1cc6   :  { %v4258_v11 = vsel %vm2381_vm10, %v2383_v49, %v2379_v19 }
0x1cc7   :  { %v2387_v25 = vmul.f32 %v4258_v11, %v4099_v23  ;;  %v2577_v23 = vpop.f32.mrf.mxu1 }
0x1cc8   :  { %v2578_v37 = vadd.f32 %v4218_v45, %v2577_v23 }
0x1cea   :  { %v2492_v18 = vpop.permute.xlu2 %2491 }
0x1ceb   :  { %2726 = vmatmul.msk.f32.vlgmr.msra.gmra.mxu3 %vm181_vm1, %v2492_v18 }
0x1d0c   :  { %v2390_v35 = vpop.permute.xlu2 %2389  ;;  %v2551_v15 = vpop.f32.mrf.mxu0 }
0x1d0d   :  { %v2392_v3 = vmul.f32 %v2390_v35, %v4258_v11  ;;  %v2552_v44 = vadd.f32 %v4232_v30, %v2551_v15 }
0x1d0f   :  { %2394 = vrot.lane.b32.xlu2 %v2392_v3, %s4377_s23 }
0x1d38   :  { %1411 = vadd.xlane.f32.xlu2 %v1410_v39 }
0x1d69   :  { %v2395_v42 = vpop.permute.xlu2 %2394 }
0x1d6a   :  { %v4265_v4 = vadd.f32 %v2395_v42, %v2387_v25 }
0x1d6c   :  { %2988 = vtanh.f32 %v4265_v4 }
0x1d6e   :  { %v2512_v57 = vpop.f32.mrf.mxu3 }
0x1d6f   :  { %v2513_v27 = vadd.f32 %v4206_v59, %v2512_v57 }
0x1d71   :  { %2990 = vtanh.f32 %v2513_v27  ;;  %2520 = vrot.lane.b32.xlu2 %v2513_v27, %s3059_s22 }
0x1d72   :  { %v2989_v28 = vpop.eup %2988  ;;  %2992 = vtanh.f32 %v2578_v37 }
0x1d73   :  { %2400 = vrot.lane.b32.xlu0 %v2989_v28, %s4377_s23 }
0x1d77   :  { %v2991_v6 = vpop.eup %2990 }
0x1d78   :  { %v2524_v0 = vsel %vm87_vm14, %v2991_v6, 0.0  ;;  %v2993_v59 = vpop.eup %2992  ;;  %v2516_v53 = vmul.f32 1.442695, %v2991_v6 }
0x1d79   :  { %2525 = vadd.xlane.f32.xlu1 %v2524_v0  ;;  %2621 = vrot.lane.b32.xlu2 %v4181_v40, %s3058_s14  ;;  %v2581_v20 = vmul.f32 %v2993_v59, %v4225_v32 }
0x1d7b   :  { %v2582_v62 = vand.u32 2147483647, %v2581_v20 }
0x1d7d   :  { %2994 = vrcp.f32 %v2582_v62  ;;  %v2596_v61 = vand.u32 2147483648, %v2582_v62  ;;  %vm2590_vm11 = vweird.f32 %v2582_v62  ;;  %vm2595_vm13 = vcmp.eq.f32.partialorder %v2582_v62, 8.507059e+37 }
0x1d7e   :  { %2996 = vpow2.f32 %v2516_v53 }
0x1d7f   :  { %2998 = vtanh.f32 %v2552_v44  ;;  %v2597_v46 = vor.u32 1.1754944e-38, %v2596_v61 }
0x1d83   :  { %v2995_v34 = vpop.eup %2994 }
0x1d84   :  { %v2586_v26 = vmul.f32 %v2995_v34, %v2582_v62  ;;  %v2997_v32 = vpop.eup %2996  ;;  %vm2591_vm1 = vweird.f32 %v2995_v34 }
0x1d85   :  { %v2999_v24 = vpop.eup %2998  ;;  %v2518_v29 = vmul.f32 %v4095_v10, %v2997_v32  ;;  %vm2592_vm12 = vmor %vm2590_vm11, %vm2591_vm1 }
0x1d86   :  { %v2587_v40 = vsub.f32 1.0, %v2586_v26  ;;  %v2555_v41 = vmul.f32 %v2999_v24, %v4241_v17  ;;  %v1319_v17 = vpop.xlane.xlu1 %1318 }
0x1d87   :  { %v1320_v51 = vadd.f32 %v1319_v17, %v1254_v33 }
0x1d88   :  { %v2588_v45 = vmul.f32 %v2995_v34, %v2587_v40 }
0x1d8a   :  { %v2589_v47 = vadd.f32 %v2995_v34, %v2588_v45 }
0x1d8c   :  { %v2593_v52 = vsel %vm2592_vm12, %v2995_v34, %v2589_v47 }
0x1d8d   :  { %v2598_v50 = vsel %vm2595_vm13, %v2597_v46, %v2593_v52 }
0x1d92   :  { %2614 = vrot.lane.b32.xlu1 %v4129_v22, %s3058_s14  ;;  %v4390_v22 = vmov 0.0  }
0x1d93   :  { %88 = vst.msk [vmem:[%s4391_s25] sm:$0x3] %vm87_vm14, %v4390_v22 }
0x1d9a   :  { %v2635_v56 = vld [vmem:[%s4391_s25] sm:$0x3] }
0x1dab   :  { %v1412_v14 = vpop.xlane.xlu2 %1411 }
0x1dac   :  { %v1413_v55 = vmul.f32 -0.5, %v1412_v14 }
0x1dae   :  { %v1414_v1 = vadd.f32 -3.675754, %v1413_v55 }
0x1dcb   :  { %v2521_v48 = vpop.permute.xlu2 %2520 }
0x1dcc   :  { %v2523_v30 = vadd.f32 %v2521_v48, %v2518_v29 }
0x1dce   :  { %v2583_v8 = vsel %vm1389_vm2, %v2523_v30, %v4186_v38  ;;  %v2466_v38 = vpop.xlane.xlu1 %2465 }
0x1dcf   :  { %v2584_v54 = vsub.f32 %v2583_v8, %v2555_v41 }
0x1dd1   :  { %v2599_v16 = vmul.f32 %v2598_v50, %v2584_v54 }
0x1dd3   :  { %v2622_v13 = vpop.permute.xlu2 %2621  ;;  %v2602_v12 = vmul.f32 %v2599_v16, %v2599_v16  ;;  %2729 = vst.msk [vmem:[%s4389_s20 + $0x2] sm:$0x3] %vm1407_vm5, %v2599_v16 }
0x1dd4   :  { %2624 = vst.msk [vmem:[#allocation3 + $0x2] sm:$0x3] %vm80_vm0, %v2622_v13 }
0x1dd5   :  { %v2603_v10 = vsel %vm1407_vm5, %v2602_v12, 0.0 }
0x1dd6   :  { %2604 = vadd.xlane.f32.xlu0 %v2603_v10 }
0x1de5   :  { %v2401_v58 = vpop.permute.xlu0 %2400 }
0x1de6   :  { %v2403_v9 = vmul.f32 %v2401_v58, %v4258_v11 }
0x1de8   :  { %2626 = vrot.lane.b32.xlu2 %v2403_v9, %s4379_s19 }
0x1dec   :  { %v2526_v43 = vpop.xlane.xlu1 %2525 }
0x1ded   :  { %v2527_v5 = vadd.f32 %v2526_v43, %v2466_v38 }
0x1def   :  { %v2608_v21 = vadd.f32 %v2527_v5, %v1320_v51 }
0x1df0   :  { %2631 = vrot.lane.b32.xlu2 %v4265_v4, %s3058_s14 }
0x1e04   :  { %v2615_v18 = vpop.permute.xlu1 %2614 }
0x1e05   :  { %2617 = vst.msk [vmem:[#allocation3] sm:$0x3] %vm80_vm0, %v2615_v18 }
0x1e42   :  { %v2627_v31 = vpop.permute.xlu2 %2626 }
0x1e43   :  { %2629 = vst.msk [vmem:[#allocation2 + $0x4] sm:$0x3] %vm80_vm0, %v2627_v31 }
0x1e49   :  { %v2605_v63 = vpop.xlane.xlu0 %2604 }
0x1e4a   :  { %v2606_v2 = vmul.f32 -0.5, %v2605_v63  ;;  %v2632_v60 = vpop.permute.xlu2 %2631 }
0x1e4b   :  { %2634 = vst.msk [vmem:[#allocation3 + $0x4] sm:$0x3] %vm80_vm0, %v2632_v60 }
0x1e4c   :  { %v2607_v7 = vadd.f32 -3.675754, %v2606_v2 }
0x1e4e   :  { %v2609_v19 = vadd.f32 %v2607_v7, %v1414_v1 }
0x1e50   :  { %v2637_v49 = vsel %vm2636_vm15, %v2608_v21, %v2609_v19 }
0x1e51   :  { %v2638_v11 = vadd.f32 %v2637_v49, %v2635_v56 }
0x1e53   :  { %2639 = vst.msk [vmem:[%s4391_s25] sm:$0x3] %vm87_vm14, %v2638_v11 }

</bundles_post_ra>
